<compile_context>
chip_gen: v5e
topology: v5e:2x2
jax: 0.10.0
libtpu: 0.0.40
codegen_flags: <defaults>
</compile_context>

<pallas_src>
import functools

import jax
import jax.numpy as jnp
from jax.experimental import pallas as pl
from jax.experimental.pallas import tpu as pltpu

LANE = 128
SUBLANE = 8


def _rup(x, m):
    return ((x + m - 1) // m) * m


def _rnn_lm_loss_kernel(emb_ref, tgt_ref,
                        wih0_ref, whh0_ref, b0_ref,
                        wihr_ref, whhr_ref, br_ref,
                        wdec_ref, bdec_ref,
                        loss_ref, seq_ref,
                        *, num_layers, batch_p, steps):
    f32, bf16 = jnp.float32, jnp.bfloat16
    L, Bp, T = num_layers, batch_p, steps
    Hp = seq_ref.shape[1]

    # ---- layer-0 input projection hoisted over all decoded timesteps:
    #      one batched MXU matmul; bias pre-summed (b_ih + b_hh) in the wrapper.
    seq_ref[...] = (jnp.dot(emb_ref[...], wih0_ref[...],
                            preferred_element_type=f32)
                    + b0_ref[...]).astype(bf16)

    # ---- wavefront recurrence: all cells (l, t) with l + t == d processed together.
    # Cells on a diagonal are independent, so their matmuls issue back-to-back; the
    # serial chain is T + L - 1 diagonals instead of T * L dependent steps.
    # state[l] = h of layer l at its latest timestep, kept bf16 (every consumer is a
    # bf16 MXU operand; accumulation inside each cell stays f32).
    # TODO(synk): for large S/L replace the static unroll with lax.fori_loop over
    # diagonals (unroll=4..8) plus pl.multiple_of on the dynamic row offsets.
    state = [jnp.zeros((Bp, Hp), bf16) for _ in range(L)]
    for d in range(T + L - 1):
        new = {}
        for l in range(max(0, d - (T - 1)), min(L - 1, d) + 1):
            t = d - l
            if l == 0:
                acc = (seq_ref[pl.ds(t * Bp, Bp), :].astype(f32)
                       + jnp.dot(state[0], whh0_ref[...],
                                 preferred_element_type=f32))
            else:
                # TODO(synk): keep W_ih/W_hh resident in the MXU across the wavefront
                # (pltpu.matmul_push_rhs / matmul_acc_lhs) if the compiler re-streams them.
                acc = (jnp.dot(state[l - 1], wihr_ref[l - 1],
                               preferred_element_type=f32)
                       + jnp.dot(state[l], whhr_ref[l - 1],
                                 preferred_element_type=f32)
                       + br_ref[l - 1])
            new[l] = jnp.tanh(acc).astype(bf16)
        for l, h in new.items():          # update states only after all reads
            state[l] = h
            if l == L - 1:
                # Last-layer output feeds the decoder; overwrite the (already consumed)
                # layer-0 pre-activation block in place.
                seq_ref[pl.ds((d - l) * Bp, Bp), :] = h

    # ---- lm_decoder + masked cross-entropy on exactly the decoded rows.
    # TODO(synk): at realistic vocab sizes, block this matmul + an online logsumexp
    # over vocab chunks (grid axis, 'parallel' for v7x's 2 TCs) so w_dec never has to
    # be fully VMEM-resident and its DMA overlaps the latency-bound recurrence.
    logits = (jnp.dot(seq_ref[...], wdec_ref[...], preferred_element_type=f32)
              + bdec_ref[...])                                    # (T*Bp, Vp) f32
    tgt = tgt_ref[...]                                            # (T*Bp, 1), -1 = ignore
    valid = (tgt >= 0).astype(f32)                                # (T*Bp, 1)
    m = jnp.max(logits, axis=-1, keepdims=True)
    lse = jnp.log(jnp.sum(jnp.exp(logits - m), axis=-1, keepdims=True))
    lane = jax.lax.broadcasted_iota(jnp.int32, logits.shape, 1)
    picked = jnp.sum(jnp.where(lane == tgt, logits, 0.0),
                     axis=-1, keepdims=True)
    nll = jnp.sum(valid * (m + lse - picked))                     # logp never materialized
    cnt = jnp.maximum(jnp.sum(valid), 1.0)                        # guard all-ignored case
    loss_ref[...] = jnp.full((1, 1), nll / cnt, dtype=f32)


def init_params(key, vocab_size, emb_dim, hidden_dim, num_layers=4):
    """Deterministic synthetic parameters matching the torch module's shapes."""
    stdv = 1.0 / float(hidden_dim) ** 0.5
    keys = iter(jax.random.split(key, 32))
    u = lambda shp: jax.random.uniform(next(keys), shp, jnp.float32, -stdv, stdv)
    p = {}
    p["embedding"] = jax.random.normal(next(keys), (vocab_size, emb_dim), jnp.float32)
    # layer 0 (input size = emb_dim); weights stored transposed (in, out) for x @ W
    p["w_ih0"] = u((emb_dim, hidden_dim))
    p["w_hh0"] = u((hidden_dim, hidden_dim))
    p["b_ih0"] = u((1, hidden_dim))
    p["b_hh0"] = u((1, hidden_dim))
    wih, whh, bih, bhh = [], [], [], []
    for _ in range(num_layers - 1):
        wih.append(u((hidden_dim, hidden_dim)))
        whh.append(u((hidden_dim, hidden_dim)))
        bih.append(u((1, hidden_dim)))
        bhh.append(u((1, hidden_dim)))
    p["w_ih_rest"] = jnp.stack(wih)      # (L-1, H, H)
    p["w_hh_rest"] = jnp.stack(whh)      # (L-1, H, H)
    p["b_ih_rest"] = jnp.stack(bih)      # (L-1, 1, H)
    p["b_hh_rest"] = jnp.stack(bhh)      # (L-1, 1, H)
    p["w_dec"] = u((hidden_dim, vocab_size))
    p["b_dec"] = u((1, vocab_size))
    return p


@functools.partial(jax.jit, static_argnames=("num_layers", "pad_idx"))
def rnn_lm_loss(context, params, num_layers=4, pad_idx=-1):
    """Pallas-backed forward pass of RNN_language_model (returns scalar loss).
    Requires seq_len >= 2 (same precondition as the torch module's loss)."""
    bf16 = jnp.bfloat16
    ctx_t = context.T.astype(jnp.int32)                       # (S, B) time-major
    S, B = ctx_t.shape
    T = S - 1                      # torch drops the last timestep before the loss
    E = params["embedding"].shape[1]
    H = params["w_hh0"].shape[0]
    V = params["w_dec"].shape[1]

    Ep, Hp, Vp = _rup(E, LANE), _rup(H, LANE), _rup(V, LANE)
    Bp = _rup(B, SUBLANE)          # sublane-aligned per-timestep row block
    rows = T * Bp

    # --- glue: embedding gather for the T decoded input timesteps; per-timestep batch
    #     rows padded to 8 sublanes, feature lanes zero-padded; bf16 MXU operand.
    emb = jnp.take(params["embedding"], ctx_t[:T], axis=0)    # (T, B, E)
    emb = jnp.pad(emb, ((0, 0), (0, Bp - B), (0, Ep - E)))
    emb = emb.reshape(rows, Ep).astype(bf16)
    # TODO(synk): nn.Dropout(p=0.001) treated as identity (eval-mode); no dropout mask.

    # --- glue: int32 targets; -1 encodes "ignore" (pad_idx targets + padded batch rows)
    tgt = ctx_t[1:]                                           # (T, B)
    tgt = jnp.where(tgt == pad_idx, -1, tgt)
    tgt = jnp.pad(tgt, ((0, 0), (0, Bp - B)), constant_values=-1)
    tgt = tgt.reshape(rows, 1)

    # --- parameter prep: zero-pad to lane-dense shapes, pre-sum biases, bf16 weights
    w_ih0 = jnp.pad(params["w_ih0"], ((0, Ep - E), (0, Hp - H))).astype(bf16)
    w_hh0 = jnp.pad(params["w_hh0"], ((0, Hp - H), (0, Hp - H))).astype(bf16)
    b0 = jnp.pad(params["b_ih0"] + params["b_hh0"], ((0, 0), (0, Hp - H)))
    w_ihr = jnp.pad(params["w_ih_rest"], ((0, 0), (0, Hp - H), (0, Hp - H))).astype(bf16)
    w_hhr = jnp.pad(params["w_hh_rest"], ((0, 0), (0, Hp - H), (0, Hp - H))).astype(bf16)
    br = jnp.pad(params["b_ih_rest"] + params["b_hh_rest"],
                 ((0, 0), (0, 0), (0, Hp - H)))
    w_dec = jnp.pad(params["w_dec"], ((0, Hp - H), (0, Vp - V))).astype(bf16)
    b_dec = jnp.pad(params["b_dec"], ((0, 0), (0, Vp - V)), constant_values=-1e9)

    kernel = functools.partial(_rnn_lm_loss_kernel,
                               num_layers=num_layers, batch_p=Bp, steps=T)
    args = (emb, tgt, w_ih0, w_hh0, b0, w_ihr, w_hhr, br, w_dec, b_dec)

    flops = (2 * rows * Ep * Hp                               # hoisted layer-0 projection
             + 2 * T * Bp * Hp * Hp                           # layer-0 recurrence cells
             + 4 * (num_layers - 1) * T * Bp * Hp * Hp        # wavefront cells, l >= 1
             + 2 * rows * Hp * Vp)                            # decoder
    transcendentals = num_layers * T * Bp * Hp + rows * Vp
    bytes_accessed = sum(int(a.size) * a.dtype.itemsize for a in args) + 4

    vmem = lambda: pl.BlockSpec(memory_space=pltpu.MemorySpace.VMEM)
    loss = pl.pallas_call(
        kernel,
        out_shape=jax.ShapeDtypeStruct((1, 1), jnp.float32),
        in_specs=[vmem() for _ in range(len(args))],
        out_specs=vmem(),
        scratch_shapes=[pltpu.VMEM((rows, Hp), bf16)],        # bf16: pre-acts then outputs
        compiler_params=pltpu.CompilerParams(vmem_limit_bytes=32 * 1024 * 1024),
        cost_estimate=pl.CostEstimate(flops=flops,
                                      transcendentals=transcendentals,
                                      bytes_accessed=bytes_accessed),
    )(*args)
    return loss[0, 0]


def rnn_lm_loss_ref(context, params, num_layers=4, pad_idx=-1):
    """Pure-JAX f32 reference of the same forward pass (for verification)."""
    ctx_t = context.T.astype(jnp.int32)
    x = jnp.take(params["embedding"], ctx_t, axis=0).astype(jnp.float32)
    S, B, _ = x.shape
    H = params["w_hh0"].shape[0]

    def run_layer(x, wih, whh, bih, bhh):
        def step(h, xt):
            h = jnp.tanh(xt @ wih + bih + h @ whh + bhh)
            return h, h
        _, ys = jax.lax.scan(step, jnp.zeros((B, H), jnp.float32), x)
        return ys

    x = run_layer(x, params["w_ih0"], params["w_hh0"], params["b_ih0"], params["b_hh0"])
    for l in range(num_layers - 1):
        x = run_layer(x, params["w_ih_rest"][l], params["w_hh_rest"][l],
                      params["b_ih_rest"][l], params["b_hh_rest"][l])
    logits = x[:-1] @ params["w_dec"] + params["b_dec"]       # (S-1, B, V)
    tgt = ctx_t[1:]                                           # (S-1, B)
    logp = jax.nn.log_softmax(logits, axis=-1)
    picked = jnp.take_along_axis(logp, tgt[..., None], axis=-1)[..., 0]
    mask = (tgt != pad_idx).astype(jnp.float32)
    return jnp.sum(-picked * mask) / jnp.sum(mask)


if __name__ == "__main__":
    vocab_size, emb_dim, hidden_dim = 32, 16, 32
    batch, seq = 2, 8

    key = jax.random.PRNGKey(0)
    k_params, k_ctx = jax.random.split(key)
    params = init_params(k_params, vocab_size, emb_dim, hidden_dim, num_layers=4)
    context = jax.random.randint(k_ctx, (batch, seq), 0, vocab_size, dtype=jnp.int32)

    loss = rnn_lm_loss(context, params)
    jax.block_until_ready(loss)

    ref = rnn_lm_loss_ref(context, params)
    # bf16 matmul operands (f32 accumulation) vs. the all-f32 reference -> modest tolerance.
    assert jnp.allclose(loss, ref, atol=2e-2, rtol=2e-2), (float(loss), float(ref))
    print("KERNEL_OK")
</pallas_src>

<mosaic_0001>
module attributes {stable_mosaic.version = 11 : i64} {
  func.func @_rnn_lm_loss_kernel(%arg0: memref<56x128xbf16, #tpu.memory_space<vmem>>, %arg1: memref<56x1xi32, #tpu.memory_space<vmem>>, %arg2: memref<128x128xbf16, #tpu.memory_space<vmem>>, %arg3: memref<128x128xbf16, #tpu.memory_space<vmem>>, %arg4: memref<1x128xf32, #tpu.memory_space<vmem>>, %arg5: memref<3x128x128xbf16, #tpu.memory_space<vmem>>, %arg6: memref<3x128x128xbf16, #tpu.memory_space<vmem>>, %arg7: memref<3x1x128xf32, #tpu.memory_space<vmem>>, %arg8: memref<128x128xbf16, #tpu.memory_space<vmem>>, %arg9: memref<1x128xf32, #tpu.memory_space<vmem>>, %arg10: memref<1x1xf32, #tpu.memory_space<vmem>>, %arg11: memref<56x128xbf16, #tpu.memory_space<vmem>>) attributes {dimension_semantics = [], scalar_prefetch = 0 : i64, scratch_operands = 1 : i64, tpu.core_type = #tpu.core_type<tc>} {
    %c0 = arith.constant 0 : index
    %c0_0 = arith.constant 0 : index
    %0 = vector.load %arg0[%c0, %c0_0] : memref<56x128xbf16, #tpu.memory_space<vmem>>, vector<56x128xbf16>
    %c0_1 = arith.constant 0 : index
    %c0_2 = arith.constant 0 : index
    %1 = vector.load %arg2[%c0_1, %c0_2] : memref<128x128xbf16, #tpu.memory_space<vmem>>, vector<128x128xbf16>
    %cst = arith.constant dense<0.000000e+00> : vector<56x128xf32>
    %2 = tpu.matmul %0, %1, %cst {dimension_numbers = #tpu.dot_dimension_numbers<[1], [0], [0], [1], [0, 0, 1, 1], [], []>} : vector<56x128xbf16>, vector<128x128xbf16>, vector<56x128xf32> -> vector<56x128xf32>
    %c0_3 = arith.constant 0 : index
    %c0_4 = arith.constant 0 : index
    %3 = vector.load %arg4[%c0_3, %c0_4] : memref<1x128xf32, #tpu.memory_space<vmem>>, vector<1x128xf32>
    %4 = vector.broadcast %3 : vector<1x128xf32> to vector<56x128xf32>
    %5 = arith.addf %2, %4 : vector<56x128xf32>
    %6 = arith.truncf %5 : vector<56x128xf32> to vector<56x128xbf16>
    %c0_5 = arith.constant 0 : index
    %c0_6 = arith.constant 0 : index
    %7 = vector.load %arg11[%c0_5, %c0_6] : memref<56x128xbf16, #tpu.memory_space<vmem>>, vector<56x128xbf16>
    tpu.vector_store %arg11[%c0_5, %c0_6], %6 {strides = array<i32>} : memref<56x128xbf16, #tpu.memory_space<vmem>>, vector<56x128xbf16>,
    %cst_7 = arith.constant 0.000000e+00 : bf16
    %8 = vector.broadcast %cst_7 : bf16 to vector<8x128xbf16>
    %cst_8 = arith.constant 0.000000e+00 : bf16
    %9 = vector.broadcast %cst_8 : bf16 to vector<8x128xbf16>
    %cst_9 = arith.constant 0.000000e+00 : bf16
    %10 = vector.broadcast %cst_9 : bf16 to vector<8x128xbf16>
    %cst_10 = arith.constant 0.000000e+00 : bf16
    %11 = vector.broadcast %cst_10 : bf16 to vector<8x128xbf16>
    %c0_11 = arith.constant 0 : index
    %c0_12 = arith.constant 0 : index
    %12 = vector.load %arg11[%c0_11, %c0_12] : memref<56x128xbf16, #tpu.memory_space<vmem>>, vector<8x128xbf16>
    %13 = arith.extf %12 : vector<8x128xbf16> to vector<8x128xf32>
    %c0_13 = arith.constant 0 : index
    %c0_14 = arith.constant 0 : index
    %14 = vector.load %arg3[%c0_13, %c0_14] : memref<128x128xbf16, #tpu.memory_space<vmem>>, vector<128x128xbf16>
    %cst_15 = arith.constant dense<0.000000e+00> : vector<8x128xf32>
    %15 = tpu.matmul %8, %14, %cst_15 {dimension_numbers = #tpu.dot_dimension_numbers<[1], [0], [0], [1], [0, 0, 1, 1], [], []>} : vector<8x128xbf16>, vector<128x128xbf16>, vector<8x128xf32> -> vector<8x128xf32>
    %16 = arith.addf %13, %15 : vector<8x128xf32>
    %17 = math.tanh %16 : vector<8x128xf32>
    %18 = arith.truncf %17 : vector<8x128xf32> to vector<8x128xbf16>
    %c8 = arith.constant 8 : index
    %c0_16 = arith.constant 0 : index
    %19 = vector.load %arg11[%c8, %c0_16] : memref<56x128xbf16, #tpu.memory_space<vmem>>, vector<8x128xbf16>
    %20 = arith.extf %19 : vector<8x128xbf16> to vector<8x128xf32>
    %c0_17 = arith.constant 0 : index
    %c0_18 = arith.constant 0 : index
    %21 = vector.load %arg3[%c0_17, %c0_18] : memref<128x128xbf16, #tpu.memory_space<vmem>>, vector<128x128xbf16>
    %cst_19 = arith.constant dense<0.000000e+00> : vector<8x128xf32>
    %22 = tpu.matmul %18, %21, %cst_19 {dimension_numbers = #tpu.dot_dimension_numbers<[1], [0], [0], [1], [0, 0, 1, 1], [], []>} : vector<8x128xbf16>, vector<128x128xbf16>, vector<8x128xf32> -> vector<8x128xf32>
    %23 = arith.addf %20, %22 : vector<8x128xf32>
    %24 = math.tanh %23 : vector<8x128xf32>
    %25 = arith.truncf %24 : vector<8x128xf32> to vector<8x128xbf16>
    %c0_20 = arith.constant 0 : index
    %c0_21 = arith.constant 0 : index
    %c0_22 = arith.constant 0 : index
    %26 = vector.load %arg5[%c0_20, %c0_21, %c0_22] : memref<3x128x128xbf16, #tpu.memory_space<vmem>>, vector<1x128x128xbf16>
    %27 = vector.shape_cast %26 : vector<1x128x128xbf16> to vector<128x128xbf16>
    %cst_23 = arith.constant dense<0.000000e+00> : vector<8x128xf32>
    %28 = tpu.matmul %18, %27, %cst_23 {dimension_numbers = #tpu.dot_dimension_numbers<[1], [0], [0], [1], [0, 0, 1, 1], [], []>} : vector<8x128xbf16>, vector<128x128xbf16>, vector<8x128xf32> -> vector<8x128xf32>
    %c0_24 = arith.constant 0 : index
    %c0_25 = arith.constant 0 : index
    %c0_26 = arith.constant 0 : index
    %29 = vector.load %arg6[%c0_24, %c0_25, %c0_26] : memref<3x128x128xbf16, #tpu.memory_space<vmem>>, vector<1x128x128xbf16>
    %30 = vector.shape_cast %29 : vector<1x128x128xbf16> to vector<128x128xbf16>
    %cst_27 = arith.constant dense<0.000000e+00> : vector<8x128xf32>
    %31 = tpu.matmul %9, %30, %cst_27 {dimension_numbers = #tpu.dot_dimension_numbers<[1], [0], [0], [1], [0, 0, 1, 1], [], []>} : vector<8x128xbf16>, vector<128x128xbf16>, vector<8x128xf32> -> vector<8x128xf32>
    %32 = arith.addf %28, %31 : vector<8x128xf32>
    %c0_28 = arith.constant 0 : index
    %c0_29 = arith.constant 0 : index
    %c0_30 = arith.constant 0 : index
    %33 = vector.load %arg7[%c0_28, %c0_29, %c0_30] : memref<3x1x128xf32, #tpu.memory_space<vmem>>, vector<1x1x128xf32>
    %34 = vector.shape_cast %33 : vector<1x1x128xf32> to vector<1x128xf32>
    %35 = vector.broadcast %34 : vector<1x128xf32> to vector<8x128xf32>
    %36 = arith.addf %32, %35 : vector<8x128xf32>
    %37 = math.tanh %36 : vector<8x128xf32>
    %38 = arith.truncf %37 : vector<8x128xf32> to vector<8x128xbf16>
    %c16 = arith.constant 16 : index
    %c0_31 = arith.constant 0 : index
    %39 = vector.load %arg11[%c16, %c0_31] : memref<56x128xbf16, #tpu.memory_space<vmem>>, vector<8x128xbf16>
    %40 = arith.extf %39 : vector<8x128xbf16> to vector<8x128xf32>
    %c0_32 = arith.constant 0 : index
    %c0_33 = arith.constant 0 : index
    %41 = vector.load %arg3[%c0_32, %c0_33] : memref<128x128xbf16, #tpu.memory_space<vmem>>, vector<128x128xbf16>
    %cst_34 = arith.constant dense<0.000000e+00> : vector<8x128xf32>
    %42 = tpu.matmul %25, %41, %cst_34 {dimension_numbers = #tpu.dot_dimension_numbers<[1], [0], [0], [1], [0, 0, 1, 1], [], []>} : vector<8x128xbf16>, vector<128x128xbf16>, vector<8x128xf32> -> vector<8x128xf32>
    %43 = arith.addf %40, %42 : vector<8x128xf32>
    %44 = math.tanh %43 : vector<8x128xf32>
    %45 = arith.truncf %44 : vector<8x128xf32> to vector<8x128xbf16>
    %c0_35 = arith.constant 0 : index
    %c0_36 = arith.constant 0 : index
    %c0_37 = arith.constant 0 : index
    %46 = vector.load %arg5[%c0_35, %c0_36, %c0_37] : memref<3x128x128xbf16, #tpu.memory_space<vmem>>, vector<1x128x128xbf16>
    %47 = vector.shape_cast %46 : vector<1x128x128xbf16> to vector<128x128xbf16>
    %cst_38 = arith.constant dense<0.000000e+00> : vector<8x128xf32>
    %48 = tpu.matmul %25, %47, %cst_38 {dimension_numbers = #tpu.dot_dimension_numbers<[1], [0], [0], [1], [0, 0, 1, 1], [], []>} : vector<8x128xbf16>, vector<128x128xbf16>, vector<8x128xf32> -> vector<8x128xf32>
    %c0_39 = arith.constant 0 : index
    %c0_40 = arith.constant 0 : index
    %c0_41 = arith.constant 0 : index
    %49 = vector.load %arg6[%c0_39, %c0_40, %c0_41] : memref<3x128x128xbf16, #tpu.memory_space<vmem>>, vector<1x128x128xbf16>
    %50 = vector.shape_cast %49 : vector<1x128x128xbf16> to vector<128x128xbf16>
    %cst_42 = arith.constant dense<0.000000e+00> : vector<8x128xf32>
    %51 = tpu.matmul %38, %50, %cst_42 {dimension_numbers = #tpu.dot_dimension_numbers<[1], [0], [0], [1], [0, 0, 1, 1], [], []>} : vector<8x128xbf16>, vector<128x128xbf16>, vector<8x128xf32> -> vector<8x128xf32>
    %52 = arith.addf %48, %51 : vector<8x128xf32>
    %c0_43 = arith.constant 0 : index
    %c0_44 = arith.constant 0 : index
    %c0_45 = arith.constant 0 : index
    %53 = vector.load %arg7[%c0_43, %c0_44, %c0_45] : memref<3x1x128xf32, #tpu.memory_space<vmem>>, vector<1x1x128xf32>
    %54 = vector.shape_cast %53 : vector<1x1x128xf32> to vector<1x128xf32>
    %55 = vector.broadcast %54 : vector<1x128xf32> to vector<8x128xf32>
    %56 = arith.addf %52, %55 : vector<8x128xf32>
    %57 = math.tanh %56 : vector<8x128xf32>
    %58 = arith.truncf %57 : vector<8x128xf32> to vector<8x128xbf16>
    %c1 = arith.constant 1 : index
    %c0_46 = arith.constant 0 : index
    %c0_47 = arith.constant 0 : index
    %59 = vector.load %arg5[%c1, %c0_46, %c0_47] : memref<3x128x128xbf16, #tpu.memory_space<vmem>>, vector<1x128x128xbf16>
    %60 = vector.shape_cast %59 : vector<1x128x128xbf16> to vector<128x128xbf16>
    %cst_48 = arith.constant dense<0.000000e+00> : vector<8x128xf32>
    %61 = tpu.matmul %38, %60, %cst_48 {dimension_numbers = #tpu.dot_dimension_numbers<[1], [0], [0], [1], [0, 0, 1, 1], [], []>} : vector<8x128xbf16>, vector<128x128xbf16>, vector<8x128xf32> -> vector<8x128xf32>
    %c1_49 = arith.constant 1 : index
    %c0_50 = arith.constant 0 : index
    %c0_51 = arith.constant 0 : index
    %62 = vector.load %arg6[%c1_49, %c0_50, %c0_51] : memref<3x128x128xbf16, #tpu.memory_space<vmem>>, vector<1x128x128xbf16>
    %63 = vector.shape_cast %62 : vector<1x128x128xbf16> to vector<128x128xbf16>
    %cst_52 = arith.constant dense<0.000000e+00> : vector<8x128xf32>
    %64 = tpu.matmul %10, %63, %cst_52 {dimension_numbers = #tpu.dot_dimension_numbers<[1], [0], [0], [1], [0, 0, 1, 1], [], []>} : vector<8x128xbf16>, vector<128x128xbf16>, vector<8x128xf32> -> vector<8x128xf32>
    %65 = arith.addf %61, %64 : vector<8x128xf32>
    %c1_53 = arith.constant 1 : index
    %c0_54 = arith.constant 0 : index
    %c0_55 = arith.constant 0 : index
    %66 = vector.load %arg7[%c1_53, %c0_54, %c0_55] : memref<3x1x128xf32, #tpu.memory_space<vmem>>, vector<1x1x128xf32>
    %67 = vector.shape_cast %66 : vector<1x1x128xf32> to vector<1x128xf32>
    %68 = vector.broadcast %67 : vector<1x128xf32> to vector<8x128xf32>
    %69 = arith.addf %65, %68 : vector<8x128xf32>
    %70 = math.tanh %69 : vector<8x128xf32>
    %71 = arith.truncf %70 : vector<8x128xf32> to vector<8x128xbf16>
    %c24 = arith.constant 24 : index
    %c0_56 = arith.constant 0 : index
    %72 = vector.load %arg11[%c24, %c0_56] : memref<56x128xbf16, #tpu.memory_space<vmem>>, vector<8x128xbf16>
    %73 = arith.extf %72 : vector<8x128xbf16> to vector<8x128xf32>
    %c0_57 = arith.constant 0 : index
    %c0_58 = arith.constant 0 : index
    %74 = vector.load %arg3[%c0_57, %c0_58] : memref<128x128xbf16, #tpu.memory_space<vmem>>, vector<128x128xbf16>
    %cst_59 = arith.constant dense<0.000000e+00> : vector<8x128xf32>
    %75 = tpu.matmul %45, %74, %cst_59 {dimension_numbers = #tpu.dot_dimension_numbers<[1], [0], [0], [1], [0, 0, 1, 1], [], []>} : vector<8x128xbf16>, vector<128x128xbf16>, vector<8x128xf32> -> vector<8x128xf32>
    %76 = arith.addf %73, %75 : vector<8x128xf32>
    %77 = math.tanh %76 : vector<8x128xf32>
    %78 = arith.truncf %77 : vector<8x128xf32> to vector<8x128xbf16>
    %c0_60 = arith.constant 0 : index
    %c0_61 = arith.constant 0 : index
    %c0_62 = arith.constant 0 : index
    %79 = vector.load %arg5[%c0_60, %c0_61, %c0_62] : memref<3x128x128xbf16, #tpu.memory_space<vmem>>, vector<1x128x128xbf16>
    %80 = vector.shape_cast %79 : vector<1x128x128xbf16> to vector<128x128xbf16>
    %cst_63 = arith.constant dense<0.000000e+00> : vector<8x128xf32>
    %81 = tpu.matmul %45, %80, %cst_63 {dimension_numbers = #tpu.dot_dimension_numbers<[1], [0], [0], [1], [0, 0, 1, 1], [], []>} : vector<8x128xbf16>, vector<128x128xbf16>, vector<8x128xf32> -> vector<8x128xf32>
    %c0_64 = arith.constant 0 : index
    %c0_65 = arith.constant 0 : index
    %c0_66 = arith.constant 0 : index
    %82 = vector.load %arg6[%c0_64, %c0_65, %c0_66] : memref<3x128x128xbf16, #tpu.memory_space<vmem>>, vector<1x128x128xbf16>
    %83 = vector.shape_cast %82 : vector<1x128x128xbf16> to vector<128x128xbf16>
    %cst_67 = arith.constant dense<0.000000e+00> : vector<8x128xf32>
    %84 = tpu.matmul %58, %83, %cst_67 {dimension_numbers = #tpu.dot_dimension_numbers<[1], [0], [0], [1], [0, 0, 1, 1], [], []>} : vector<8x128xbf16>, vector<128x128xbf16>, vector<8x128xf32> -> vector<8x128xf32>
    %85 = arith.addf %81, %84 : vector<8x128xf32>
    %c0_68 = arith.constant 0 : index
    %c0_69 = arith.constant 0 : index
    %c0_70 = arith.constant 0 : index
    %86 = vector.load %arg7[%c0_68, %c0_69, %c0_70] : memref<3x1x128xf32, #tpu.memory_space<vmem>>, vector<1x1x128xf32>
    %87 = vector.shape_cast %86 : vector<1x1x128xf32> to vector<1x128xf32>
    %88 = vector.broadcast %87 : vector<1x128xf32> to vector<8x128xf32>
    %89 = arith.addf %85, %88 : vector<8x128xf32>
    %90 = math.tanh %89 : vector<8x128xf32>
    %91 = arith.truncf %90 : vector<8x128xf32> to vector<8x128xbf16>
    %c1_71 = arith.constant 1 : index
    %c0_72 = arith.constant 0 : index
    %c0_73 = arith.constant 0 : index
    %92 = vector.load %arg5[%c1_71, %c0_72, %c0_73] : memref<3x128x128xbf16, #tpu.memory_space<vmem>>, vector<1x128x128xbf16>
    %93 = vector.shape_cast %92 : vector<1x128x128xbf16> to vector<128x128xbf16>
    %cst_74 = arith.constant dense<0.000000e+00> : vector<8x128xf32>
    %94 = tpu.matmul %58, %93, %cst_74 {dimension_numbers = #tpu.dot_dimension_numbers<[1], [0], [0], [1], [0, 0, 1, 1], [], []>} : vector<8x128xbf16>, vector<128x128xbf16>, vector<8x128xf32> -> vector<8x128xf32>
    %c1_75 = arith.constant 1 : index
    %c0_76 = arith.constant 0 : index
    %c0_77 = arith.constant 0 : index
    %95 = vector.load %arg6[%c1_75, %c0_76, %c0_77] : memref<3x128x128xbf16, #tpu.memory_space<vmem>>, vector<1x128x128xbf16>
    %96 = vector.shape_cast %95 : vector<1x128x128xbf16> to vector<128x128xbf16>
    %cst_78 = arith.constant dense<0.000000e+00> : vector<8x128xf32>
    %97 = tpu.matmul %71, %96, %cst_78 {dimension_numbers = #tpu.dot_dimension_numbers<[1], [0], [0], [1], [0, 0, 1, 1], [], []>} : vector<8x128xbf16>, vector<128x128xbf16>, vector<8x128xf32> -> vector<8x128xf32>
    %98 = arith.addf %94, %97 : vector<8x128xf32>
    %c1_79 = arith.constant 1 : index
    %c0_80 = arith.constant 0 : index
    %c0_81 = arith.constant 0 : index
    %99 = vector.load %arg7[%c1_79, %c0_80, %c0_81] : memref<3x1x128xf32, #tpu.memory_space<vmem>>, vector<1x1x128xf32>
    %100 = vector.shape_cast %99 : vector<1x1x128xf32> to vector<1x128xf32>
    %101 = vector.broadcast %100 : vector<1x128xf32> to vector<8x128xf32>
    %102 = arith.addf %98, %101 : vector<8x128xf32>
    %103 = math.tanh %102 : vector<8x128xf32>
    %104 = arith.truncf %103 : vector<8x128xf32> to vector<8x128xbf16>
    %c2 = arith.constant 2 : index
    %c0_82 = arith.constant 0 : index
    %c0_83 = arith.constant 0 : index
    %105 = vector.load %arg5[%c2, %c0_82, %c0_83] : memref<3x128x128xbf16, #tpu.memory_space<vmem>>, vector<1x128x128xbf16>
    %106 = vector.shape_cast %105 : vector<1x128x128xbf16> to vector<128x128xbf16>
    %cst_84 = arith.constant dense<0.000000e+00> : vector<8x128xf32>
    %107 = tpu.matmul %71, %106, %cst_84 {dimension_numbers = #tpu.dot_dimension_numbers<[1], [0], [0], [1], [0, 0, 1, 1], [], []>} : vector<8x128xbf16>, vector<128x128xbf16>, vector<8x128xf32> -> vector<8x128xf32>
    %c2_85 = arith.constant 2 : index
    %c0_86 = arith.constant 0 : index
    %c0_87 = arith.constant 0 : index
    %108 = vector.load %arg6[%c2_85, %c0_86, %c0_87] : memref<3x128x128xbf16, #tpu.memory_space<vmem>>, vector<1x128x128xbf16>
    %109 = vector.shape_cast %108 : vector<1x128x128xbf16> to vector<128x128xbf16>
    %cst_88 = arith.constant dense<0.000000e+00> : vector<8x128xf32>
    %110 = tpu.matmul %11, %109, %cst_88 {dimension_numbers = #tpu.dot_dimension_numbers<[1], [0], [0], [1], [0, 0, 1, 1], [], []>} : vector<8x128xbf16>, vector<128x128xbf16>, vector<8x128xf32> -> vector<8x128xf32>
    %111 = arith.addf %107, %110 : vector<8x128xf32>
    %c2_89 = arith.constant 2 : index
    %c0_90 = arith.constant 0 : index
    %c0_91 = arith.constant 0 : index
    %112 = vector.load %arg7[%c2_89, %c0_90, %c0_91] : memref<3x1x128xf32, #tpu.memory_space<vmem>>, vector<1x1x128xf32>
    %113 = vector.shape_cast %112 : vector<1x1x128xf32> to vector<1x128xf32>
    %114 = vector.broadcast %113 : vector<1x128xf32> to vector<8x128xf32>
    %115 = arith.addf %111, %114 : vector<8x128xf32>
    %116 = math.tanh %115 : vector<8x128xf32>
    %117 = arith.truncf %116 : vector<8x128xf32> to vector<8x128xbf16>
    %c0_92 = arith.constant 0 : index
    %c0_93 = arith.constant 0 : index
    %118 = vector.load %arg11[%c0_92, %c0_93] : memref<56x128xbf16, #tpu.memory_space<vmem>>, vector<8x128xbf16>
    tpu.vector_store %arg11[%c0_92, %c0_93], %117 {strides = array<i32>} : memref<56x128xbf16, #tpu.memory_space<vmem>>, vector<8x128xbf16>,
    %c32 = arith.constant 32 : index
    %c0_94 = arith.constant 0 : index
    %119 = vector.load %arg11[%c32, %c0_94] : memref<56x128xbf16, #tpu.memory_space<vmem>>, vector<8x128xbf16>
    %120 = arith.extf %119 : vector<8x128xbf16> to vector<8x128xf32>
    %c0_95 = arith.constant 0 : index
    %c0_96 = arith.constant 0 : index
    %121 = vector.load %arg3[%c0_95, %c0_96] : memref<128x128xbf16, #tpu.memory_space<vmem>>, vector<128x128xbf16>
    %cst_97 = arith.constant dense<0.000000e+00> : vector<8x128xf32>
    %122 = tpu.matmul %78, %121, %cst_97 {dimension_numbers = #tpu.dot_dimension_numbers<[1], [0], [0], [1], [0, 0, 1, 1], [], []>} : vector<8x128xbf16>, vector<128x128xbf16>, vector<8x128xf32> -> vector<8x128xf32>
    %123 = arith.addf %120, %122 : vector<8x128xf32>
    %124 = math.tanh %123 : vector<8x128xf32>
    %125 = arith.truncf %124 : vector<8x128xf32> to vector<8x128xbf16>
    %c0_98 = arith.constant 0 : index
    %c0_99 = arith.constant 0 : index
    %c0_100 = arith.constant 0 : index
    %126 = vector.load %arg5[%c0_98, %c0_99, %c0_100] : memref<3x128x128xbf16, #tpu.memory_space<vmem>>, vector<1x128x128xbf16>
    %127 = vector.shape_cast %126 : vector<1x128x128xbf16> to vector<128x128xbf16>
    %cst_101 = arith.constant dense<0.000000e+00> : vector<8x128xf32>
    %128 = tpu.matmul %78, %127, %cst_101 {dimension_numbers = #tpu.dot_dimension_numbers<[1], [0], [0], [1], [0, 0, 1, 1], [], []>} : vector<8x128xbf16>, vector<128x128xbf16>, vector<8x128xf32> -> vector<8x128xf32>
    %c0_102 = arith.constant 0 : index
    %c0_103 = arith.constant 0 : index
    %c0_104 = arith.constant 0 : index
    %129 = vector.load %arg6[%c0_102, %c0_103, %c0_104] : memref<3x128x128xbf16, #tpu.memory_space<vmem>>, vector<1x128x128xbf16>
    %130 = vector.shape_cast %129 : vector<1x128x128xbf16> to vector<128x128xbf16>
    %cst_105 = arith.constant dense<0.000000e+00> : vector<8x128xf32>
    %131 = tpu.matmul %91, %130, %cst_105 {dimension_numbers = #tpu.dot_dimension_numbers<[1], [0], [0], [1], [0, 0, 1, 1], [], []>} : vector<8x128xbf16>, vector<128x128xbf16>, vector<8x128xf32> -> vector<8x128xf32>
    %132 = arith.addf %128, %131 : vector<8x128xf32>
    %c0_106 = arith.constant 0 : index
    %c0_107 = arith.constant 0 : index
    %c0_108 = arith.constant 0 : index
    %133 = vector.load %arg7[%c0_106, %c0_107, %c0_108] : memref<3x1x128xf32, #tpu.memory_space<vmem>>, vector<1x1x128xf32>
    %134 = vector.shape_cast %133 : vector<1x1x128xf32> to vector<1x128xf32>
    %135 = vector.broadcast %134 : vector<1x128xf32> to vector<8x128xf32>
    %136 = arith.addf %132, %135 : vector<8x128xf32>
    %137 = math.tanh %136 : vector<8x128xf32>
    %138 = arith.truncf %137 : vector<8x128xf32> to vector<8x128xbf16>
    %c1_109 = arith.constant 1 : index
    %c0_110 = arith.constant 0 : index
    %c0_111 = arith.constant 0 : index
    %139 = vector.load %arg5[%c1_109, %c0_110, %c0_111] : memref<3x128x128xbf16, #tpu.memory_space<vmem>>, vector<1x128x128xbf16>
    %140 = vector.shape_cast %139 : vector<1x128x128xbf16> to vector<128x128xbf16>
    %cst_112 = arith.constant dense<0.000000e+00> : vector<8x128xf32>
    %141 = tpu.matmul %91, %140, %cst_112 {dimension_numbers = #tpu.dot_dimension_numbers<[1], [0], [0], [1], [0, 0, 1, 1], [], []>} : vector<8x128xbf16>, vector<128x128xbf16>, vector<8x128xf32> -> vector<8x128xf32>
    %c1_113 = arith.constant 1 : index
    %c0_114 = arith.constant 0 : index
    %c0_115 = arith.constant 0 : index
    %142 = vector.load %arg6[%c1_113, %c0_114, %c0_115] : memref<3x128x128xbf16, #tpu.memory_space<vmem>>, vector<1x128x128xbf16>
    %143 = vector.shape_cast %142 : vector<1x128x128xbf16> to vector<128x128xbf16>
    %cst_116 = arith.constant dense<0.000000e+00> : vector<8x128xf32>
    %144 = tpu.matmul %104, %143, %cst_116 {dimension_numbers = #tpu.dot_dimension_numbers<[1], [0], [0], [1], [0, 0, 1, 1], [], []>} : vector<8x128xbf16>, vector<128x128xbf16>, vector<8x128xf32> -> vector<8x128xf32>
    %145 = arith.addf %141, %144 : vector<8x128xf32>
    %c1_117 = arith.constant 1 : index
    %c0_118 = arith.constant 0 : index
    %c0_119 = arith.constant 0 : index
    %146 = vector.load %arg7[%c1_117, %c0_118, %c0_119] : memref<3x1x128xf32, #tpu.memory_space<vmem>>, vector<1x1x128xf32>
    %147 = vector.shape_cast %146 : vector<1x1x128xf32> to vector<1x128xf32>
    %148 = vector.broadcast %147 : vector<1x128xf32> to vector<8x128xf32>
    %149 = arith.addf %145, %148 : vector<8x128xf32>
    %150 = math.tanh %149 : vector<8x128xf32>
    %151 = arith.truncf %150 : vector<8x128xf32> to vector<8x128xbf16>
    %c2_120 = arith.constant 2 : index
    %c0_121 = arith.constant 0 : index
    %c0_122 = arith.constant 0 : index
    %152 = vector.load %arg5[%c2_120, %c0_121, %c0_122] : memref<3x128x128xbf16, #tpu.memory_space<vmem>>, vector<1x128x128xbf16>
    %153 = vector.shape_cast %152 : vector<1x128x128xbf16> to vector<128x128xbf16>
    %cst_123 = arith.constant dense<0.000000e+00> : vector<8x128xf32>
    %154 = tpu.matmul %104, %153, %cst_123 {dimension_numbers = #tpu.dot_dimension_numbers<[1], [0], [0], [1], [0, 0, 1, 1], [], []>} : vector<8x128xbf16>, vector<128x128xbf16>, vector<8x128xf32> -> vector<8x128xf32>
    %c2_124 = arith.constant 2 : index
    %c0_125 = arith.constant 0 : index
    %c0_126 = arith.constant 0 : index
    %155 = vector.load %arg6[%c2_124, %c0_125, %c0_126] : memref<3x128x128xbf16, #tpu.memory_space<vmem>>, vector<1x128x128xbf16>
    %156 = vector.shape_cast %155 : vector<1x128x128xbf16> to vector<128x128xbf16>
    %cst_127 = arith.constant dense<0.000000e+00> : vector<8x128xf32>
    %157 = tpu.matmul %117, %156, %cst_127 {dimension_numbers = #tpu.dot_dimension_numbers<[1], [0], [0], [1], [0, 0, 1, 1], [], []>} : vector<8x128xbf16>, vector<128x128xbf16>, vector<8x128xf32> -> vector<8x128xf32>
    %158 = arith.addf %154, %157 : vector<8x128xf32>
    %c2_128 = arith.constant 2 : index
    %c0_129 = arith.constant 0 : index
    %c0_130 = arith.constant 0 : index
    %159 = vector.load %arg7[%c2_128, %c0_129, %c0_130] : memref<3x1x128xf32, #tpu.memory_space<vmem>>, vector<1x1x128xf32>
    %160 = vector.shape_cast %159 : vector<1x1x128xf32> to vector<1x128xf32>
    %161 = vector.broadcast %160 : vector<1x128xf32> to vector<8x128xf32>
    %162 = arith.addf %158, %161 : vector<8x128xf32>
    %163 = math.tanh %162 : vector<8x128xf32>
    %164 = arith.truncf %163 : vector<8x128xf32> to vector<8x128xbf16>
    %c8_131 = arith.constant 8 : index
    %c0_132 = arith.constant 0 : index
    %165 = vector.load %arg11[%c8_131, %c0_132] : memref<56x128xbf16, #tpu.memory_space<vmem>>, vector<8x128xbf16>
    tpu.vector_store %arg11[%c8_131, %c0_132], %164 {strides = array<i32>} : memref<56x128xbf16, #tpu.memory_space<vmem>>, vector<8x128xbf16>,
    %c40 = arith.constant 40 : index
    %c0_133 = arith.constant 0 : index
    %166 = vector.load %arg11[%c40, %c0_133] : memref<56x128xbf16, #tpu.memory_space<vmem>>, vector<8x128xbf16>
    %167 = arith.extf %166 : vector<8x128xbf16> to vector<8x128xf32>
    %c0_134 = arith.constant 0 : index
    %c0_135 = arith.constant 0 : index
    %168 = vector.load %arg3[%c0_134, %c0_135] : memref<128x128xbf16, #tpu.memory_space<vmem>>, vector<128x128xbf16>
    %cst_136 = arith.constant dense<0.000000e+00> : vector<8x128xf32>
    %169 = tpu.matmul %125, %168, %cst_136 {dimension_numbers = #tpu.dot_dimension_numbers<[1], [0], [0], [1], [0, 0, 1, 1], [], []>} : vector<8x128xbf16>, vector<128x128xbf16>, vector<8x128xf32> -> vector<8x128xf32>
    %170 = arith.addf %167, %169 : vector<8x128xf32>
    %171 = math.tanh %170 : vector<8x128xf32>
    %172 = arith.truncf %171 : vector<8x128xf32> to vector<8x128xbf16>
    %c0_137 = arith.constant 0 : index
    %c0_138 = arith.constant 0 : index
    %c0_139 = arith.constant 0 : index
    %173 = vector.load %arg5[%c0_137, %c0_138, %c0_139] : memref<3x128x128xbf16, #tpu.memory_space<vmem>>, vector<1x128x128xbf16>
    %174 = vector.shape_cast %173 : vector<1x128x128xbf16> to vector<128x128xbf16>
    %cst_140 = arith.constant dense<0.000000e+00> : vector<8x128xf32>
    %175 = tpu.matmul %125, %174, %cst_140 {dimension_numbers = #tpu.dot_dimension_numbers<[1], [0], [0], [1], [0, 0, 1, 1], [], []>} : vector<8x128xbf16>, vector<128x128xbf16>, vector<8x128xf32> -> vector<8x128xf32>
    %c0_141 = arith.constant 0 : index
    %c0_142 = arith.constant 0 : index
    %c0_143 = arith.constant 0 : index
    %176 = vector.load %arg6[%c0_141, %c0_142, %c0_143] : memref<3x128x128xbf16, #tpu.memory_space<vmem>>, vector<1x128x128xbf16>
    %177 = vector.shape_cast %176 : vector<1x128x128xbf16> to vector<128x128xbf16>
    %cst_144 = arith.constant dense<0.000000e+00> : vector<8x128xf32>
    %178 = tpu.matmul %138, %177, %cst_144 {dimension_numbers = #tpu.dot_dimension_numbers<[1], [0], [0], [1], [0, 0, 1, 1], [], []>} : vector<8x128xbf16>, vector<128x128xbf16>, vector<8x128xf32> -> vector<8x128xf32>
    %179 = arith.addf %175, %178 : vector<8x128xf32>
    %c0_145 = arith.constant 0 : index
    %c0_146 = arith.constant 0 : index
    %c0_147 = arith.constant 0 : index
    %180 = vector.load %arg7[%c0_145, %c0_146, %c0_147] : memref<3x1x128xf32, #tpu.memory_space<vmem>>, vector<1x1x128xf32>
    %181 = vector.shape_cast %180 : vector<1x1x128xf32> to vector<1x128xf32>
    %182 = vector.broadcast %181 : vector<1x128xf32> to vector<8x128xf32>
    %183 = arith.addf %179, %182 : vector<8x128xf32>
    %184 = math.tanh %183 : vector<8x128xf32>
    %185 = arith.truncf %184 : vector<8x128xf32> to vector<8x128xbf16>
    %c1_148 = arith.constant 1 : index
    %c0_149 = arith.constant 0 : index
    %c0_150 = arith.constant 0 : index
    %186 = vector.load %arg5[%c1_148, %c0_149, %c0_150] : memref<3x128x128xbf16, #tpu.memory_space<vmem>>, vector<1x128x128xbf16>
    %187 = vector.shape_cast %186 : vector<1x128x128xbf16> to vector<128x128xbf16>
    %cst_151 = arith.constant dense<0.000000e+00> : vector<8x128xf32>
    %188 = tpu.matmul %138, %187, %cst_151 {dimension_numbers = #tpu.dot_dimension_numbers<[1], [0], [0], [1], [0, 0, 1, 1], [], []>} : vector<8x128xbf16>, vector<128x128xbf16>, vector<8x128xf32> -> vector<8x128xf32>
    %c1_152 = arith.constant 1 : index
    %c0_153 = arith.constant 0 : index
    %c0_154 = arith.constant 0 : index
    %189 = vector.load %arg6[%c1_152, %c0_153, %c0_154] : memref<3x128x128xbf16, #tpu.memory_space<vmem>>, vector<1x128x128xbf16>
    %190 = vector.shape_cast %189 : vector<1x128x128xbf16> to vector<128x128xbf16>
    %cst_155 = arith.constant dense<0.000000e+00> : vector<8x128xf32>
    %191 = tpu.matmul %151, %190, %cst_155 {dimension_numbers = #tpu.dot_dimension_numbers<[1], [0], [0], [1], [0, 0, 1, 1], [], []>} : vector<8x128xbf16>, vector<128x128xbf16>, vector<8x128xf32> -> vector<8x128xf32>
    %192 = arith.addf %188, %191 : vector<8x128xf32>
    %c1_156 = arith.constant 1 : index
    %c0_157 = arith.constant 0 : index
    %c0_158 = arith.constant 0 : index
    %193 = vector.load %arg7[%c1_156, %c0_157, %c0_158] : memref<3x1x128xf32, #tpu.memory_space<vmem>>, vector<1x1x128xf32>
    %194 = vector.shape_cast %193 : vector<1x1x128xf32> to vector<1x128xf32>
    %195 = vector.broadcast %194 : vector<1x128xf32> to vector<8x128xf32>
    %196 = arith.addf %192, %195 : vector<8x128xf32>
    %197 = math.tanh %196 : vector<8x128xf32>
    %198 = arith.truncf %197 : vector<8x128xf32> to vector<8x128xbf16>
    %c2_159 = arith.constant 2 : index
    %c0_160 = arith.constant 0 : index
    %c0_161 = arith.constant 0 : index
    %199 = vector.load %arg5[%c2_159, %c0_160, %c0_161] : memref<3x128x128xbf16, #tpu.memory_space<vmem>>, vector<1x128x128xbf16>
    %200 = vector.shape_cast %199 : vector<1x128x128xbf16> to vector<128x128xbf16>
    %cst_162 = arith.constant dense<0.000000e+00> : vector<8x128xf32>
    %201 = tpu.matmul %151, %200, %cst_162 {dimension_numbers = #tpu.dot_dimension_numbers<[1], [0], [0], [1], [0, 0, 1, 1], [], []>} : vector<8x128xbf16>, vector<128x128xbf16>, vector<8x128xf32> -> vector<8x128xf32>
    %c2_163 = arith.constant 2 : index
    %c0_164 = arith.constant 0 : index
    %c0_165 = arith.constant 0 : index
    %202 = vector.load %arg6[%c2_163, %c0_164, %c0_165] : memref<3x128x128xbf16, #tpu.memory_space<vmem>>, vector<1x128x128xbf16>
    %203 = vector.shape_cast %202 : vector<1x128x128xbf16> to vector<128x128xbf16>
    %cst_166 = arith.constant dense<0.000000e+00> : vector<8x128xf32>
    %204 = tpu.matmul %164, %203, %cst_166 {dimension_numbers = #tpu.dot_dimension_numbers<[1], [0], [0], [1], [0, 0, 1, 1], [], []>} : vector<8x128xbf16>, vector<128x128xbf16>, vector<8x128xf32> -> vector<8x128xf32>
    %205 = arith.addf %201, %204 : vector<8x128xf32>
    %c2_167 = arith.constant 2 : index
    %c0_168 = arith.constant 0 : index
    %c0_169 = arith.constant 0 : index
    %206 = vector.load %arg7[%c2_167, %c0_168, %c0_169] : memref<3x1x128xf32, #tpu.memory_space<vmem>>, vector<1x1x128xf32>
    %207 = vector.shape_cast %206 : vector<1x1x128xf32> to vector<1x128xf32>
    %208 = vector.broadcast %207 : vector<1x128xf32> to vector<8x128xf32>
    %209 = arith.addf %205, %208 : vector<8x128xf32>
    %210 = math.tanh %209 : vector<8x128xf32>
    %211 = arith.truncf %210 : vector<8x128xf32> to vector<8x128xbf16>
    %c16_170 = arith.constant 16 : index
    %c0_171 = arith.constant 0 : index
    %212 = vector.load %arg11[%c16_170, %c0_171] : memref<56x128xbf16, #tpu.memory_space<vmem>>, vector<8x128xbf16>
    tpu.vector_store %arg11[%c16_170, %c0_171], %211 {strides = array<i32>} : memref<56x128xbf16, #tpu.memory_space<vmem>>, vector<8x128xbf16>,
    %c48 = arith.constant 48 : index
    %c0_172 = arith.constant 0 : index
    %213 = vector.load %arg11[%c48, %c0_172] : memref<56x128xbf16, #tpu.memory_space<vmem>>, vector<8x128xbf16>
    %214 = arith.extf %213 : vector<8x128xbf16> to vector<8x128xf32>
    %c0_173 = arith.constant 0 : index
    %c0_174 = arith.constant 0 : index
    %215 = vector.load %arg3[%c0_173, %c0_174] : memref<128x128xbf16, #tpu.memory_space<vmem>>, vector<128x128xbf16>
    %cst_175 = arith.constant dense<0.000000e+00> : vector<8x128xf32>
    %216 = tpu.matmul %172, %215, %cst_175 {dimension_numbers = #tpu.dot_dimension_numbers<[1], [0], [0], [1], [0, 0, 1, 1], [], []>} : vector<8x128xbf16>, vector<128x128xbf16>, vector<8x128xf32> -> vector<8x128xf32>
    %217 = arith.addf %214, %216 : vector<8x128xf32>
    %218 = math.tanh %217 : vector<8x128xf32>
    %219 = arith.truncf %218 : vector<8x128xf32> to vector<8x128xbf16>
    %c0_176 = arith.constant 0 : index
    %c0_177 = arith.constant 0 : index
    %c0_178 = arith.constant 0 : index
    %220 = vector.load %arg5[%c0_176, %c0_177, %c0_178] : memref<3x128x128xbf16, #tpu.memory_space<vmem>>, vector<1x128x128xbf16>
    %221 = vector.shape_cast %220 : vector<1x128x128xbf16> to vector<128x128xbf16>
    %cst_179 = arith.constant dense<0.000000e+00> : vector<8x128xf32>
    %222 = tpu.matmul %172, %221, %cst_179 {dimension_numbers = #tpu.dot_dimension_numbers<[1], [0], [0], [1], [0, 0, 1, 1], [], []>} : vector<8x128xbf16>, vector<128x128xbf16>, vector<8x128xf32> -> vector<8x128xf32>
    %c0_180 = arith.constant 0 : index
    %c0_181 = arith.constant 0 : index
    %c0_182 = arith.constant 0 : index
    %223 = vector.load %arg6[%c0_180, %c0_181, %c0_182] : memref<3x128x128xbf16, #tpu.memory_space<vmem>>, vector<1x128x128xbf16>
    %224 = vector.shape_cast %223 : vector<1x128x128xbf16> to vector<128x128xbf16>
    %cst_183 = arith.constant dense<0.000000e+00> : vector<8x128xf32>
    %225 = tpu.matmul %185, %224, %cst_183 {dimension_numbers = #tpu.dot_dimension_numbers<[1], [0], [0], [1], [0, 0, 1, 1], [], []>} : vector<8x128xbf16>, vector<128x128xbf16>, vector<8x128xf32> -> vector<8x128xf32>
    %226 = arith.addf %222, %225 : vector<8x128xf32>
    %c0_184 = arith.constant 0 : index
    %c0_185 = arith.constant 0 : index
    %c0_186 = arith.constant 0 : index
    %227 = vector.load %arg7[%c0_184, %c0_185, %c0_186] : memref<3x1x128xf32, #tpu.memory_space<vmem>>, vector<1x1x128xf32>
    %228 = vector.shape_cast %227 : vector<1x1x128xf32> to vector<1x128xf32>
    %229 = vector.broadcast %228 : vector<1x128xf32> to vector<8x128xf32>
    %230 = arith.addf %226, %229 : vector<8x128xf32>
    %231 = math.tanh %230 : vector<8x128xf32>
    %232 = arith.truncf %231 : vector<8x128xf32> to vector<8x128xbf16>
    %c1_187 = arith.constant 1 : index
    %c0_188 = arith.constant 0 : index
    %c0_189 = arith.constant 0 : index
    %233 = vector.load %arg5[%c1_187, %c0_188, %c0_189] : memref<3x128x128xbf16, #tpu.memory_space<vmem>>, vector<1x128x128xbf16>
    %234 = vector.shape_cast %233 : vector<1x128x128xbf16> to vector<128x128xbf16>
    %cst_190 = arith.constant dense<0.000000e+00> : vector<8x128xf32>
    %235 = tpu.matmul %185, %234, %cst_190 {dimension_numbers = #tpu.dot_dimension_numbers<[1], [0], [0], [1], [0, 0, 1, 1], [], []>} : vector<8x128xbf16>, vector<128x128xbf16>, vector<8x128xf32> -> vector<8x128xf32>
    %c1_191 = arith.constant 1 : index
    %c0_192 = arith.constant 0 : index
    %c0_193 = arith.constant 0 : index
    %236 = vector.load %arg6[%c1_191, %c0_192, %c0_193] : memref<3x128x128xbf16, #tpu.memory_space<vmem>>, vector<1x128x128xbf16>
    %237 = vector.shape_cast %236 : vector<1x128x128xbf16> to vector<128x128xbf16>
    %cst_194 = arith.constant dense<0.000000e+00> : vector<8x128xf32>
    %238 = tpu.matmul %198, %237, %cst_194 {dimension_numbers = #tpu.dot_dimension_numbers<[1], [0], [0], [1], [0, 0, 1, 1], [], []>} : vector<8x128xbf16>, vector<128x128xbf16>, vector<8x128xf32> -> vector<8x128xf32>
    %239 = arith.addf %235, %238 : vector<8x128xf32>
    %c1_195 = arith.constant 1 : index
    %c0_196 = arith.constant 0 : index
    %c0_197 = arith.constant 0 : index
    %240 = vector.load %arg7[%c1_195, %c0_196, %c0_197] : memref<3x1x128xf32, #tpu.memory_space<vmem>>, vector<1x1x128xf32>
    %241 = vector.shape_cast %240 : vector<1x1x128xf32> to vector<1x128xf32>
    %242 = vector.broadcast %241 : vector<1x128xf32> to vector<8x128xf32>
    %243 = arith.addf %239, %242 : vector<8x128xf32>
    %244 = math.tanh %243 : vector<8x128xf32>
    %245 = arith.truncf %244 : vector<8x128xf32> to vector<8x128xbf16>
    %c2_198 = arith.constant 2 : index
    %c0_199 = arith.constant 0 : index
    %c0_200 = arith.constant 0 : index
    %246 = vector.load %arg5[%c2_198, %c0_199, %c0_200] : memref<3x128x128xbf16, #tpu.memory_space<vmem>>, vector<1x128x128xbf16>
    %247 = vector.shape_cast %246 : vector<1x128x128xbf16> to vector<128x128xbf16>
    %cst_201 = arith.constant dense<0.000000e+00> : vector<8x128xf32>
    %248 = tpu.matmul %198, %247, %cst_201 {dimension_numbers = #tpu.dot_dimension_numbers<[1], [0], [0], [1], [0, 0, 1, 1], [], []>} : vector<8x128xbf16>, vector<128x128xbf16>, vector<8x128xf32> -> vector<8x128xf32>
    %c2_202 = arith.constant 2 : index
    %c0_203 = arith.constant 0 : index
    %c0_204 = arith.constant 0 : index
    %249 = vector.load %arg6[%c2_202, %c0_203, %c0_204] : memref<3x128x128xbf16, #tpu.memory_space<vmem>>, vector<1x128x128xbf16>
    %250 = vector.shape_cast %249 : vector<1x128x128xbf16> to vector<128x128xbf16>
    %cst_205 = arith.constant dense<0.000000e+00> : vector<8x128xf32>
    %251 = tpu.matmul %211, %250, %cst_205 {dimension_numbers = #tpu.dot_dimension_numbers<[1], [0], [0], [1], [0, 0, 1, 1], [], []>} : vector<8x128xbf16>, vector<128x128xbf16>, vector<8x128xf32> -> vector<8x128xf32>
    %252 = arith.addf %248, %251 : vector<8x128xf32>
    %c2_206 = arith.constant 2 : index
    %c0_207 = arith.constant 0 : index
    %c0_208 = arith.constant 0 : index
    %253 = vector.load %arg7[%c2_206, %c0_207, %c0_208] : memref<3x1x128xf32, #tpu.memory_space<vmem>>, vector<1x1x128xf32>
    %254 = vector.shape_cast %253 : vector<1x1x128xf32> to vector<1x128xf32>
    %255 = vector.broadcast %254 : vector<1x128xf32> to vector<8x128xf32>
    %256 = arith.addf %252, %255 : vector<8x128xf32>
    %257 = math.tanh %256 : vector<8x128xf32>
    %258 = arith.truncf %257 : vector<8x128xf32> to vector<8x128xbf16>
    %c24_209 = arith.constant 24 : index
    %c0_210 = arith.constant 0 : index
    %259 = vector.load %arg11[%c24_209, %c0_210] : memref<56x128xbf16, #tpu.memory_space<vmem>>, vector<8x128xbf16>
    tpu.vector_store %arg11[%c24_209, %c0_210], %258 {strides = array<i32>} : memref<56x128xbf16, #tpu.memory_space<vmem>>, vector<8x128xbf16>,
    %c0_211 = arith.constant 0 : index
    %c0_212 = arith.constant 0 : index
    %c0_213 = arith.constant 0 : index
    %260 = vector.load %arg5[%c0_211, %c0_212, %c0_213] : memref<3x128x128xbf16, #tpu.memory_space<vmem>>, vector<1x128x128xbf16>
    %261 = vector.shape_cast %260 : vector<1x128x128xbf16> to vector<128x128xbf16>
    %cst_214 = arith.constant dense<0.000000e+00> : vector<8x128xf32>
    %262 = tpu.matmul %219, %261, %cst_214 {dimension_numbers = #tpu.dot_dimension_numbers<[1], [0], [0], [1], [0, 0, 1, 1], [], []>} : vector<8x128xbf16>, vector<128x128xbf16>, vector<8x128xf32> -> vector<8x128xf32>
    %c0_215 = arith.constant 0 : index
    %c0_216 = arith.constant 0 : index
    %c0_217 = arith.constant 0 : index
    %263 = vector.load %arg6[%c0_215, %c0_216, %c0_217] : memref<3x128x128xbf16, #tpu.memory_space<vmem>>, vector<1x128x128xbf16>
    %264 = vector.shape_cast %263 : vector<1x128x128xbf16> to vector<128x128xbf16>
    %cst_218 = arith.constant dense<0.000000e+00> : vector<8x128xf32>
    %265 = tpu.matmul %232, %264, %cst_218 {dimension_numbers = #tpu.dot_dimension_numbers<[1], [0], [0], [1], [0, 0, 1, 1], [], []>} : vector<8x128xbf16>, vector<128x128xbf16>, vector<8x128xf32> -> vector<8x128xf32>
    %266 = arith.addf %262, %265 : vector<8x128xf32>
    %c0_219 = arith.constant 0 : index
    %c0_220 = arith.constant 0 : index
    %c0_221 = arith.constant 0 : index
    %267 = vector.load %arg7[%c0_219, %c0_220, %c0_221] : memref<3x1x128xf32, #tpu.memory_space<vmem>>, vector<1x1x128xf32>
    %268 = vector.shape_cast %267 : vector<1x1x128xf32> to vector<1x128xf32>
    %269 = vector.broadcast %268 : vector<1x128xf32> to vector<8x128xf32>
    %270 = arith.addf %266, %269 : vector<8x128xf32>
    %271 = math.tanh %270 : vector<8x128xf32>
    %272 = arith.truncf %271 : vector<8x128xf32> to vector<8x128xbf16>
    %c1_222 = arith.constant 1 : index
    %c0_223 = arith.constant 0 : index
    %c0_224 = arith.constant 0 : index
    %273 = vector.load %arg5[%c1_222, %c0_223, %c0_224] : memref<3x128x128xbf16, #tpu.memory_space<vmem>>, vector<1x128x128xbf16>
    %274 = vector.shape_cast %273 : vector<1x128x128xbf16> to vector<128x128xbf16>
    %cst_225 = arith.constant dense<0.000000e+00> : vector<8x128xf32>
    %275 = tpu.matmul %232, %274, %cst_225 {dimension_numbers = #tpu.dot_dimension_numbers<[1], [0], [0], [1], [0, 0, 1, 1], [], []>} : vector<8x128xbf16>, vector<128x128xbf16>, vector<8x128xf32> -> vector<8x128xf32>
    %c1_226 = arith.constant 1 : index
    %c0_227 = arith.constant 0 : index
    %c0_228 = arith.constant 0 : index
    %276 = vector.load %arg6[%c1_226, %c0_227, %c0_228] : memref<3x128x128xbf16, #tpu.memory_space<vmem>>, vector<1x128x128xbf16>
    %277 = vector.shape_cast %276 : vector<1x128x128xbf16> to vector<128x128xbf16>
    %cst_229 = arith.constant dense<0.000000e+00> : vector<8x128xf32>
    %278 = tpu.matmul %245, %277, %cst_229 {dimension_numbers = #tpu.dot_dimension_numbers<[1], [0], [0], [1], [0, 0, 1, 1], [], []>} : vector<8x128xbf16>, vector<128x128xbf16>, vector<8x128xf32> -> vector<8x128xf32>
    %279 = arith.addf %275, %278 : vector<8x128xf32>
    %c1_230 = arith.constant 1 : index
    %c0_231 = arith.constant 0 : index
    %c0_232 = arith.constant 0 : index
    %280 = vector.load %arg7[%c1_230, %c0_231, %c0_232] : memref<3x1x128xf32, #tpu.memory_space<vmem>>, vector<1x1x128xf32>
    %281 = vector.shape_cast %280 : vector<1x1x128xf32> to vector<1x128xf32>
    %282 = vector.broadcast %281 : vector<1x128xf32> to vector<8x128xf32>
    %283 = arith.addf %279, %282 : vector<8x128xf32>
    %284 = math.tanh %283 : vector<8x128xf32>
    %285 = arith.truncf %284 : vector<8x128xf32> to vector<8x128xbf16>
    %c2_233 = arith.constant 2 : index
    %c0_234 = arith.constant 0 : index
    %c0_235 = arith.constant 0 : index
    %286 = vector.load %arg5[%c2_233, %c0_234, %c0_235] : memref<3x128x128xbf16, #tpu.memory_space<vmem>>, vector<1x128x128xbf16>
    %287 = vector.shape_cast %286 : vector<1x128x128xbf16> to vector<128x128xbf16>
    %cst_236 = arith.constant dense<0.000000e+00> : vector<8x128xf32>
    %288 = tpu.matmul %245, %287, %cst_236 {dimension_numbers = #tpu.dot_dimension_numbers<[1], [0], [0], [1], [0, 0, 1, 1], [], []>} : vector<8x128xbf16>, vector<128x128xbf16>, vector<8x128xf32> -> vector<8x128xf32>
    %c2_237 = arith.constant 2 : index
    %c0_238 = arith.constant 0 : index
    %c0_239 = arith.constant 0 : index
    %289 = vector.load %arg6[%c2_237, %c0_238, %c0_239] : memref<3x128x128xbf16, #tpu.memory_space<vmem>>, vector<1x128x128xbf16>
    %290 = vector.shape_cast %289 : vector<1x128x128xbf16> to vector<128x128xbf16>
    %cst_240 = arith.constant dense<0.000000e+00> : vector<8x128xf32>
    %291 = tpu.matmul %258, %290, %cst_240 {dimension_numbers = #tpu.dot_dimension_numbers<[1], [0], [0], [1], [0, 0, 1, 1], [], []>} : vector<8x128xbf16>, vector<128x128xbf16>, vector<8x128xf32> -> vector<8x128xf32>
    %292 = arith.addf %288, %291 : vector<8x128xf32>
    %c2_241 = arith.constant 2 : index
    %c0_242 = arith.constant 0 : index
    %c0_243 = arith.constant 0 : index
    %293 = vector.load %arg7[%c2_241, %c0_242, %c0_243] : memref<3x1x128xf32, #tpu.memory_space<vmem>>, vector<1x1x128xf32>
    %294 = vector.shape_cast %293 : vector<1x1x128xf32> to vector<1x128xf32>
    %295 = vector.broadcast %294 : vector<1x128xf32> to vector<8x128xf32>
    %296 = arith.addf %292, %295 : vector<8x128xf32>
    %297 = math.tanh %296 : vector<8x128xf32>
    %298 = arith.truncf %297 : vector<8x128xf32> to vector<8x128xbf16>
    %c32_244 = arith.constant 32 : index
    %c0_245 = arith.constant 0 : index
    %299 = vector.load %arg11[%c32_244, %c0_245] : memref<56x128xbf16, #tpu.memory_space<vmem>>, vector<8x128xbf16>
    tpu.vector_store %arg11[%c32_244, %c0_245], %298 {strides = array<i32>} : memref<56x128xbf16, #tpu.memory_space<vmem>>, vector<8x128xbf16>,
    %c1_246 = arith.constant 1 : index
    %c0_247 = arith.constant 0 : index
    %c0_248 = arith.constant 0 : index
    %300 = vector.load %arg5[%c1_246, %c0_247, %c0_248] : memref<3x128x128xbf16, #tpu.memory_space<vmem>>, vector<1x128x128xbf16>
    %301 = vector.shape_cast %300 : vector<1x128x128xbf16> to vector<128x128xbf16>
    %cst_249 = arith.constant dense<0.000000e+00> : vector<8x128xf32>
    %302 = tpu.matmul %272, %301, %cst_249 {dimension_numbers = #tpu.dot_dimension_numbers<[1], [0], [0], [1], [0, 0, 1, 1], [], []>} : vector<8x128xbf16>, vector<128x128xbf16>, vector<8x128xf32> -> vector<8x128xf32>
    %c1_250 = arith.constant 1 : index
    %c0_251 = arith.constant 0 : index
    %c0_252 = arith.constant 0 : index
    %303 = vector.load %arg6[%c1_250, %c0_251, %c0_252] : memref<3x128x128xbf16, #tpu.memory_space<vmem>>, vector<1x128x128xbf16>
    %304 = vector.shape_cast %303 : vector<1x128x128xbf16> to vector<128x128xbf16>
    %cst_253 = arith.constant dense<0.000000e+00> : vector<8x128xf32>
    %305 = tpu.matmul %285, %304, %cst_253 {dimension_numbers = #tpu.dot_dimension_numbers<[1], [0], [0], [1], [0, 0, 1, 1], [], []>} : vector<8x128xbf16>, vector<128x128xbf16>, vector<8x128xf32> -> vector<8x128xf32>
    %306 = arith.addf %302, %305 : vector<8x128xf32>
    %c1_254 = arith.constant 1 : index
    %c0_255 = arith.constant 0 : index
    %c0_256 = arith.constant 0 : index
    %307 = vector.load %arg7[%c1_254, %c0_255, %c0_256] : memref<3x1x128xf32, #tpu.memory_space<vmem>>, vector<1x1x128xf32>
    %308 = vector.shape_cast %307 : vector<1x1x128xf32> to vector<1x128xf32>
    %309 = vector.broadcast %308 : vector<1x128xf32> to vector<8x128xf32>
    %310 = arith.addf %306, %309 : vector<8x128xf32>
    %311 = math.tanh %310 : vector<8x128xf32>
    %312 = arith.truncf %311 : vector<8x128xf32> to vector<8x128xbf16>
    %c2_257 = arith.constant 2 : index
    %c0_258 = arith.constant 0 : index
    %c0_259 = arith.constant 0 : index
    %313 = vector.load %arg5[%c2_257, %c0_258, %c0_259] : memref<3x128x128xbf16, #tpu.memory_space<vmem>>, vector<1x128x128xbf16>
    %314 = vector.shape_cast %313 : vector<1x128x128xbf16> to vector<128x128xbf16>
    %cst_260 = arith.constant dense<0.000000e+00> : vector<8x128xf32>
    %315 = tpu.matmul %285, %314, %cst_260 {dimension_numbers = #tpu.dot_dimension_numbers<[1], [0], [0], [1], [0, 0, 1, 1], [], []>} : vector<8x128xbf16>, vector<128x128xbf16>, vector<8x128xf32> -> vector<8x128xf32>
    %c2_261 = arith.constant 2 : index
    %c0_262 = arith.constant 0 : index
    %c0_263 = arith.constant 0 : index
    %316 = vector.load %arg6[%c2_261, %c0_262, %c0_263] : memref<3x128x128xbf16, #tpu.memory_space<vmem>>, vector<1x128x128xbf16>
    %317 = vector.shape_cast %316 : vector<1x128x128xbf16> to vector<128x128xbf16>
    %cst_264 = arith.constant dense<0.000000e+00> : vector<8x128xf32>
    %318 = tpu.matmul %298, %317, %cst_264 {dimension_numbers = #tpu.dot_dimension_numbers<[1], [0], [0], [1], [0, 0, 1, 1], [], []>} : vector<8x128xbf16>, vector<128x128xbf16>, vector<8x128xf32> -> vector<8x128xf32>
    %319 = arith.addf %315, %318 : vector<8x128xf32>
    %c2_265 = arith.constant 2 : index
    %c0_266 = arith.constant 0 : index
    %c0_267 = arith.constant 0 : index
    %320 = vector.load %arg7[%c2_265, %c0_266, %c0_267] : memref<3x1x128xf32, #tpu.memory_space<vmem>>, vector<1x1x128xf32>
    %321 = vector.shape_cast %320 : vector<1x1x128xf32> to vector<1x128xf32>
    %322 = vector.broadcast %321 : vector<1x128xf32> to vector<8x128xf32>
    %323 = arith.addf %319, %322 : vector<8x128xf32>
    %324 = math.tanh %323 : vector<8x128xf32>
    %325 = arith.truncf %324 : vector<8x128xf32> to vector<8x128xbf16>
    %c40_268 = arith.constant 40 : index
    %c0_269 = arith.constant 0 : index
    %326 = vector.load %arg11[%c40_268, %c0_269] : memref<56x128xbf16, #tpu.memory_space<vmem>>, vector<8x128xbf16>
    tpu.vector_store %arg11[%c40_268, %c0_269], %325 {strides = array<i32>} : memref<56x128xbf16, #tpu.memory_space<vmem>>, vector<8x128xbf16>,
    %c2_270 = arith.constant 2 : index
    %c0_271 = arith.constant 0 : index
    %c0_272 = arith.constant 0 : index
    %327 = vector.load %arg5[%c2_270, %c0_271, %c0_272] : memref<3x128x128xbf16, #tpu.memory_space<vmem>>, vector<1x128x128xbf16>
    %328 = vector.shape_cast %327 : vector<1x128x128xbf16> to vector<128x128xbf16>
    %cst_273 = arith.constant dense<0.000000e+00> : vector<8x128xf32>
    %329 = tpu.matmul %312, %328, %cst_273 {dimension_numbers = #tpu.dot_dimension_numbers<[1], [0], [0], [1], [0, 0, 1, 1], [], []>} : vector<8x128xbf16>, vector<128x128xbf16>, vector<8x128xf32> -> vector<8x128xf32>
    %c2_274 = arith.constant 2 : index
    %c0_275 = arith.constant 0 : index
    %c0_276 = arith.constant 0 : index
    %330 = vector.load %arg6[%c2_274, %c0_275, %c0_276] : memref<3x128x128xbf16, #tpu.memory_space<vmem>>, vector<1x128x128xbf16>
    %331 = vector.shape_cast %330 : vector<1x128x128xbf16> to vector<128x128xbf16>
    %cst_277 = arith.constant dense<0.000000e+00> : vector<8x128xf32>
    %332 = tpu.matmul %325, %331, %cst_277 {dimension_numbers = #tpu.dot_dimension_numbers<[1], [0], [0], [1], [0, 0, 1, 1], [], []>} : vector<8x128xbf16>, vector<128x128xbf16>, vector<8x128xf32> -> vector<8x128xf32>
    %333 = arith.addf %329, %332 : vector<8x128xf32>
    %c2_278 = arith.constant 2 : index
    %c0_279 = arith.constant 0 : index
    %c0_280 = arith.constant 0 : index
    %334 = vector.load %arg7[%c2_278, %c0_279, %c0_280] : memref<3x1x128xf32, #tpu.memory_space<vmem>>, vector<1x1x128xf32>
    %335 = vector.shape_cast %334 : vector<1x1x128xf32> to vector<1x128xf32>
    %336 = vector.broadcast %335 : vector<1x128xf32> to vector<8x128xf32>
    %337 = arith.addf %333, %336 : vector<8x128xf32>
    %338 = math.tanh %337 : vector<8x128xf32>
    %339 = arith.truncf %338 : vector<8x128xf32> to vector<8x128xbf16>
    %c48_281 = arith.constant 48 : index
    %c0_282 = arith.constant 0 : index
    %340 = vector.load %arg11[%c48_281, %c0_282] : memref<56x128xbf16, #tpu.memory_space<vmem>>, vector<8x128xbf16>
    tpu.vector_store %arg11[%c48_281, %c0_282], %339 {strides = array<i32>} : memref<56x128xbf16, #tpu.memory_space<vmem>>, vector<8x128xbf16>,
    %c0_283 = arith.constant 0 : index
    %c0_284 = arith.constant 0 : index
    %341 = vector.load %arg11[%c0_283, %c0_284] : memref<56x128xbf16, #tpu.memory_space<vmem>>, vector<56x128xbf16>
    %c0_285 = arith.constant 0 : index
    %c0_286 = arith.constant 0 : index
    %342 = vector.load %arg8[%c0_285, %c0_286] : memref<128x128xbf16, #tpu.memory_space<vmem>>, vector<128x128xbf16>
    %cst_287 = arith.constant dense<0.000000e+00> : vector<56x128xf32>
    %343 = tpu.matmul %341, %342, %cst_287 {dimension_numbers = #tpu.dot_dimension_numbers<[1], [0], [0], [1], [0, 0, 1, 1], [], []>} : vector<56x128xbf16>, vector<128x128xbf16>, vector<56x128xf32> -> vector<56x128xf32>
    %c0_288 = arith.constant 0 : index
    %c0_289 = arith.constant 0 : index
    %344 = vector.load %arg9[%c0_288, %c0_289] : memref<1x128xf32, #tpu.memory_space<vmem>>, vector<1x128xf32>
    %345 = vector.broadcast %344 : vector<1x128xf32> to vector<56x128xf32>
    %346 = arith.addf %343, %345 : vector<56x128xf32>
    %c0_290 = arith.constant 0 : index
    %c0_291 = arith.constant 0 : index
    %347 = vector.load %arg1[%c0_290, %c0_291] : memref<56x1xi32, #tpu.memory_space<vmem>>, vector<56x1xi32>
    %c0_i32 = arith.constant 0 : i32
    %348 = vector.broadcast %c0_i32 : i32 to vector<56x1xi32>
    %349 = arith.cmpi sge, %347, %348 : vector<56x1xi32>
    %350 = arith.extui %349 : vector<56x1xi1> to vector<56x1xi32>
    %351 = arith.sitofp %350 : vector<56x1xi32> to vector<56x1xf32>
    %cst_292 = arith.constant dense<0xFF800000> : vector<56xf32>
    %352 = vector.multi_reduction <maximumf>, %346, %cst_292 [1] : vector<56x128xf32> to vector<56xf32>
    %353 = vector.shape_cast %352 : vector<56xf32> to vector<56x1xf32>
    %354 = vector.broadcast %353 : vector<56x1xf32> to vector<56x128xf32>
    %355 = arith.subf %346, %354 : vector<56x128xf32>
    %356 = math.exp %355 : vector<56x128xf32>
    %cst_293 = arith.constant dense<0.000000e+00> : vector<56xf32>
    %357 = vector.multi_reduction <add>, %356, %cst_293 [1] : vector<56x128xf32> to vector<56xf32>
    %358 = vector.shape_cast %357 : vector<56xf32> to vector<56x1xf32>
    %359 = math.log %358 : vector<56x1xf32>
    %360 = tpu.iota {dimensions = array<i32: 1>} : vector<56x128xi32>
    %361 = vector.broadcast %347 : vector<56x1xi32> to vector<56x128xi32>
    %362 = arith.cmpi eq, %360, %361 : vector<56x128xi32>
    %cst_294 = arith.constant 0.000000e+00 : f32
    %363 = vector.broadcast %cst_294 : f32 to vector<56x128xf32>
    %364 = arith.select %362, %346, %363 : vector<56x128xi1>, vector<56x128xf32>
    %cst_295 = arith.constant dense<0.000000e+00> : vector<56xf32>
    %365 = vector.multi_reduction <add>, %364, %cst_295 [1] : vector<56x128xf32> to vector<56xf32>
    %366 = vector.shape_cast %365 : vector<56xf32> to vector<56x1xf32>
    %367 = arith.addf %353, %359 : vector<56x1xf32>
    %368 = arith.subf %367, %366 : vector<56x1xf32>
    %369 = arith.mulf %351, %368 : vector<56x1xf32>
    %370 = vector.shape_cast %369 : vector<56x1xf32> to vector<1x56x1xf32>
    %cst_296 = arith.constant dense<0.000000e+00> : vector<1xf32>
    %371 = vector.multi_reduction <add>, %370, %cst_296 [1, 2] : vector<1x56x1xf32> to vector<1xf32>
    %372 = vector.shape_cast %371 : vector<1xf32> to vector<1x1x1xf32>
    %373 = vector.extract %372[0, 0, 0] : f32 from vector<1x1x1xf32>
    %374 = vector.shape_cast %351 : vector<56x1xf32> to vector<1x56x1xf32>
    %cst_297 = arith.constant dense<0.000000e+00> : vector<1xf32>
    %375 = vector.multi_reduction <add>, %374, %cst_297 [1, 2] : vector<1x56x1xf32> to vector<1xf32>
    %376 = vector.shape_cast %375 : vector<1xf32> to vector<1x1x1xf32>
    %377 = vector.extract %376[0, 0, 0] : f32 from vector<1x1x1xf32>
    %cst_298 = arith.constant 1.000000e+00 : f32
    %378 = arith.maximumf %377, %cst_298 : f32
    %379 = arith.divf %373, %378 : f32
    %380 = vector.broadcast %379 : f32 to vector<1x1xf32>
    %c0_299 = arith.constant 0 : index
    %c0_300 = arith.constant 0 : index
    %381 = vector.load %arg10[%c0_299, %c0_300] : memref<1x1xf32, #tpu.memory_space<vmem>>, vector<1x1xf32>
    tpu.vector_store %arg10[%c0_299, %c0_300], %380 {strides = array<i32>} : memref<1x1xf32, #tpu.memory_space<vmem>>, vector<1x1xf32>,
    return
  }
}

</mosaic_0001>

<bundles_post_ra>
// kernel: rnn_lm_loss.1
= control target key start
LH: loop header
LB: loop body
LE: loop exit
PB: predicated region body
PF: predicated region fallthrough
CT: control target
= control target key end

     0   :  { %v6234_v3 = vmov 0   ;;  %s7663_s0 = inlined_call_operand.vmem [shape: bf16[56,128], index: 0, kind: input, shape index: {}]   ;;  %s7664_s1 = inlined_call_operand.vmem [shape: s32[56,1], index: 1, kind: input, shape index: {}]   ;;  %s7665_s2 = inlined_call_operand.vmem [shape: bf16[128,128], index: 2, kind: input, shape index: {}]   ;;  %s7666_s3 = inlined_call_operand.vmem [shape: bf16[128,128], index: 3, kind: input, shape index: {}]   ;;  %s7667_s4 = inlined_call_operand.vmem [shape: f32[1,128], index: 4, kind: input, shape index: {}]   ;;  %s7668_s5 = inlined_call_operand.vmem [shape: bf16[3,128,128], index: 5, kind: input, shape index: {}]   ;;  %s7669_s6 = inlined_call_operand.vmem [shape: bf16[3,128,128], index: 6, kind: input, shape index: {}]   ;;  %s7670_s7 = inlined_call_operand.vmem [shape: f32[3,1,128], index: 7, kind: input, shape index: {}]   ;;  %s7671_s8 = inlined_call_operand.vmem [shape: bf16[128,128], index: 8, kind: input, shape index: {}]   ;;  %s7672_s9 = inlined_call_operand.vmem [shape: f32[1,128], index: 9, kind: input, shape index: {}]   ;;  %s7673_s10 = inlined_call_operand.hbm [shape: f32[1,1], index: 10, kind: output, shape index: {}]  }
   0x1   :  { %v5740_v0 = vld [vmem:[%s7665_s2 + $0x38] sm:$0xff]  ;;  %v5739_v2 = vld [vmem:[%s7665_s2 + $0x30] sm:$0xff]  ;;  %6099 = vset.pattern.permute.xlu1 %v6234_v3  ;;  %6100 = vset.pattern.permute.xlu2 %v6234_v3  ;;  %v5738_v5 = vld [vmem:[%s7665_s2 + $0x28] sm:$0xff] }
   0x2   :  { %v6299_v1 = vld [vmem:[%s7666_s3 + $0x38] sm:$0xff]  ;;  %134 = vmatpush.bf16.msra.mxu0 %v5740_v0  ;;  %v6309_v4 = vld [vmem:[%s7666_s3 + $0x30] sm:$0xff]  ;;  %6101 = vset.pattern.permute.xlu0 %v6234_v3  ;;  %v6320_v6 = vld [vmem:[%s7666_s3 + $0x28] sm:$0xff] }
   0x3   :  { %242 = vmatpush.bf16.msra.mxu1 %v6299_v1  ;;  %260 = vmatpush.bf16.msra.mxu2 %v6299_v1  ;;  %v6325_v7 = vld [vmem:[%s7669_s6 + $0x38] sm:$0xff]  ;;  %v5737_v8 = vld [vmem:[%s7665_s2 + $0x20] sm:$0xff] }
   0x4   :  { %455 = vmatpush.bf16.msra.mxu3 %v6325_v7  ;;  %v6336_v9 = vld [vmem:[%s7666_s3 + $0x20] sm:$0xff] }
   0x6   :  { %135 = vmatpush.bf16.msra.mxu0 %v5739_v2 }
   0x7   :  { %243 = vmatpush.bf16.msra.mxu1 %v6309_v4  ;;  %261 = vmatpush.bf16.msra.mxu2 %v6309_v4 }
   0xa   :  { %136 = vmatpush.bf16.msra.mxu0 %v5738_v5 }
   0xb   :  { %244 = vmatpush.bf16.msra.mxu1 %v6320_v6  ;;  %262 = vmatpush.bf16.msra.mxu2 %v6320_v6 }
   0xc   :  { %15 = vsyncpa [#allocation4], 0  ;;  %v5736_v10 = vld [vmem:[%s7665_s2 + $0x18] sm:$0xff]  ;;  %v5735_v12 = vld [vmem:[%s7665_s2 + $0x10] sm:$0xff]  ;;  %vm3844_vm2 = vcmask 7168   ;;  %s6236_s21 = smov 1.0  }
   0xd   :  { %v6347_v11 = vld [vmem:[%s7666_s3 + $0x18] sm:$0xff]  ;;  %v6356_v13 = vld [vmem:[%s7669_s6 + $0x30] sm:$0xff]  ;;  %v5734_v15 = vld [vmem:[%s7665_s2 + $0x8] sm:$0xff]  ;;  %s3917_s25 = sshll.u32 %s7673_s10, 4  ;;  %s3918_s25 = int_to_ptr.hbm [resolvable:$true] %s3917_s25 }
   0xe   :  { %137 = vmatpush.bf16.msra.mxu0 %v5737_v8  ;;  %v6362_v14 = vld [vmem:[%s7666_s3 + $0x10] sm:$0xff]  ;;  %456 = vmatpush.bf16.msra.mxu3 %v6356_v13  ;;  %v6372_v16 = vld [vmem:[%s7669_s6 + $0x28] sm:$0xff]  ;;  %v5733_v18 = vld [vmem:[%s7665_s2] sm:$0xff] }
   0xf   :  { %245 = vmatpush.bf16.msra.mxu1 %v6336_v9  ;;  %263 = vmatpush.bf16.msra.mxu2 %v6336_v9  ;;  %v6378_v17 = vld [vmem:[%s7666_s3 + $0x8] sm:$0xff]  ;;  %v6389_v19 = vld [vmem:[%s7666_s3] sm:$0xff]  ;;  %v5732_v22 = vld [vmem:[%s7663_s0 + $0x10] sm:$0xff] }
  0x10   :  { %v5730_v20 = vld [vmem:[%s7663_s0] sm:$0xff]  ;;  %v5731_v21 = vld [vmem:[%s7663_s0 + $0x8] sm:$0xff]  ;;  %v6423_v24 = vld [vmem:[%s7668_s5 + $0x38] sm:$0xff] }
  0x11   :  { %v6418_v23 = vld [vmem:[%s7669_s6 + $0x20] sm:$0xff]  ;;  %v6430_v25 = vld [vmem:[%s7668_s5 + $0x30] sm:$0xff]  ;;  %v6437_v26 = vld [vmem:[%s7668_s5 + $0x28] sm:$0xff] }
  0x12   :  { %138 = vmatpush.bf16.msra.mxu0 %v5736_v10  ;;  %457 = vmatpush.bf16.msra.mxu3 %v6372_v16  ;;  %v43_v27 = vld [vmem:[%s7663_s0 + $0x18] sm:$0xf]  ;;  %v6451_v30 = vld [vmem:[%s7668_s5 + $0x20] sm:$0xff]  ;;  %v5759_v33 = vld [vmem:[%s7669_s6 + $0x10] sm:$0xff] }
  0x13   :  { %246 = vmatpush.bf16.msra.mxu1 %v6347_v11  ;;  %264 = vmatpush.bf16.msra.mxu2 %v6347_v11  ;;  %v77_v28 = vunpack.c.l.b16 %v43_v27  ;;  %v6446_v29 = vld [vmem:[%s7669_s6 + $0x18] sm:$0xff]  ;;  %v6468_v34 = vld [vmem:[%s7668_s5 + $0x10] sm:$0xff]  ;;  %v5758_v35 = vld [vmem:[%s7669_s6 + $0x8] sm:$0xff] }
  0x14   :  { %v6459_v32 = vld [vmem:[%s7668_s5 + $0x18] sm:$0xff]  ;;  %v6477_v36 = vld [vmem:[%s7668_s5 + $0x8] sm:$0xff]  ;;  %v5757_v37 = vld [vmem:[%s7669_s6] sm:$0xff] }
  0x15   :  { %v81_v31 = vpack.c.b16 %v77_v28, %v77_v28  ;;  %v6486_v38 = vld [vmem:[%s7668_s5] sm:$0xff]  ;;  %v5772_v5 = vld [vmem:[%s7668_s5 + $0x78] sm:$0xff]  ;;  %v5770_v10 = vld [vmem:[%s7668_s5 + $0x68] sm:$0xff] }
  0x16   :  { %139 = vmatpush.bf16.msra.mxu0 %v5735_v12  ;;  %458 = vmatpush.bf16.msra.mxu3 %v6418_v23  ;;  %v6102_v41 = vld [vmem:[%s7667_s4] ss:$0 sm:$0xff] }
  0x17   :  { %247 = vmatpush.bf16.msra.mxu1 %v6362_v14  ;;  %265 = vmatpush.bf16.msra.mxu2 %v6362_v14  ;;  %v5769_v12 = vld [vmem:[%s7668_s5 + $0x60] sm:$0xff] }
  0x1a   :  { %140 = vmatpush.bf16.msra.mxu0 %v5734_v15  ;;  %459 = vmatpush.bf16.msra.mxu3 %v6446_v29  ;;  %v5775_v15 = vld [vmem:[%s7669_s6 + $0x50] sm:$0xff] }
  0x1b   :  { %248 = vmatpush.bf16.msra.mxu1 %v6378_v17  ;;  %266 = vmatpush.bf16.msra.mxu2 %v6378_v17 }
  0x1e   :  { %141 = vmatpush.bf16.msra.mxu0 %v5733_v18  ;;  %460 = vmatpush.bf16.msra.mxu3 %v5759_v33  ;;  %v5766_v18 = vld [vmem:[%s7668_s5 + $0x48] sm:$0xff] }
  0x1f   :  { %249 = vmatpush.bf16.msra.mxu1 %v6389_v19  ;;  %267 = vmatpush.bf16.msra.mxu2 %v6389_v19 }
  0x21   :  { %142 = vmatmul.bf16.vlgmr.msra.gmra.mxu0 %v5730_v20  ;;  %v5765_v20 = vld [vmem:[%s7668_s5 + $0x40] sm:$0xff] }
  0x22   :  { %356 = vmatpush.bf16.msrb.mxu0 %v6325_v7  ;;  %250 = vmatmul.bf16.vlgmr.msra.gmra.mxu1 %v6234_v3 }
  0x23   :  { %439 = vmatpush.bf16.msrb.mxu2 %v6299_v1  ;;  %417 = vmatpush.bf16.msrb.mxu1 %v6423_v24 }
  0x24   :  { %461 = vmatpush.bf16.msra.mxu3 %v5758_v35 }
  0x26   :  { %357 = vmatpush.bf16.msrb.mxu0 %v6356_v13 }
  0x27   :  { %440 = vmatpush.bf16.msrb.mxu2 %v6309_v4  ;;  %418 = vmatpush.bf16.msrb.mxu1 %v6430_v25 }
  0x28   :  { %462 = vmatpush.bf16.msra.mxu3 %v5757_v37 }
  0x2a   :  { %358 = vmatpush.bf16.msrb.mxu0 %v6372_v16 }
  0x2b   :  { %441 = vmatpush.bf16.msrb.mxu2 %v6320_v6  ;;  %419 = vmatpush.bf16.msrb.mxu1 %v6437_v26 }
  0x2c   :  { %650 = vmatpush.bf16.msrb.mxu3 %v6299_v1 }
  0x2e   :  { %359 = vmatpush.bf16.msrb.mxu0 %v6418_v23 }
  0x2f   :  { %442 = vmatpush.bf16.msrb.mxu2 %v6336_v9  ;;  %420 = vmatpush.bf16.msrb.mxu1 %v6451_v30 }
  0x30   :  { %651 = vmatpush.bf16.msrb.mxu3 %v6309_v4  ;;  %v5780_v4 = vld [vmem:[%s7669_s6 + $0x78] sm:$0xff] }
  0x31   :  { %147 = vmatmul.bf16.gmra.mxu0 %v5731_v21  ;;  %v6568_v21 = vld [vmem:[%s7670_s7] ss:$0 sm:$0xff] }
  0x32   :  { %360 = vmatpush.bf16.msrb.mxu0 %v6446_v29 }
  0x33   :  { %443 = vmatpush.bf16.msrb.mxu2 %v6347_v11  ;;  %421 = vmatpush.bf16.msrb.mxu1 %v6459_v32 }
  0x34   :  { %652 = vmatpush.bf16.msrb.mxu3 %v6320_v6  ;;  %v5779_v6 = vld [vmem:[%s7669_s6 + $0x70] sm:$0xff] }
  0x36   :  { %361 = vmatpush.bf16.msrb.mxu0 %v5759_v33 }
  0x37   :  { %444 = vmatpush.bf16.msrb.mxu2 %v6362_v14  ;;  %422 = vmatpush.bf16.msrb.mxu1 %v6468_v34 }
  0x38   :  { %653 = vmatpush.bf16.msrb.mxu3 %v6336_v9  ;;  %v5778_v9 = vld [vmem:[%s7669_s6 + $0x68] sm:$0xff] }
  0x3a   :  { %362 = vmatpush.bf16.msrb.mxu0 %v5758_v35 }
  0x3b   :  { %445 = vmatpush.bf16.msrb.mxu2 %v6378_v17  ;;  %423 = vmatpush.bf16.msrb.mxu1 %v6477_v36 }
  0x3c   :  { %654 = vmatpush.bf16.msrb.mxu3 %v6347_v11  ;;  %v5777_v11 = vld [vmem:[%s7669_s6 + $0x60] sm:$0xff] }
  0x3e   :  { %363 = vmatpush.bf16.msrb.mxu0 %v5757_v37 }
  0x3f   :  { %446 = vmatpush.bf16.msrb.mxu2 %v6389_v19  ;;  %424 = vmatpush.bf16.msrb.mxu1 %v6486_v38 }
  0x40   :  { %655 = vmatpush.bf16.msrb.mxu3 %v6362_v14  ;;  %v5768_v14 = vld [vmem:[%s7668_s5 + $0x58] sm:$0xff] }
  0x41   :  { %152 = vmatmul.bf16.gmra.mxu0 %v5732_v22 }
  0x42   :  { %468 = vmatpush.bf16.msra.mxu0 %v6423_v24 }
  0x43   :  { %566 = vmatpush.bf16.msra.mxu1 %v5780_v4 }
  0x44   :  { %656 = vmatpush.bf16.msrb.mxu3 %v6378_v17  ;;  %v5774_v17 = vld [vmem:[%s7669_s6 + $0x48] sm:$0xff] }
  0x46   :  { %469 = vmatpush.bf16.msra.mxu0 %v6430_v25 }
  0x47   :  { %567 = vmatpush.bf16.msra.mxu1 %v5779_v6 }
  0x48   :  { %657 = vmatpush.bf16.msrb.mxu3 %v6389_v19  ;;  %v5773_v19 = vld [vmem:[%s7669_s6 + $0x40] sm:$0xff] }
  0x4a   :  { %470 = vmatpush.bf16.msra.mxu0 %v6437_v26 }
  0x4b   :  { %568 = vmatpush.bf16.msra.mxu1 %v5778_v9 }
  0x4e   :  { %471 = vmatpush.bf16.msra.mxu0 %v6451_v30 }
  0x4f   :  { %569 = vmatpush.bf16.msra.mxu1 %v5777_v11 }
  0x51   :  { %157 = vmatmul.bf16.gmra.mxu0 %v81_v31 }
  0x52   :  { %472 = vmatpush.bf16.msra.mxu0 %v6459_v32 }
  0x56   :  { %473 = vmatpush.bf16.msra.mxu0 %v6468_v34 }
  0x5a   :  { %474 = vmatpush.bf16.msra.mxu0 %v6477_v36 }
  0x5e   :  { %475 = vmatpush.bf16.msra.mxu0 %v6486_v38 }
  0x61   :  { %364 = vmatmul.bf16.vlgmr.msrb.gmra.mxu0 %v6234_v3 }
  0x62   :  { %666 = vmatpush.bf16.msrb.mxu0 %v6325_v7  ;;  %v5771_v7 = vld [vmem:[%s7668_s5 + $0x70] sm:$0xff] }
  0x66   :  { %667 = vmatpush.bf16.msrb.mxu0 %v6356_v13  ;;  %v5776_v13 = vld [vmem:[%s7669_s6 + $0x58] sm:$0xff] }
  0x67   :  { %570 = vmatpush.bf16.msra.mxu1 %v5776_v13 }
  0x6a   :  { %668 = vmatpush.bf16.msrb.mxu0 %v6372_v16  ;;  %v5767_v16 = vld [vmem:[%s7668_s5 + $0x50] sm:$0xff] }
  0x6b   :  { %571 = vmatpush.bf16.msra.mxu1 %v5775_v15 }
  0x6e   :  { %669 = vmatpush.bf16.msrb.mxu0 %v6418_v23 }
  0x6f   :  { %572 = vmatpush.bf16.msra.mxu1 %v5774_v17 }
  0x72   :  { %670 = vmatpush.bf16.msrb.mxu0 %v6446_v29 }
  0x73   :  { %573 = vmatpush.bf16.msra.mxu1 %v5773_v19 }
  0x76   :  { %671 = vmatpush.bf16.msrb.mxu0 %v5759_v33 }
  0x7a   :  { %672 = vmatpush.bf16.msrb.mxu0 %v5758_v35 }
  0x7e   :  { %673 = vmatpush.bf16.msrb.mxu0 %v5757_v37 }
  0x9e   :  { %v143_v39 = vpop.f32.mrf.mxu0 }
  0x9f   :  { %v251_v40 = vpop.f32.mrf.mxu1  ;;  %v144_v43 = vadd.f32 %v6102_v41, %v143_v39 }
  0xa6   :  { %v145_v42 = vpop.f32.mrf.mxu0 }
  0xa7   :  { %v146_v44 = vadd.f32 %v6102_v41, %v145_v42  ;;  %v253_v45 = vpop.f32.mrf.mxu1  ;;  %v5785_v42 = vld [vmem:[%s7668_s5 + $0xa0] sm:$0xff] }
  0xa8   :  { %v5784_v45 = vld [vmem:[%s7668_s5 + $0x98] sm:$0xff] }
  0xa9   :  { %v6075_v46 = vpack.c.bf16 %v146_v44, %v144_v43  ;;  %v5791_v44 = vld [vmem:[%s7669_s6 + $0x90] sm:$0xff] }
  0xab   :  { %6076 = vst [vmem:[#allocation2] sm:$0xff] %v6075_v46   ;;  %v5790_v46 = vld [vmem:[%s7669_s6 + $0x88] sm:$0xff] }
  0xae   :  { %v148_v47 = vpop.f32.mrf.mxu0 }
  0xaf   :  { %v149_v51 = vadd.f32 %v6102_v41, %v148_v47  ;;  %v5783_v47 = vld [vmem:[%s7668_s5 + $0x90] sm:$0xff] }
  0xb2   :  { %v6505_v48 = vld [vmem:[#allocation2] sm:$0xff]  }
  0xb3   :  { %v177_v49 = vunpack.c.l.bf16 %v6505_v48  ;;  %v259_v28 = vunpack.c.h.bf16 %v6505_v48 }
  0xb5   :  { %v255_v50 = vadd.f32 %v251_v40, %v177_v49  ;;  %v5789_v49 = vld [vmem:[%s7669_s6 + $0x80] sm:$0xff] }
  0xb6   :  { %v150_v52 = vpop.f32.mrf.mxu0 }
  0xb7   :  { %6122 = vtanh.f32 %v255_v50  ;;  %v151_v53 = vadd.f32 %v6102_v41, %v150_v52  ;;  %v5782_v50 = vld [vmem:[%s7668_s5 + $0x88] sm:$0xff] }
  0xb9   :  { %v6080_v54 = vpack.c.bf16 %v151_v53, %v149_v51  ;;  %v5781_v51 = vld [vmem:[%s7668_s5 + $0x80] sm:$0xff] }
  0xbb   :  { %6087 = vst [vmem:[#allocation2 + $0x8] sm:$0xff] %v6080_v54  }
  0xbd   :  { %v6123_v55 = vpop.eup %6122 }
  0xbe   :  { %v257_v56 = vpack.c.bf16 %v6123_v55, %v6123_v55  ;;  %v153_v57 = vpop.f32.mrf.mxu0 }
  0xbf   :  { %v154_v58 = vadd.f32 %v6102_v41, %v153_v57 }
  0xc0   :  { %268 = vmatmul.bf16.vlgmr.msra.gmra.mxu2 %v257_v56  ;;  %425 = vmatmul.bf16.vlgmr.msrb.gmra.mxu1 %v257_v56  ;;  %v5804_v56 = vld [vmem:[%s7666_s3 + $0x38] sm:$0xff] }
  0xc1   :  { %627 = vmatpush.bf16.msra.mxu2 %v5772_v5  ;;  %679 = vmatpush.bf16.msrb.mxu1 %v6423_v24 }
  0xc2   :  { %v6629_v54 = vld [vmem:[#allocation2 + $0x8] sm:$0xff]  }
  0xc5   :  { %628 = vmatpush.bf16.msra.mxu2 %v5771_v7  ;;  %680 = vmatpush.bf16.msrb.mxu1 %v6430_v25  ;;  %v5796_v25 = vld [vmem:[%s7669_s6 + $0xb8] sm:$0xff] }
  0xc6   :  { %v155_v59 = vpop.f32.mrf.mxu0 }
  0xc7   :  { %v156_v60 = vadd.f32 %v6102_v41, %v155_v59 }
  0xc9   :  { %v6085_v61 = vpack.c.bf16 %v156_v60, %v154_v58  ;;  %629 = vmatpush.bf16.msra.mxu2 %v5770_v10  ;;  %681 = vmatpush.bf16.msrb.mxu1 %v6437_v26  ;;  %v5795_v26 = vld [vmem:[%s7669_s6 + $0xb0] sm:$0xff]  ;;  %v438_v58 = vunpack.c.l.bf16 %v6629_v54 }
  0xca   :  { %v5803_v60 = vld [vmem:[%s7666_s3 + $0x30] sm:$0xff] }
  0xcb   :  { %6088 = vst [vmem:[#allocation2 + $0x10] sm:$0xff] %v6085_v61  }
  0xcd   :  { %630 = vmatpush.bf16.msra.mxu2 %v5769_v12  ;;  %682 = vmatpush.bf16.msrb.mxu1 %v6451_v30  ;;  %v5788_v30 = vld [vmem:[%s7668_s5 + $0xb8] sm:$0xff] }
  0xce   :  { %v158_v62 = vpop.f32.mrf.mxu0 }
  0xcf   :  { %v159_v63 = vadd.f32 %v6102_v41, %v158_v62  ;;  %v5792_v41 = vld [vmem:[%s7669_s6 + $0x98] sm:$0xff] }
  0xd0   :  { %574 = vmatmul.bf16.vlgmr.msra.gmra.mxu1 %v6234_v3 }
  0xd1   :  { %v168_v0 = vpack.c.bf16 %v159_v63, %v159_v63  ;;  %631 = vmatpush.bf16.msra.mxu2 %v5768_v14  ;;  %683 = vmatpush.bf16.msrb.mxu1 %v6459_v32  ;;  %v5794_v32 = vld [vmem:[%s7669_s6 + $0xa8] sm:$0xff] }
  0xd3   :  { %175 = vst [vmem:[#allocation2 + $0x18] sm:$0xf] %v168_v0  ;;  %v5802_v0 = vld [vmem:[%s7666_s3 + $0x28] sm:$0xff] }
  0xd5   :  { %632 = vmatpush.bf16.msra.mxu2 %v5767_v16  ;;  %684 = vmatpush.bf16.msrb.mxu1 %v6468_v34  ;;  %v5787_v34 = vld [vmem:[%s7668_s5 + $0xb0] sm:$0xff] }
  0xd6   :  { %v160_v1 = vpop.f32.mrf.mxu0 }
  0xd9   :  { %633 = vmatpush.bf16.msra.mxu2 %v5766_v18  ;;  %685 = vmatpush.bf16.msrb.mxu1 %v6477_v36  ;;  %v5793_v36 = vld [vmem:[%s7669_s6 + $0xa0] sm:$0xff] }
  0xdd   :  { %634 = vmatpush.bf16.msra.mxu2 %v5765_v20  ;;  %686 = vmatpush.bf16.msrb.mxu1 %v6486_v38  ;;  %v5786_v38 = vld [vmem:[%s7668_s5 + $0xa8] sm:$0xff] }
  0xde   :  { %v365_v2 = vpop.f32.mrf.mxu0 }
  0xe1   :  { %867 = vmatpush.bf16.msra.mxu1 %v5788_v30  ;;  %v5851_v30 = vld [vmem:[%s7669_s6 + $0xb0] sm:$0xff] }
  0xe5   :  { %868 = vmatpush.bf16.msra.mxu1 %v5787_v34  ;;  %v5836_v34 = vld [vmem:[%s7669_s6 + $0x78] sm:$0xff] }
  0xe6   :  { %v367_v8 = vpop.f32.mrf.mxu0 }
  0xe7   :  { %v5801_v8 = vld [vmem:[%s7666_s3 + $0x20] sm:$0xff] }
  0xe9   :  { %869 = vmatpush.bf16.msra.mxu1 %v5786_v38  ;;  %v5844_v38 = vld [vmem:[%s7668_s5 + $0xb8] sm:$0xff] }
  0xed   :  { %870 = vmatpush.bf16.msra.mxu1 %v5785_v42  ;;  %v5835_v42 = vld [vmem:[%s7669_s6 + $0x70] sm:$0xff] }
  0xf1   :  { %871 = vmatpush.bf16.msra.mxu1 %v5784_v45  ;;  %v5849_v45 = vld [vmem:[%s7669_s6 + $0xa0] sm:$0xff] }
  0xf5   :  { %872 = vmatpush.bf16.msra.mxu1 %v5783_v47  ;;  %v5825_v47 = vld [vmem:[%s7668_s5 + $0x60] sm:$0xff] }
  0xf9   :  { %873 = vmatpush.bf16.msra.mxu1 %v5782_v50  ;;  %v5833_v50 = vld [vmem:[%s7669_s6 + $0x60] sm:$0xff] }
  0xfd   :  { %874 = vmatpush.bf16.msra.mxu1 %v5781_v51  ;;  %v5824_v51 = vld [vmem:[%s7668_s5 + $0x58] sm:$0xff] }
 0x13d   :  { %v426_v22 = vpop.f32.mrf.mxu1 }
 0x13e   :  { %v427_v23 = vadd.f32 %v426_v22, %v365_v2  ;;  %v5812_v2 = vld [vmem:[%s7668_s5 + $0x38] sm:$0xff]  ;;  %v5817_v22 = vld [vmem:[%s7669_s6 + $0x20] sm:$0xff] }
 0x140   :  { %v434_v27 = vadd.f32 %v6568_v21, %v427_v23  ;;  %v5808_v23 = vld [vmem:[%s7668_s5 + $0x18] sm:$0xff] }
 0x142   :  { %6124 = vtanh.f32 %v434_v27 }
 0x143   :  { %v269_v29 = vpop.f32.mrf.mxu2 }
 0x144   :  { %v273_v31 = vadd.f32 %v269_v29, %v259_v28  ;;  %v5816_v28 = vld [vmem:[%s7669_s6 + $0x18] sm:$0xff] }
 0x145   :  { %v428_v33 = vpop.f32.mrf.mxu1 }
 0x146   :  { %6126 = vtanh.f32 %v273_v31  ;;  %v5815_v33 = vld [vmem:[%s7669_s6 + $0x10] sm:$0xff] }
 0x148   :  { %v6125_v35 = vpop.eup %6124 }
 0x149   :  { %v436_v37 = vpack.c.bf16 %v6125_v35, %v6125_v35  ;;  %v5814_v35 = vld [vmem:[%s7669_s6 + $0x8] sm:$0xff] }
 0x14b   :  { %v271_v24 = vpop.f32.mrf.mxu2  ;;  %463 = vmatmul.bf16.vlgmr.msra.gmra.mxu3 %v436_v37 }
 0x14c   :  { %v6127_v39 = vpop.eup %6126  ;;  %708 = vmatpush.bf16.msra.mxu3 %v5772_v5  ;;  %v5813_v24 = vld [vmem:[%s7669_s6] sm:$0xff] }
 0x14d   :  { %v275_v40 = vpack.c.bf16 %v6127_v39, %v6127_v39  ;;  %v575_v43 = vpop.f32.mrf.mxu1  ;;  %v5852_v39 = vld [vmem:[%s7669_s6 + $0xb8] sm:$0xff] }
 0x14f   :  { %447 = vmatmul.bf16.vlgmr.msrb.gmra.mxu2 %v275_v40  ;;  %476 = vmatmul.bf16.vlgmr.msra.gmra.mxu0 %v275_v40  ;;  %v5797_v40 = vld [vmem:[%s7666_s3] sm:$0xff] }
 0x150   :  { %695 = vmatpush.bf16.msrb.mxu2 %v5780_v4  ;;  %709 = vmatpush.bf16.msra.mxu3 %v5771_v7  ;;  %v5820_v7 = vld [vmem:[%s7669_s6 + $0x38] sm:$0xff] }
 0x151   :  { %806 = vmatpush.bf16.msra.mxu0 %v5796_v25  ;;  %v5806_v25 = vld [vmem:[%s7668_s5 + $0x8] sm:$0xff] }
 0x154   :  { %696 = vmatpush.bf16.msrb.mxu2 %v5779_v6  ;;  %710 = vmatpush.bf16.msra.mxu3 %v5770_v10  ;;  %v5811_v10 = vld [vmem:[%s7668_s5 + $0x30] sm:$0xff] }
 0x155   :  { %807 = vmatpush.bf16.msra.mxu0 %v5795_v26  ;;  %v577_v48 = vpop.f32.mrf.mxu1  ;;  %v5828_v26 = vld [vmem:[%s7668_s5 + $0x78] sm:$0xff] }
 0x156   :  { %v5842_v48 = vld [vmem:[%s7668_s5 + $0xa8] sm:$0xff] }
 0x158   :  { %697 = vmatpush.bf16.msrb.mxu2 %v5778_v9  ;;  %711 = vmatpush.bf16.msra.mxu3 %v5769_v12  ;;  %v5800_v12 = vld [vmem:[%s7666_s3 + $0x18] sm:$0xff] }
 0x159   :  { %808 = vmatpush.bf16.msra.mxu0 %v5794_v32  ;;  %v5805_v32 = vld [vmem:[%s7668_s5] sm:$0xff] }
 0x15c   :  { %698 = vmatpush.bf16.msrb.mxu2 %v5777_v11  ;;  %712 = vmatpush.bf16.msra.mxu3 %v5768_v14  ;;  %v5819_v11 = vld [vmem:[%s7669_s6 + $0x30] sm:$0xff]  ;;  %v5810_v14 = vld [vmem:[%s7668_s5 + $0x28] sm:$0xff] }
 0x15d   :  { %809 = vmatpush.bf16.msra.mxu0 %v5793_v36  ;;  %v5827_v36 = vld [vmem:[%s7668_s5 + $0x70] sm:$0xff] }
 0x15f   :  { %635 = vmatmul.bf16.vlgmr.msra.gmra.mxu2 %v436_v37  ;;  %v5807_v37 = vld [vmem:[%s7668_s5 + $0x10] sm:$0xff] }
 0x160   :  { %699 = vmatpush.bf16.msrb.mxu2 %v5776_v13  ;;  %713 = vmatpush.bf16.msra.mxu3 %v5767_v16  ;;  %v6663_v13 = vld [vmem:[%s7670_s7 + $0x1] ss:$0 sm:$0xff] }
 0x161   :  { %810 = vmatpush.bf16.msra.mxu0 %v5792_v41  ;;  %v5850_v41 = vld [vmem:[%s7669_s6 + $0xa8] sm:$0xff] }
 0x164   :  { %700 = vmatpush.bf16.msrb.mxu2 %v5775_v15  ;;  %714 = vmatpush.bf16.msra.mxu3 %v5766_v18  ;;  %v5799_v18 = vld [vmem:[%s7666_s3 + $0x10] sm:$0xff] }
 0x165   :  { %811 = vmatpush.bf16.msra.mxu0 %v5791_v44  ;;  %v5843_v44 = vld [vmem:[%s7668_s5 + $0xb0] sm:$0xff] }
 0x168   :  { %701 = vmatpush.bf16.msrb.mxu2 %v5774_v17  ;;  %715 = vmatpush.bf16.msra.mxu3 %v5765_v20  ;;  %v5818_v17 = vld [vmem:[%s7669_s6 + $0x28] sm:$0xff]  ;;  %v5809_v20 = vld [vmem:[%s7668_s5 + $0x20] sm:$0xff] }
 0x169   :  { %812 = vmatpush.bf16.msra.mxu0 %v5790_v46  ;;  %v5834_v46 = vld [vmem:[%s7669_s6 + $0x68] sm:$0xff] }
 0x16c   :  { %702 = vmatpush.bf16.msrb.mxu2 %v5773_v19 }
 0x16d   :  { %813 = vmatpush.bf16.msra.mxu0 %v5789_v49  ;;  %v5848_v49 = vld [vmem:[%s7669_s6 + $0x98] sm:$0xff] }
 0x170   :  { %955 = vmatpush.bf16.msra.mxu2 %v5804_v56  ;;  %v5823_v56 = vld [vmem:[%s7668_s5 + $0x50] sm:$0xff] }
 0x174   :  { %956 = vmatpush.bf16.msra.mxu2 %v5803_v60  ;;  %v5822_v60 = vld [vmem:[%s7668_s5 + $0x48] sm:$0xff] }
 0x178   :  { %957 = vmatpush.bf16.msra.mxu2 %v5802_v0  ;;  %v5821_v0 = vld [vmem:[%s7668_s5 + $0x40] sm:$0xff] }
 0x17c   :  { %958 = vmatpush.bf16.msra.mxu2 %v5801_v8 }
 0x180   :  { %959 = vmatpush.bf16.msra.mxu2 %v5800_v12  ;;  %v5860_v12 = vld [vmem:[%s7666_s3 + $0x38] sm:$0xff] }
 0x184   :  { %960 = vmatpush.bf16.msra.mxu2 %v5799_v18  ;;  %v5858_v18 = vld [vmem:[%s7666_s3 + $0x28] sm:$0xff] }
 0x1cc   :  { %v477_v52 = vpop.f32.mrf.mxu0 }
 0x1ce   :  { %v464_v53 = vpop.f32.mrf.mxu3 }
 0x1cf   :  { %v478_v55 = vadd.f32 %v477_v52, %v464_v53  ;;  %v5841_v52 = vld [vmem:[%s7668_s5 + $0xa0] sm:$0xff]  ;;  %v5847_v53 = vld [vmem:[%s7669_s6 + $0x90] sm:$0xff] }
 0x1d1   :  { %v481_v57 = vadd.f32 %v6568_v21, %v478_v55  ;;  %v5832_v55 = vld [vmem:[%s7669_s6 + $0x58] sm:$0xff] }
 0x1d2   :  { %v448_v59 = vpop.f32.mrf.mxu2 }
 0x1d3   :  { %6128 = vtanh.f32 %v481_v57  ;;  %v452_v61 = vadd.f32 %v448_v59, %v438_v58  ;;  %v5840_v57 = vld [vmem:[%s7668_s5 + $0x98] sm:$0xff]  ;;  %v5846_v58 = vld [vmem:[%s7669_s6 + $0x88] sm:$0xff]  ;;  %v5831_v59 = vld [vmem:[%s7669_s6 + $0x50] sm:$0xff] }
 0x1d4   :  { %v479_v62 = vpop.f32.mrf.mxu0 }
 0x1d5   :  { %6130 = vtanh.f32 %v452_v61  ;;  %v5839_v61 = vld [vmem:[%s7668_s5 + $0x90] sm:$0xff]  ;;  %v5845_v62 = vld [vmem:[%s7669_s6 + $0x80] sm:$0xff] }
 0x1d6   :  { %v466_v63 = vpop.f32.mrf.mxu3 }
 0x1d7   :  { %v5830_v63 = vld [vmem:[%s7669_s6 + $0x48] sm:$0xff] }
 0x1d9   :  { %v6129_v1 = vpop.eup %6128 }
 0x1da   :  { %v483_v4 = vpack.c.bf16 %v6129_v1, %v6129_v1  ;;  %v450_v5 = vpop.f32.mrf.mxu2  ;;  %v5838_v1 = vld [vmem:[%s7668_s5 + $0x88] sm:$0xff] }
 0x1db   :  { %v6131_v6 = vpop.eup %6130 }
 0x1dc   :  { %v454_v9 = vpack.c.bf16 %v6131_v6, %v6131_v6  ;;  %674 = vmatmul.bf16.vlgmr.msrb.gmra.mxu0 %v483_v4  ;;  %v5829_v6 = vld [vmem:[%s7669_s6 + $0x40] sm:$0xff] }
 0x1dd   :  { %1112 = vmatpush.bf16.msrb.mxu0 %v5812_v2 }
 0x1de   :  { %658 = vmatmul.bf16.vlgmr.msrb.gmra.mxu3 %v454_v9  ;;  %687 = vmatmul.bf16.vlgmr.msrb.gmra.mxu1 %v454_v9  ;;  %v649_v9 = vunpack.c.h.bf16 %v6629_v54 }
 0x1df   :  { %1051 = vmatpush.bf16.msrb.mxu3 %v5820_v7  ;;  %1212 = vmatpush.bf16.msrb.mxu1 %v5836_v34  ;;  %v5837_v7 = vld [vmem:[%s7668_s5 + $0x80] sm:$0xff]  ;;  %v5855_v34 = vld [vmem:[%s7666_s3 + $0x10] sm:$0xff] }
 0x1e1   :  { %1113 = vmatpush.bf16.msrb.mxu0 %v5811_v10 }
 0x1e2   :  { %v636_v15 = vpop.f32.mrf.mxu2 }
 0x1e3   :  { %v637_v16 = vadd.f32 %v636_v15, %v575_v43  ;;  %1052 = vmatpush.bf16.msrb.mxu3 %v5819_v11  ;;  %v5826_v43 = vld [vmem:[%s7668_s5 + $0x68] sm:$0xff]  ;;  %1213 = vmatpush.bf16.msrb.mxu1 %v5835_v42  ;;  %v5873_v42 = vld [vmem:[%s7669_s6 + $0x20] sm:$0xff] }
 0x1e5   :  { %v645_v19 = vadd.f32 %v6663_v13, %v637_v16  ;;  %1114 = vmatpush.bf16.msrb.mxu0 %v5810_v14  ;;  %v5859_v16 = vld [vmem:[%s7666_s3 + $0x30] sm:$0xff] }
 0x1e7   :  { %6132 = vtanh.f32 %v645_v19  ;;  %1053 = vmatpush.bf16.msrb.mxu3 %v5818_v17  ;;  %1214 = vmatpush.bf16.msrb.mxu1 %v5834_v46  ;;  %v5868_v17 = vld [vmem:[%s7668_s5 + $0x38] sm:$0xff] }
 0x1e9   :  { %1115 = vmatpush.bf16.msrb.mxu0 %v5809_v20 }
 0x1ea   :  { %v638_v27 = vpop.f32.mrf.mxu2 }
 0x1eb   :  { %1054 = vmatpush.bf16.msrb.mxu3 %v5817_v22  ;;  %1215 = vmatpush.bf16.msrb.mxu1 %v5833_v50  ;;  %v5867_v27 = vld [vmem:[%s7668_s5 + $0x30] sm:$0xff] }
 0x1ec   :  { %814 = vmatmul.bf16.vlgmr.msra.gmra.mxu0 %v6234_v3  ;;  %v5798_v3 = vld [vmem:[%s7666_s3 + $0x8] sm:$0xff] }
 0x1ed   :  { %v6133_v29 = vpop.eup %6132  ;;  %1116 = vmatpush.bf16.msrb.mxu0 %v5808_v23  ;;  %961 = vmatpush.bf16.msra.mxu2 %v5798_v3  ;;  %v5876_v23 = vld [vmem:[%s7669_s6 + $0x38] sm:$0xff]  ;;  %v5875_v3 = vld [vmem:[%s7669_s6 + $0x30] sm:$0xff] }
 0x1ee   :  { %v647_v31 = vpack.c.bf16 %v6133_v29, %v6133_v29  ;;  %716 = vmatmul.bf16.vlgmr.msra.gmra.mxu3 %v483_v4  ;;  %v5857_v29 = vld [vmem:[%s7666_s3 + $0x20] sm:$0xff] }
 0x1ef   :  { %1055 = vmatpush.bf16.msrb.mxu3 %v5816_v28  ;;  %1216 = vmatpush.bf16.msrb.mxu1 %v5832_v55  ;;  %v5862_v55 = vld [vmem:[%s7668_s5 + $0x8] sm:$0xff] }
 0x1f0   :  { %703 = vmatmul.bf16.vlgmr.msrb.gmra.mxu2 %v647_v31  ;;  %875 = vmatmul.bf16.vlgmr.msra.gmra.mxu1 %v647_v31  ;;  %v6105_v31 = vld [vmem:[%s7670_s7 + $0x2] ss:$0 sm:$0xff] }
 0x1f1   :  { %1117 = vmatpush.bf16.msrb.mxu0 %v5807_v37  ;;  %962 = vmatpush.bf16.msra.mxu2 %v5797_v40  ;;  %v5866_v37 = vld [vmem:[%s7668_s5 + $0x28] sm:$0xff] }
 0x1f3   :  { %1056 = vmatpush.bf16.msrb.mxu3 %v5815_v33  ;;  %1217 = vmatpush.bf16.msrb.mxu1 %v5831_v59  ;;  %v5908_v59 = vld [vmem:[%s7669_s6 + $0xb8] sm:$0xff] }
 0x1f5   :  { %1118 = vmatpush.bf16.msrb.mxu0 %v5806_v25  ;;  %1273 = vmatpush.bf16.msrb.mxu2 %v5828_v26  ;;  %v5874_v26 = vld [vmem:[%s7669_s6 + $0x28] sm:$0xff] }
 0x1f7   :  { %1057 = vmatpush.bf16.msrb.mxu3 %v5814_v35  ;;  %1218 = vmatpush.bf16.msrb.mxu1 %v5830_v63  ;;  %v5883_v63 = vld [vmem:[%s7668_s5 + $0x70] sm:$0xff] }
 0x1f9   :  { %1119 = vmatpush.bf16.msrb.mxu0 %v5805_v32  ;;  %1274 = vmatpush.bf16.msrb.mxu2 %v5827_v36 }
 0x1fb   :  { %1058 = vmatpush.bf16.msrb.mxu3 %v5813_v24  ;;  %1219 = vmatpush.bf16.msrb.mxu1 %v5829_v6  ;;  %v5856_v24 = vld [vmem:[%s7666_s3 + $0x18] sm:$0xff]  ;;  %v5890_v6 = vld [vmem:[%s7669_s6 + $0x68] sm:$0xff] }
 0x1fd   :  { %1434 = vmatpush.bf16.msra.mxu0 %v5844_v38  ;;  %1275 = vmatpush.bf16.msrb.mxu2 %v5826_v43  ;;  %v5864_v43 = vld [vmem:[%s7668_s5 + $0x18] sm:$0xff] }
 0x1ff   :  { %1373 = vmatpush.bf16.msra.mxu3 %v5852_v39  ;;  %1521 = vmatpush.bf16.msra.mxu1 %v5860_v12  ;;  %v5880_v12 = vld [vmem:[%s7668_s5 + $0x58] sm:$0xff] }
 0x201   :  { %1435 = vmatpush.bf16.msra.mxu0 %v5843_v44  ;;  %1276 = vmatpush.bf16.msrb.mxu2 %v5825_v47  ;;  %v5854_v44 = vld [vmem:[%s7666_s3 + $0x8] sm:$0xff] }
 0x203   :  { %1374 = vmatpush.bf16.msra.mxu3 %v5851_v30  ;;  %1522 = vmatpush.bf16.msra.mxu1 %v5859_v16  ;;  %v5865_v30 = vld [vmem:[%s7668_s5 + $0x20] sm:$0xff]  ;;  %v5896_v16 = vld [vmem:[%s7668_s5 + $0x98] sm:$0xff] }
 0x205   :  { %1436 = vmatpush.bf16.msra.mxu0 %v5842_v48  ;;  %1277 = vmatpush.bf16.msrb.mxu2 %v5824_v51  ;;  %v5863_v48 = vld [vmem:[%s7668_s5 + $0x10] sm:$0xff] }
 0x206   :  { %v5871_v51 = vld [vmem:[%s7669_s6 + $0x10] sm:$0xff] }
 0x207   :  { %1375 = vmatpush.bf16.msra.mxu3 %v5850_v41  ;;  %1523 = vmatpush.bf16.msra.mxu1 %v5858_v18  ;;  %v5895_v18 = vld [vmem:[%s7668_s5 + $0x90] sm:$0xff] }
 0x209   :  { %1437 = vmatpush.bf16.msra.mxu0 %v5841_v52  ;;  %1278 = vmatpush.bf16.msrb.mxu2 %v5823_v56  ;;  %v5853_v56 = vld [vmem:[%s7666_s3] sm:$0xff] }
 0x20b   :  { %1376 = vmatpush.bf16.msra.mxu3 %v5849_v45  ;;  %1524 = vmatpush.bf16.msra.mxu1 %v5857_v29 }
 0x20d   :  { %1438 = vmatpush.bf16.msra.mxu0 %v5840_v57  ;;  %1279 = vmatpush.bf16.msrb.mxu2 %v5822_v60  ;;  %v5869_v57 = vld [vmem:[%s7669_s6] sm:$0xff] }
 0x20e   :  { %v5861_v60 = vld [vmem:[%s7668_s5] sm:$0xff] }
 0x20f   :  { %1377 = vmatpush.bf16.msra.mxu3 %v5848_v49  ;;  %1525 = vmatpush.bf16.msra.mxu1 %v5856_v24 }
 0x211   :  { %1439 = vmatpush.bf16.msra.mxu0 %v5839_v61  ;;  %1280 = vmatpush.bf16.msrb.mxu2 %v5821_v0  ;;  %v5892_v61 = vld [vmem:[%s7669_s6 + $0x78] sm:$0xff]  ;;  %v5907_v0 = vld [vmem:[%s7669_s6 + $0xb0] sm:$0xff] }
 0x213   :  { %1378 = vmatpush.bf16.msra.mxu3 %v5847_v53  ;;  %1526 = vmatpush.bf16.msra.mxu1 %v5855_v34  ;;  %v5870_v53 = vld [vmem:[%s7669_s6 + $0x8] sm:$0xff] }
 0x215   :  { %1440 = vmatpush.bf16.msra.mxu0 %v5838_v1  ;;  %v5891_v1 = vld [vmem:[%s7669_s6 + $0x70] sm:$0xff] }
 0x217   :  { %1379 = vmatpush.bf16.msra.mxu3 %v5846_v58  ;;  %1527 = vmatpush.bf16.msra.mxu1 %v5854_v44  ;;  %v5884_v58 = vld [vmem:[%s7668_s5 + $0x78] sm:$0xff] }
 0x219   :  { %1441 = vmatpush.bf16.msra.mxu0 %v5837_v7  ;;  %v5898_v7 = vld [vmem:[%s7668_s5 + $0xa8] sm:$0xff] }
 0x21b   :  { %1380 = vmatpush.bf16.msra.mxu3 %v5845_v62  ;;  %1528 = vmatpush.bf16.msra.mxu1 %v5853_v56  ;;  %v5900_v62 = vld [vmem:[%s7668_s5 + $0xb8] sm:$0xff]  ;;  %v6108_v56 = vld [vmem:[%s7670_s7 + $0x1] ss:$0 sm:$0xff] }
 0x259   :  { %v675_v2 = vpop.f32.mrf.mxu0 }
 0x25b   :  { %v688_v4 = vpop.f32.mrf.mxu1 }
 0x25c   :  { %v689_v5 = vadd.f32 %v688_v4, %v675_v2  ;;  %v5899_v2 = vld [vmem:[%s7668_s5 + $0xb0] sm:$0xff]  ;;  %v5882_v4 = vld [vmem:[%s7668_s5 + $0x68] sm:$0xff] }
 0x25e   :  { %v692_v8 = vadd.f32 %v6568_v21, %v689_v5  ;;  %v5906_v5 = vld [vmem:[%s7669_s6 + $0xa8] sm:$0xff] }
 0x260   :  { %6134 = vtanh.f32 %v692_v8  ;;  %v5881_v8 = vld [vmem:[%s7668_s5 + $0x60] sm:$0xff] }
 0x261   :  { %v659_v10 = vpop.f32.mrf.mxu3  ;;  %v677_v11 = vpop.f32.mrf.mxu0 }
 0x262   :  { %v663_v14 = vadd.f32 %v659_v10, %v649_v9  ;;  %v5905_v9 = vld [vmem:[%s7669_s6 + $0xa0] sm:$0xff] }
 0x263   :  { %v690_v15 = vpop.f32.mrf.mxu1  ;;  %v5889_v10 = vld [vmem:[%s7669_s6 + $0x60] sm:$0xff] }
 0x264   :  { %6136 = vtanh.f32 %v663_v14  ;;  %v5897_v11 = vld [vmem:[%s7668_s5 + $0xa0] sm:$0xff]  ;;  %v5904_v14 = vld [vmem:[%s7669_s6 + $0x98] sm:$0xff] }
 0x265   :  { %v5888_v15 = vld [vmem:[%s7669_s6 + $0x58] sm:$0xff] }
 0x266   :  { %v6135_v21 = vpop.eup %6134 }
 0x267   :  { %v694_v54 = vpack.c.bf16 %v6135_v21, %v6135_v21  ;;  %v5879_v21 = vld [vmem:[%s7668_s5 + $0x50] sm:$0xff] }
 0x269   :  { %v661_v19 = vpop.f32.mrf.mxu3  ;;  %v815_v20 = vpop.f32.mrf.mxu0  ;;  %1059 = vmatmul.bf16.vlgmr.msrb.gmra.mxu3 %v694_v54 }
 0x26a   :  { %v6137_v22 = vpop.eup %6136  ;;  %1678 = vmatpush.bf16.msrb.mxu3 %v5868_v17  ;;  %v5903_v17 = vld [vmem:[%s7669_s6 + $0x90] sm:$0xff]  ;;  %v5878_v19 = vld [vmem:[%s7668_s5 + $0x48] sm:$0xff] }
 0x26b   :  { %v665_v28 = vpack.c.bf16 %v6137_v22, %v6137_v22  ;;  %v5886_v22 = vld [vmem:[%s7669_s6 + $0x48] sm:$0xff] }
 0x26d   :  { %v876_v33 = vpop.f32.mrf.mxu1  ;;  %963 = vmatmul.bf16.vlgmr.msra.gmra.mxu2 %v665_v28  ;;  %1120 = vmatmul.bf16.vlgmr.msrb.gmra.mxu0 %v665_v28  ;;  %v5901_v28 = vld [vmem:[%s7669_s6 + $0x80] sm:$0xff] }
 0x26e   :  { %v877_v35 = vadd.f32 %v876_v33, %v815_v20  ;;  %1617 = vmatpush.bf16.msra.mxu2 %v5876_v23  ;;  %1679 = vmatpush.bf16.msrb.mxu3 %v5867_v27  ;;  %v5902_v20 = vld [vmem:[%s7669_s6 + $0x88] sm:$0xff]  ;;  %v5877_v27 = vld [vmem:[%s7668_s5 + $0x40] sm:$0xff] }
 0x26f   :  { %1778 = vmatpush.bf16.msrb.mxu0 %v5892_v61  ;;  %v5894_v23 = vld [vmem:[%s7668_s5 + $0x88] sm:$0xff]  ;;  %v5893_v33 = vld [vmem:[%s7668_s5 + $0x80] sm:$0xff] }
 0x270   :  { %v885_v39 = vadd.f32 %v6105_v31, %v877_v35  ;;  %v5885_v31 = vld [vmem:[%s7669_s6 + $0x40] sm:$0xff]  ;;  %v5930_v61 = vld [vmem:[%s7669_s6 + $0x28] sm:$0xff] }
 0x271   :  { %v717_v40 = vpop.f32.mrf.mxu3  ;;  %v817_v25 = vpop.f32.mrf.mxu0  ;;  %v6106_v35 = vld [vmem:[%s7670_s7] ss:$0 sm:$0xff] }
 0x272   :  { %6138 = vtanh.f32 %v885_v39  ;;  %1618 = vmatpush.bf16.msra.mxu2 %v5875_v3  ;;  %1680 = vmatpush.bf16.msrb.mxu3 %v5866_v37  ;;  %v6985_v37 = vld [vmem:[#allocation2 + $0x10] sm:$0xff]   ;;  %v5916_v39 = vld [vmem:[%s7666_s3 + $0x38] sm:$0xff] }
 0x273   :  { %v704_v32 = vpop.f32.mrf.mxu2  ;;  %1779 = vmatpush.bf16.msrb.mxu0 %v5891_v1  ;;  %v890_v25 = vunpack.c.l.bf16 %v6985_v37  ;;  %v5921_v1 = vld [vmem:[%s7668_s5 + $0x20] sm:$0xff] }
 0x274   :  { %v718_v36 = vadd.f32 %v717_v40, %v704_v32 }
 0x275   :  { %v878_v38 = vpop.f32.mrf.mxu1 }
 0x276   :  { %v721_v41 = vadd.f32 %v6663_v13, %v718_v36  ;;  %1619 = vmatpush.bf16.msra.mxu2 %v5874_v26  ;;  %1681 = vmatpush.bf16.msrb.mxu3 %v5865_v30  ;;  %v5872_v13 = vld [vmem:[%s7669_s6 + $0x18] sm:$0xff]  ;;  %v5915_v30 = vld [vmem:[%s7666_s3 + $0x30] sm:$0xff]  ;;  %v5914_v38 = vld [vmem:[%s7666_s3 + $0x28] sm:$0xff] }
 0x277   :  { %1780 = vmatpush.bf16.msrb.mxu0 %v5890_v6 }
 0x278   :  { %v6139_v45 = vpop.eup %6138  ;;  %6140 = vtanh.f32 %v721_v41 }
 0x279   :  { %v887_v46 = vpack.c.bf16 %v6139_v45, %v6139_v45  ;;  %v719_v47 = vpop.f32.mrf.mxu3 }
 0x27a   :  { %1620 = vmatpush.bf16.msra.mxu2 %v5873_v42  ;;  %1682 = vmatpush.bf16.msrb.mxu3 %v5864_v43  ;;  %v5924_v42 = vld [vmem:[%s7668_s5 + $0x38] sm:$0xff]  ;;  %v5913_v47 = vld [vmem:[%s7666_s3 + $0x20] sm:$0xff] }
 0x27b   :  { %888 = vst [vmem:[#allocation2] sm:$0xf] %v887_v46  ;;  %v706_v49 = vpop.f32.mrf.mxu2  ;;  %1381 = vmatmul.bf16.vlgmr.msra.gmra.mxu3 %v887_v46  ;;  %1781 = vmatpush.bf16.msrb.mxu0 %v5889_v10  ;;  %v5932_v46 = vld [vmem:[%s7669_s6 + $0x38] sm:$0xff] }
 0x27c   :  { %v5931_v49 = vld [vmem:[%s7669_s6 + $0x30] sm:$0xff]  ;;  %v5928_v10 = vld [vmem:[%s7669_s6 + $0x18] sm:$0xff] }
 0x27d   :  { %1281 = vmatmul.bf16.vlgmr.msrb.gmra.mxu2 %v694_v54  ;;  %v5887_v54 = vld [vmem:[%s7669_s6 + $0x50] sm:$0xff] }
 0x27e   :  { %v6141_v50 = vpop.eup %6140  ;;  %1621 = vmatpush.bf16.msra.mxu2 %v5872_v13  ;;  %1683 = vmatpush.bf16.msrb.mxu3 %v5863_v48  ;;  %v5923_v48 = vld [vmem:[%s7668_s5 + $0x30] sm:$0xff] }
 0x27f   :  { %v723_v52 = vpack.c.bf16 %v6141_v50, %v6141_v50  ;;  %1782 = vmatpush.bf16.msrb.mxu0 %v5888_v15  ;;  %v5912_v50 = vld [vmem:[%s7666_s3 + $0x18] sm:$0xff]  ;;  %v5919_v15 = vld [vmem:[%s7668_s5 + $0x10] sm:$0xff] }
 0x281   :  { %1220 = vmatmul.bf16.vlgmr.msrb.gmra.mxu1 %v723_v52  ;;  %1442 = vmatmul.bf16.vlgmr.msra.gmra.mxu0 %v723_v52 }
 0x282   :  { %1622 = vmatpush.bf16.msra.mxu2 %v5871_v51  ;;  %1684 = vmatpush.bf16.msrb.mxu3 %v5862_v55 }
 0x283   :  { %1839 = vmatpush.bf16.msrb.mxu1 %v5884_v58  ;;  %1783 = vmatpush.bf16.msrb.mxu0 %v5887_v54  ;;  %v5927_v54 = vld [vmem:[%s7669_s6 + $0x10] sm:$0xff] }
 0x286   :  { %1623 = vmatpush.bf16.msra.mxu2 %v5870_v53  ;;  %1685 = vmatpush.bf16.msrb.mxu3 %v5861_v60  ;;  %v6107_v53 = vld [vmem:[%s7670_s7 + $0x2] ss:$0 sm:$0xff] }
 0x287   :  { %1840 = vmatpush.bf16.msrb.mxu1 %v5883_v63  ;;  %1784 = vmatpush.bf16.msrb.mxu0 %v5886_v22  ;;  %v5939_v22 = vld [vmem:[%s7668_s5 + $0x70] sm:$0xff] }
 0x28a   :  { %1624 = vmatpush.bf16.msra.mxu2 %v5869_v57  ;;  %2000 = vmatpush.bf16.msra.mxu3 %v5900_v62  ;;  %v5922_v57 = vld [vmem:[%s7668_s5 + $0x28] sm:$0xff]  ;;  %v5911_v62 = vld [vmem:[%s7666_s3 + $0x10] sm:$0xff] }
 0x28b   :  { %1841 = vmatpush.bf16.msrb.mxu1 %v5882_v4  ;;  %1785 = vmatpush.bf16.msrb.mxu0 %v5885_v31  ;;  %v5910_v4 = vld [vmem:[%s7666_s3 + $0x8] sm:$0xff]  ;;  %v5955_v31 = vld [vmem:[%s7668_s5 + $0xb0] sm:$0xff] }
 0x28e   :  { %1939 = vmatpush.bf16.msrb.mxu2 %v5908_v59  ;;  %2001 = vmatpush.bf16.msra.mxu3 %v5899_v2  ;;  %v5929_v2 = vld [vmem:[%s7669_s6 + $0x20] sm:$0xff] }
 0x28f   :  { %1842 = vmatpush.bf16.msrb.mxu1 %v5881_v8  ;;  %2087 = vmatpush.bf16.msra.mxu0 %v5916_v39  ;;  %v5920_v8 = vld [vmem:[%s7668_s5 + $0x18] sm:$0xff]  ;;  %v5954_v39 = vld [vmem:[%s7668_s5 + $0xa8] sm:$0xff] }
 0x292   :  { %1940 = vmatpush.bf16.msrb.mxu2 %v5907_v0  ;;  %2002 = vmatpush.bf16.msra.mxu3 %v5898_v7 }
 0x293   :  { %1843 = vmatpush.bf16.msrb.mxu1 %v5880_v12  ;;  %2088 = vmatpush.bf16.msra.mxu0 %v5915_v30  ;;  %v5953_v30 = vld [vmem:[%s7668_s5 + $0xa0] sm:$0xff] }
 0x296   :  { %1941 = vmatpush.bf16.msrb.mxu2 %v5906_v5  ;;  %2003 = vmatpush.bf16.msra.mxu3 %v5897_v11 }
 0x297   :  { %1844 = vmatpush.bf16.msrb.mxu1 %v5879_v21  ;;  %2089 = vmatpush.bf16.msra.mxu0 %v5914_v38  ;;  %v5952_v38 = vld [vmem:[%s7668_s5 + $0x98] sm:$0xff] }
 0x29a   :  { %1942 = vmatpush.bf16.msrb.mxu2 %v5905_v9  ;;  %2004 = vmatpush.bf16.msra.mxu3 %v5896_v16  ;;  %v5909_v16 = vld [vmem:[%s7666_s3] sm:$0xff]  ;;  %s6237_s3 = smov [#allocation3]  }
 0x29b   :  { %1845 = vmatpush.bf16.msrb.mxu1 %v5878_v19  ;;  %2090 = vmatpush.bf16.msra.mxu0 %v5913_v47  ;;  %v5917_v19 = vld [vmem:[%s7668_s5] sm:$0xff]  ;;  %s3915_s23 = sshll.u32 %s6237_s3, 4  ;;  %s3916_s23 = int_to_ptr.vmem [resolvable:$true] %s3915_s23 }
 0x29c   :  { %v5933_v47 = vld [vmem:[%s7668_s5 + $0x40] sm:$0xff] }
 0x29e   :  { %1943 = vmatpush.bf16.msrb.mxu2 %v5904_v14  ;;  %2005 = vmatpush.bf16.msra.mxu3 %v5895_v18  ;;  %v5918_v18 = vld [vmem:[%s7668_s5 + $0x8] sm:$0xff] }
 0x29f   :  { %1846 = vmatpush.bf16.msrb.mxu1 %v5877_v27  ;;  %2091 = vmatpush.bf16.msra.mxu0 %v5912_v50  ;;  %v5926_v27 = vld [vmem:[%s7669_s6 + $0x8] sm:$0xff]  ;;  %v5949_v50 = vld [vmem:[%s7668_s5 + $0x80] sm:$0xff] }
 0x2a2   :  { %1944 = vmatpush.bf16.msrb.mxu2 %v5903_v17  ;;  %2006 = vmatpush.bf16.msra.mxu3 %v5894_v23  ;;  %v5940_v17 = vld [vmem:[%s7668_s5 + $0x78] sm:$0xff] }
 0x2a3   :  { %2092 = vmatpush.bf16.msra.mxu0 %v5911_v62  ;;  %v5956_v23 = vld [vmem:[%s7668_s5 + $0xb8] sm:$0xff] }
 0x2a6   :  { %1945 = vmatpush.bf16.msrb.mxu2 %v5902_v20  ;;  %2007 = vmatpush.bf16.msra.mxu3 %v5893_v33  ;;  %v5948_v20 = vld [vmem:[%s7669_s6 + $0x78] sm:$0xff]  ;;  %v5925_v33 = vld [vmem:[%s7669_s6] sm:$0xff] }
 0x2a7   :  { %2093 = vmatpush.bf16.msra.mxu0 %v5910_v4  ;;  %v5988_v4 = vld [vmem:[%s7668_s5 + $0x78] sm:$0xff] }
 0x2aa   :  { %1946 = vmatpush.bf16.msrb.mxu2 %v5901_v28  ;;  %v5947_v28 = vld [vmem:[%s7669_s6 + $0x70] sm:$0xff] }
 0x2ab   :  { %2094 = vmatpush.bf16.msra.mxu0 %v5909_v16 }
 0x2ea   :  { %v1121_v29 = vpop.f32.mrf.mxu0 }
 0x2ec   :  { %v1060_v3 = vpop.f32.mrf.mxu3 }
 0x2ed   :  { %v1122_v24 = vadd.f32 %v1121_v29, %v1060_v3  ;;  %v5938_v29 = vld [vmem:[%s7668_s5 + $0x68] sm:$0xff] }
 0x2ee   :  { %v5946_v3 = vld [vmem:[%s7669_s6 + $0x68] sm:$0xff] }
 0x2ef   :  { %v1129_v40 = vadd.f32 %v6106_v35, %v1122_v24  ;;  %v5964_v35 = vld [vmem:[%s7669_s6 + $0xb8] sm:$0xff]  ;;  %v5937_v24 = vld [vmem:[%s7668_s5 + $0x60] sm:$0xff] }
 0x2f0   :  { %v964_v26 = vpop.f32.mrf.mxu2 }
 0x2f1   :  { %6142 = vtanh.f32 %v1129_v40  ;;  %v968_v32 = vadd.f32 %v964_v26, %v890_v25  ;;  %v5963_v40 = vld [vmem:[%s7669_s6 + $0xb0] sm:$0xff]  ;;  %v5945_v25 = vld [vmem:[%s7669_s6 + $0x60] sm:$0xff]  ;;  %v5936_v26 = vld [vmem:[%s7668_s5 + $0x58] sm:$0xff] }
 0x2f2   :  { %v1123_v34 = vpop.f32.mrf.mxu0 }
 0x2f3   :  { %6144 = vtanh.f32 %v968_v32  ;;  %v5962_v32 = vld [vmem:[%s7669_s6 + $0xa8] sm:$0xff]  ;;  %v5944_v34 = vld [vmem:[%s7669_s6 + $0x58] sm:$0xff] }
 0x2f4   :  { %v1062_v36 = vpop.f32.mrf.mxu3 }
 0x2f5   :  { %v5935_v36 = vld [vmem:[%s7668_s5 + $0x50] sm:$0xff] }
 0x2f7   :  { %v6143_v41 = vpop.eup %6142 }
 0x2f8   :  { %v1131_v43 = vpack.c.bf16 %v6143_v41, %v6143_v41  ;;  %v966_v44 = vpop.f32.mrf.mxu2  ;;  %v5961_v41 = vld [vmem:[%s7669_s6 + $0xa0] sm:$0xff] }
 0x2f9   :  { %v6145_v45 = vpop.eup %6144  ;;  %v5951_v44 = vld [vmem:[%s7668_s5 + $0x90] sm:$0xff] }
 0x2fa   :  { %v970_v13 = vpack.c.bf16 %v6145_v45, %v6145_v45  ;;  %1625 = vmatmul.bf16.vlgmr.msra.gmra.mxu2 %v1131_v43  ;;  %v5960_v45 = vld [vmem:[%s7669_s6 + $0x98] sm:$0xff] }
 0x2fb   :  { %2244 = vmatpush.bf16.msra.mxu2 %v5924_v42  ;;  %v5943_v42 = vld [vmem:[%s7669_s6 + $0x50] sm:$0xff] }
 0x2fc   :  { %1529 = vmatmul.bf16.vlgmr.msra.gmra.mxu1 %v970_v13  ;;  %1686 = vmatmul.bf16.vlgmr.msrb.gmra.mxu3 %v970_v13  ;;  %v5950_v13 = vld [vmem:[%s7668_s5 + $0x88] sm:$0xff] }
 0x2fd   :  { %2183 = vmatpush.bf16.msra.mxu1 %v5932_v46  ;;  %2344 = vmatpush.bf16.msrb.mxu3 %v5948_v20  ;;  %v5942_v46 = vld [vmem:[%s7669_s6 + $0x48] sm:$0xff]  ;;  %v5976_v20 = vld [vmem:[%s7669_s6 + $0x18] sm:$0xff] }
 0x2fe   :  { %v1221_v51 = vpop.f32.mrf.mxu1  ;;  %v1382_v52 = vpop.f32.mrf.mxu3 }
 0x2ff   :  { %v1443_v55 = vpop.f32.mrf.mxu0  ;;  %2245 = vmatpush.bf16.msra.mxu2 %v5923_v48  ;;  %v5959_v48 = vld [vmem:[%s7669_s6 + $0x90] sm:$0xff] }
 0x300   :  { %v1444_v58 = vadd.f32 %v1443_v55, %v1382_v52  ;;  %v1282_v59 = vpop.f32.mrf.mxu2  ;;  %v1456_v52 = vunpack.c.h.bf16 %v6985_v37  ;;  %v5980_v37 = vld [vmem:[%s7669_s6 + $0x38] sm:$0xff] }
 0x301   :  { %v1283_v60 = vadd.f32 %v1282_v59, %v1221_v51  ;;  %2184 = vmatpush.bf16.msra.mxu1 %v5931_v49  ;;  %2345 = vmatpush.bf16.msrb.mxu3 %v5947_v28  ;;  %v5941_v49 = vld [vmem:[%s7669_s6 + $0x40] sm:$0xff]  ;;  %v5958_v51 = vld [vmem:[%s7669_s6 + $0x88] sm:$0xff] }
 0x302   :  { %v1451_v63 = vadd.f32 %v6107_v53, %v1444_v58  ;;  %v6109_v58 = vld [vmem:[%s7670_s7] ss:$0 sm:$0xff] }
 0x303   :  { %v1290_v0 = vadd.f32 %v6108_v56, %v1283_v60  ;;  %2246 = vmatpush.bf16.msra.mxu2 %v5922_v57  ;;  %v5957_v56 = vld [vmem:[%s7669_s6 + $0x80] sm:$0xff] }
 0x304   :  { %6146 = vtanh.f32 %v1451_v63 }
 0x305   :  { %6148 = vtanh.f32 %v1290_v0  ;;  %2185 = vmatpush.bf16.msra.mxu1 %v5930_v61  ;;  %2346 = vmatpush.bf16.msrb.mxu3 %v5946_v3  ;;  %v5972_v0 = vld [vmem:[%s7668_s5 + $0x38] sm:$0xff] }
 0x306   :  { %v1223_v5 = vpop.f32.mrf.mxu1  ;;  %v1384_v6 = vpop.f32.mrf.mxu3 }
 0x307   :  { %v1445_v7 = vpop.f32.mrf.mxu0  ;;  %2247 = vmatpush.bf16.msra.mxu2 %v5921_v1  ;;  %v5979_v1 = vld [vmem:[%s7669_s6 + $0x30] sm:$0xff] }
 0x308   :  { %v1284_v9 = vpop.f32.mrf.mxu2  ;;  %v5971_v6 = vld [vmem:[%s7668_s5 + $0x30] sm:$0xff]  ;;  %v5978_v7 = vld [vmem:[%s7669_s6 + $0x28] sm:$0xff] }
 0x309   :  { %2186 = vmatpush.bf16.msra.mxu1 %v5929_v2  ;;  %2347 = vmatpush.bf16.msrb.mxu3 %v5945_v25  ;;  %v5987_v9 = vld [vmem:[%s7668_s5 + $0x70] sm:$0xff] }
 0x30a   :  { %v6147_v11 = vpop.eup %6146 }
 0x30b   :  { %v6149_v12 = vpop.eup %6148  ;;  %v1453_v14 = vpack.c.bf16 %v6147_v11, %v6147_v11  ;;  %2248 = vmatpush.bf16.msra.mxu2 %v5920_v8 }
 0x30c   :  { %v1292_v21 = vpack.c.bf16 %v6149_v12, %v6149_v12  ;;  %1847 = vmatmul.bf16.vlgmr.msrb.gmra.mxu1 %v1131_v43  ;;  %v5934_v43 = vld [vmem:[%s7668_s5 + $0x48] sm:$0xff]  ;;  %v6110_v12 = vld [vmem:[%s7670_s7 + $0x1] ss:$0 sm:$0xff] }
 0x30d   :  { %1454 = vst [vmem:[#allocation2 + $0x4] sm:$0xf] %v1453_v14  ;;  %1947 = vmatmul.bf16.vlgmr.msrb.gmra.mxu2 %v1453_v14  ;;  %2187 = vmatpush.bf16.msra.mxu1 %v5928_v10  ;;  %v5970_v14 = vld [vmem:[%s7668_s5 + $0x28] sm:$0xff] }
 0x30e   :  { %1786 = vmatmul.bf16.vlgmr.msrb.gmra.mxu0 %v1292_v21  ;;  %2008 = vmatmul.bf16.vlgmr.msra.gmra.mxu3 %v1292_v21 }
 0x30f   :  { %2249 = vmatpush.bf16.msra.mxu2 %v5919_v15  ;;  %2405 = vmatpush.bf16.msrb.mxu0 %v5940_v17  ;;  %v5977_v15 = vld [vmem:[%s7669_s6 + $0x20] sm:$0xff]  ;;  %v5986_v17 = vld [vmem:[%s7668_s5 + $0x68] sm:$0xff] }
 0x310   :  { %2348 = vmatpush.bf16.msrb.mxu3 %v5944_v34  ;;  %v5985_v34 = vld [vmem:[%s7668_s5 + $0x60] sm:$0xff] }
 0x311   :  { %2188 = vmatpush.bf16.msra.mxu1 %v5927_v54 }
 0x313   :  { %2250 = vmatpush.bf16.msra.mxu2 %v5918_v18  ;;  %2406 = vmatpush.bf16.msrb.mxu0 %v5939_v22 }
 0x314   :  { %2349 = vmatpush.bf16.msrb.mxu3 %v5943_v42  ;;  %v5973_v42 = vld [vmem:[%s7669_s6] sm:$0xff] }
 0x315   :  { %2189 = vmatpush.bf16.msra.mxu1 %v5926_v27 }
 0x317   :  { %2251 = vmatpush.bf16.msra.mxu2 %v5917_v19  ;;  %2407 = vmatpush.bf16.msrb.mxu0 %v5938_v29  ;;  %v5969_v19 = vld [vmem:[%s7668_s5 + $0x20] sm:$0xff] }
 0x318   :  { %2350 = vmatpush.bf16.msrb.mxu3 %v5942_v46  ;;  %v6004_v46 = vld [vmem:[%s7668_s5 + $0xb8] sm:$0xff] }
 0x319   :  { %2190 = vmatpush.bf16.msra.mxu1 %v5925_v33 }
 0x31b   :  { %2566 = vmatpush.bf16.msrb.mxu2 %v5956_v23  ;;  %2408 = vmatpush.bf16.msrb.mxu0 %v5937_v24  ;;  %v6111_v23 = vld [vmem:[%s7670_s7 + $0x2] ss:$0 sm:$0xff] }
 0x31c   :  { %2351 = vmatpush.bf16.msrb.mxu3 %v5941_v49  ;;  %v6003_v49 = vld [vmem:[%s7668_s5 + $0xb0] sm:$0xff] }
 0x31d   :  { %2505 = vmatpush.bf16.msrb.mxu1 %v5964_v35 }
 0x31f   :  { %2567 = vmatpush.bf16.msrb.mxu2 %v5955_v31  ;;  %2409 = vmatpush.bf16.msrb.mxu0 %v5936_v26  ;;  %v5968_v31 = vld [vmem:[%s7668_s5 + $0x18] sm:$0xff] }
 0x320   :  { %2667 = vmatpush.bf16.msra.mxu3 %v5980_v37  ;;  %v6008_v37 = vld [vmem:[%s7669_s6 + $0x98] sm:$0xff] }
 0x321   :  { %2506 = vmatpush.bf16.msrb.mxu1 %v5963_v40 }
 0x323   :  { %2568 = vmatpush.bf16.msrb.mxu2 %v5954_v39  ;;  %2410 = vmatpush.bf16.msrb.mxu0 %v5935_v36  ;;  %v5974_v36 = vld [vmem:[%s7669_s6 + $0x8] sm:$0xff] }
 0x324   :  { %2668 = vmatpush.bf16.msra.mxu3 %v5979_v1 }
 0x325   :  { %2507 = vmatpush.bf16.msrb.mxu1 %v5962_v32  ;;  %v5967_v32 = vld [vmem:[%s7668_s5 + $0x10] sm:$0xff] }
 0x327   :  { %2569 = vmatpush.bf16.msrb.mxu2 %v5953_v30  ;;  %2411 = vmatpush.bf16.msrb.mxu0 %v5934_v43  ;;  %v5975_v30 = vld [vmem:[%s7669_s6 + $0x10] sm:$0xff]  ;;  %v5965_v43 = vld [vmem:[%s7668_s5] sm:$0xff] }
 0x328   :  { %2669 = vmatpush.bf16.msra.mxu3 %v5978_v7 }
 0x329   :  { %2508 = vmatpush.bf16.msrb.mxu1 %v5961_v41  ;;  %v5984_v41 = vld [vmem:[%s7668_s5 + $0x58] sm:$0xff] }
 0x32b   :  { %2570 = vmatpush.bf16.msrb.mxu2 %v5952_v38  ;;  %2412 = vmatpush.bf16.msrb.mxu0 %v5933_v47  ;;  %v5966_v38 = vld [vmem:[%s7668_s5 + $0x8] sm:$0xff]  ;;  %v5983_v47 = vld [vmem:[%s7668_s5 + $0x50] sm:$0xff] }
 0x32c   :  { %2670 = vmatpush.bf16.msra.mxu3 %v5977_v15 }
 0x32d   :  { %2509 = vmatpush.bf16.msrb.mxu1 %v5960_v45  ;;  %v6012_v45 = vld [vmem:[%s7669_s6 + $0xb8] sm:$0xff] }
 0x32f   :  { %2571 = vmatpush.bf16.msrb.mxu2 %v5951_v44  ;;  %v5996_v44 = vld [vmem:[%s7669_s6 + $0x78] sm:$0xff] }
 0x330   :  { %2671 = vmatpush.bf16.msra.mxu3 %v5976_v20 }
 0x331   :  { %2510 = vmatpush.bf16.msrb.mxu1 %v5959_v48  ;;  %v6011_v48 = vld [vmem:[%s7669_s6 + $0xb0] sm:$0xff] }
 0x333   :  { %2572 = vmatpush.bf16.msrb.mxu2 %v5950_v13  ;;  %v5995_v13 = vld [vmem:[%s7669_s6 + $0x70] sm:$0xff] }
 0x334   :  { %2672 = vmatpush.bf16.msra.mxu3 %v5975_v30 }
 0x335   :  { %2511 = vmatpush.bf16.msrb.mxu1 %v5958_v51  ;;  %v5994_v51 = vld [vmem:[%s7669_s6 + $0x68] sm:$0xff] }
 0x337   :  { %2573 = vmatpush.bf16.msrb.mxu2 %v5949_v50  ;;  %v5982_v50 = vld [vmem:[%s7668_s5 + $0x48] sm:$0xff] }
 0x338   :  { %2673 = vmatpush.bf16.msra.mxu3 %v5974_v36 }
 0x339   :  { %2512 = vmatpush.bf16.msrb.mxu1 %v5957_v56  ;;  %v5993_v56 = vld [vmem:[%s7669_s6 + $0x60] sm:$0xff] }
 0x33c   :  { %2674 = vmatpush.bf16.msra.mxu3 %v5973_v42  ;;  %v6019_v42 = vld [vmem:[%s7668_s5 + $0x70] sm:$0xff] }
 0x379   :  { %v1530_v53 = vpop.f32.mrf.mxu1 }
 0x37a   :  { %v1534_v55 = vadd.f32 %v1530_v53, %v1456_v52  ;;  %v6010_v52 = vld [vmem:[%s7669_s6 + $0xa8] sm:$0xff] }
 0x37b   :  { %v6002_v53 = vld [vmem:[%s7668_s5 + $0xa8] sm:$0xff] }
 0x37c   :  { %6150 = vtanh.f32 %v1534_v55  ;;  %v5981_v55 = vld [vmem:[%s7668_s5 + $0x40] sm:$0xff] }
 0x37d   :  { %v1626_v57 = vpop.f32.mrf.mxu2 }
 0x37f   :  { %v1687_v59 = vpop.f32.mrf.mxu3 }
 0x380   :  { %v1688_v60 = vadd.f32 %v1687_v59, %v1626_v57  ;;  %v6009_v57 = vld [vmem:[%s7669_s6 + $0xa0] sm:$0xff]  ;;  %v5992_v59 = vld [vmem:[%s7669_s6 + $0x58] sm:$0xff] }
 0x381   :  { %v1532_v61 = vpop.f32.mrf.mxu1 }
 0x382   :  { %v6151_v62 = vpop.eup %6150  ;;  %v1695_v63 = vadd.f32 %v6109_v58, %v1688_v60  ;;  %v6001_v58 = vld [vmem:[%s7668_s5 + $0xa0] sm:$0xff]  ;;  %v6000_v60 = vld [vmem:[%s7668_s5 + $0x98] sm:$0xff] }
 0x383   :  { %v1536_v2 = vpack.c.bf16 %v6151_v62, %v6151_v62  ;;  %v2021_v61 = vld [vmem:[#allocation2 + $0x18] sm:$0xf]  ;;  %v5991_v62 = vld [vmem:[%s7669_s6 + $0x50] sm:$0xff] }
 0x384   :  { %6152 = vtanh.f32 %v1695_v63  ;;  %v6007_v63 = vld [vmem:[%s7669_s6 + $0x90] sm:$0xff]  ;;  %v2022_v1 = vunpack.c.l.bf16 %v2021_v61  ;;  %v6024_v61 = vld [vmem:[%s7669_s6 + $0x58] sm:$0xff] }
 0x385   :  { %v1628_v5 = vpop.f32.mrf.mxu2  ;;  %2095 = vmatmul.bf16.vlgmr.msra.gmra.mxu0 %v1536_v2  ;;  %2252 = vmatmul.bf16.vlgmr.msra.gmra.mxu2 %v1536_v2 }
 0x386   :  { %2728 = vmatpush.bf16.msra.mxu0 %v5972_v0  ;;  %2889 = vmatpush.bf16.msra.mxu2 %v5988_v4  ;;  %v5999_v0 = vld [vmem:[%s7668_s5 + $0x90] sm:$0xff]  ;;  %v5990_v4 = vld [vmem:[%s7669_s6 + $0x48] sm:$0xff] }
 0x387   :  { %v1689_v8 = vpop.f32.mrf.mxu3  ;;  %v6006_v5 = vld [vmem:[%s7669_s6 + $0x88] sm:$0xff] }
 0x388   :  { %v5989_v8 = vld [vmem:[%s7669_s6 + $0x40] sm:$0xff] }
 0x389   :  { %v1848_v10 = vpop.f32.mrf.mxu1 }
 0x38a   :  { %v6153_v11 = vpop.eup %6152  ;;  %2729 = vmatpush.bf16.msra.mxu0 %v5971_v6  ;;  %2890 = vmatpush.bf16.msra.mxu2 %v5987_v9  ;;  %v5998_v6 = vld [vmem:[%s7668_s5 + $0x88] sm:$0xff]  ;;  %v6005_v9 = vld [vmem:[%s7669_s6 + $0x80] sm:$0xff] }
 0x38b   :  { %v1697_v16 = vpack.c.bf16 %v6153_v11, %v6153_v11  ;;  %v1787_v21 = vpop.f32.mrf.mxu0 }
 0x38c   :  { %v1849_v54 = vadd.f32 %v1848_v10, %v1787_v21  ;;  %v5997_v10 = vld [vmem:[%s7668_s5 + $0x80] sm:$0xff] }
 0x38d   :  { %2191 = vmatmul.bf16.vlgmr.msra.gmra.mxu1 %v1697_v16 }
 0x38e   :  { %v1856_v18 = vadd.f32 %v6110_v12, %v1849_v54  ;;  %2730 = vmatpush.bf16.msra.mxu0 %v5970_v14  ;;  %2891 = vmatpush.bf16.msra.mxu2 %v5986_v17  ;;  %v6112_v12 = vld [vmem:[%s7670_s7] ss:$0 sm:$0xff]  ;;  %v6020_v17 = vld [vmem:[%s7668_s5 + $0x78] sm:$0xff] }
 0x38f   :  { %2828 = vmatpush.bf16.msra.mxu1 %v5996_v44  ;;  %v6018_v44 = vld [vmem:[%s7668_s5 + $0x68] sm:$0xff] }
 0x390   :  { %6154 = vtanh.f32 %v1856_v18  ;;  %v1948_v22 = vpop.f32.mrf.mxu2 }
 0x391   :  { %v1850_v27 = vpop.f32.mrf.mxu1  ;;  %v2009_v28 = vpop.f32.mrf.mxu3 }
 0x392   :  { %v2010_v29 = vadd.f32 %v2009_v28, %v1948_v22  ;;  %2731 = vmatpush.bf16.msra.mxu0 %v5969_v19  ;;  %2892 = vmatpush.bf16.msra.mxu2 %v5985_v34 }
 0x393   :  { %v1789_v33 = vpop.f32.mrf.mxu0  ;;  %2829 = vmatpush.bf16.msra.mxu1 %v5995_v13  ;;  %v6036_v13 = vld [vmem:[%s7668_s5 + $0xb8] sm:$0xff] }
 0x394   :  { %v2017_v35 = vadd.f32 %v6111_v23, %v2010_v29  ;;  %v6113_v29 = vld [vmem:[%s7670_s7 + $0x1] ss:$0 sm:$0xff] }
 0x395   :  { %2413 = vmatmul.bf16.vlgmr.msrb.gmra.mxu0 %v1697_v16 }
 0x396   :  { %v6155_v3 = vpop.eup %6154  ;;  %6156 = vtanh.f32 %v2017_v35  ;;  %2732 = vmatpush.bf16.msra.mxu0 %v5968_v31  ;;  %2893 = vmatpush.bf16.msra.mxu2 %v5984_v41  ;;  %v6114_v35 = vld [vmem:[%s7670_s7 + $0x2] ss:$0 sm:$0xff] }
 0x397   :  { %v1858_v24 = vpack.c.bf16 %v6155_v3, %v6155_v3  ;;  %2830 = vmatpush.bf16.msra.mxu1 %v5994_v51  ;;  %v6035_v51 = vld [vmem:[%s7668_s5 + $0xb0] sm:$0xff] }
 0x398   :  { %v1950_v39 = vpop.f32.mrf.mxu2 }
 0x399   :  { %v2011_v40 = vpop.f32.mrf.mxu3  ;;  %2352 = vmatmul.bf16.vlgmr.msrb.gmra.mxu3 %v1858_v24  ;;  %2574 = vmatmul.bf16.vlgmr.msrb.gmra.mxu2 %v1858_v24 }
 0x39a   :  { %2733 = vmatpush.bf16.msra.mxu0 %v5967_v32  ;;  %2989 = vmatpush.bf16.msrb.mxu3 %v6012_v45  ;;  %v6043_v45 = vld [vmem:[%s7669_s6 + $0xb0] sm:$0xff] }
 0x39b   :  { %2894 = vmatpush.bf16.msra.mxu2 %v5983_v47  ;;  %2831 = vmatpush.bf16.msra.mxu1 %v5993_v56  ;;  %v6017_v47 = vld [vmem:[%s7668_s5 + $0x60] sm:$0xff]  ;;  %v6034_v56 = vld [vmem:[%s7668_s5 + $0xa8] sm:$0xff] }
 0x39c   :  { %v6157_v25 = vpop.eup %6156 }
 0x39d   :  { %v2019_v26 = vpack.c.bf16 %v6157_v25, %v6157_v25 }
 0x39e   :  { %2734 = vmatpush.bf16.msra.mxu0 %v5966_v38  ;;  %2990 = vmatpush.bf16.msrb.mxu3 %v6011_v48  ;;  %v6042_v48 = vld [vmem:[%s7669_s6 + $0xa8] sm:$0xff] }
 0x39f   :  { %2020 = vst [vmem:[#allocation2 + $0x8] sm:$0xf] %v2019_v26  ;;  %2513 = vmatmul.bf16.vlgmr.msrb.gmra.mxu1 %v2019_v26  ;;  %2895 = vmatpush.bf16.msra.mxu2 %v5982_v50  ;;  %v6016_v50 = vld [vmem:[%s7668_s5 + $0x58] sm:$0xff] }
 0x3a0   :  { %2832 = vmatpush.bf16.msra.mxu1 %v5992_v59  ;;  %v6014_v59 = vld [vmem:[%s7668_s5 + $0x48] sm:$0xff] }
 0x3a2   :  { %2735 = vmatpush.bf16.msra.mxu0 %v5965_v43  ;;  %2991 = vmatpush.bf16.msrb.mxu3 %v6010_v52  ;;  %v6044_v43 = vld [vmem:[%s7669_s6 + $0xb8] sm:$0xff]  ;;  %v6041_v52 = vld [vmem:[%s7669_s6 + $0xa0] sm:$0xff] }
 0x3a3   :  { %2896 = vmatpush.bf16.msra.mxu2 %v5981_v55  ;;  %v6015_v55 = vld [vmem:[%s7668_s5 + $0x50] sm:$0xff] }
 0x3a4   :  { %2833 = vmatpush.bf16.msra.mxu1 %v5991_v62  ;;  %v6013_v62 = vld [vmem:[%s7668_s5 + $0x40] sm:$0xff] }
 0x3a6   :  { %3050 = vmatpush.bf16.msrb.mxu0 %v6004_v46  ;;  %2992 = vmatpush.bf16.msrb.mxu3 %v6009_v57  ;;  %v6028_v46 = vld [vmem:[%s7669_s6 + $0x78] sm:$0xff] }
 0x3a7   :  { %3212 = vmatpush.bf16.msrb.mxu2 %v6020_v17  ;;  %v6040_v57 = vld [vmem:[%s7669_s6 + $0x98] sm:$0xff] }
 0x3a8   :  { %2834 = vmatpush.bf16.msra.mxu1 %v5990_v4  ;;  %v6037_v4 = vld [vmem:[%s7669_s6 + $0x80] sm:$0xff] }
 0x3aa   :  { %3051 = vmatpush.bf16.msrb.mxu0 %v6003_v49  ;;  %2993 = vmatpush.bf16.msrb.mxu3 %v6008_v37  ;;  %v6027_v49 = vld [vmem:[%s7669_s6 + $0x70] sm:$0xff]  ;;  %v6033_v37 = vld [vmem:[%s7668_s5 + $0xa0] sm:$0xff] }
 0x3ab   :  { %3213 = vmatpush.bf16.msrb.mxu2 %v6019_v42 }
 0x3ac   :  { %2835 = vmatpush.bf16.msra.mxu1 %v5989_v8  ;;  %v6030_v8 = vld [vmem:[%s7668_s5 + $0x88] sm:$0xff] }
 0x3ae   :  { %3052 = vmatpush.bf16.msrb.mxu0 %v6002_v53  ;;  %2994 = vmatpush.bf16.msrb.mxu3 %v6007_v63  ;;  %v6026_v53 = vld [vmem:[%s7669_s6 + $0x68] sm:$0xff]  ;;  %v6032_v63 = vld [vmem:[%s7668_s5 + $0x98] sm:$0xff] }
 0x3af   :  { %3214 = vmatpush.bf16.msrb.mxu2 %v6018_v44  ;;  %v3681_v44 = vld [vmem:[%s7664_s1] sm:$0xff] }
 0x3b0   :  { %3151 = vmatpush.bf16.msrb.mxu1 %v6028_v46  ;;  %vm3688_vm0 = vcmp.ge.s32.totalorder %v3681_v44, 0  ;;  %3775 = vperm.xlu1 %6099, %v3681_v44   ;;  %v6052_v46 = vld [vmem:[%s7668_s5 + $0xb8] sm:$0xff] }
 0x3b2   :  { %3053 = vmatpush.bf16.msrb.mxu0 %v6001_v58  ;;  %2995 = vmatpush.bf16.msrb.mxu3 %v6006_v5  ;;  %v6025_v58 = vld [vmem:[%s7669_s6 + $0x60] sm:$0xff] }
 0x3b3   :  { %3215 = vmatpush.bf16.msrb.mxu2 %v6017_v47  ;;  %v6235_v47 = vmov 0.0  }
 0x3b4   :  { %3152 = vmatpush.bf16.msrb.mxu1 %v6027_v49 }
 0x3b6   :  { %3054 = vmatpush.bf16.msrb.mxu0 %v6000_v60  ;;  %2996 = vmatpush.bf16.msrb.mxu3 %v6005_v9  ;;  %v6039_v60 = vld [vmem:[%s7669_s6 + $0x90] sm:$0xff] }
 0x3b7   :  { %3216 = vmatpush.bf16.msrb.mxu2 %v6016_v50  ;;  %v6070_v9 = vld [vmem:[%s7671_s8 + $0x30] sm:$0xff] }
 0x3b8   :  { %3153 = vmatpush.bf16.msrb.mxu1 %v6026_v53  ;;  %v6050_v53 = vld [vmem:[%s7668_s5 + $0xa8] sm:$0xff] }
 0x3ba   :  { %3055 = vmatpush.bf16.msrb.mxu0 %v5999_v0  ;;  %v6038_v0 = vld [vmem:[%s7669_s6 + $0x88] sm:$0xff] }
 0x3bb   :  { %3217 = vmatpush.bf16.msrb.mxu2 %v6015_v55  ;;  %v6061_v55 = vld [vmem:[#allocation2] sm:$0xff] }
 0x3bc   :  { %3154 = vmatpush.bf16.msrb.mxu1 %v6025_v58  ;;  %v6049_v58 = vld [vmem:[%s7668_s5 + $0xa0] sm:$0xff] }
 0x3be   :  { %3056 = vmatpush.bf16.msrb.mxu0 %v5998_v6  ;;  %v6071_v6 = vld [vmem:[%s7671_s8 + $0x38] sm:$0xff] }
 0x3bf   :  { %3218 = vmatpush.bf16.msrb.mxu2 %v6014_v59  ;;  %v6059_v59 = vld [vmem:[%s7669_s6 + $0xb0] sm:$0xff] }
 0x3c0   :  { %3155 = vmatpush.bf16.msrb.mxu1 %v6024_v61  ;;  %v6047_v61 = vld [vmem:[%s7668_s5 + $0x90] sm:$0xff] }
 0x3c2   :  { %3057 = vmatpush.bf16.msrb.mxu0 %v5997_v10  ;;  %v6021_v10 = vld [vmem:[%s7669_s6 + $0x40] sm:$0xff] }
 0x3c3   :  { %3219 = vmatpush.bf16.msrb.mxu2 %v6013_v62  ;;  %v6057_v62 = vld [vmem:[%s7669_s6 + $0xa0] sm:$0xff] }
 0x402   :  { %v2096_v2 = vpop.f32.mrf.mxu0 }
 0x403   :  { %v2100_v7 = vadd.f32 %v2096_v2, %v2022_v1  ;;  %v6023_v1 = vld [vmem:[%s7669_s6 + $0x50] sm:$0xff] }
 0x404   :  { %v6031_v2 = vld [vmem:[%s7668_s5 + $0x90] sm:$0xff]  ;;  %3156 = vmatpush.bf16.msrb.mxu1 %v6023_v1  ;;  %v6045_v1 = vld [vmem:[%s7668_s5 + $0x80] sm:$0xff] }
 0x405   :  { %6158 = vtanh.f32 %v2100_v7  ;;  %v6022_v7 = vld [vmem:[%s7669_s6 + $0x48] sm:$0xff] }
 0x408   :  { %v2253_v11 = vpop.f32.mrf.mxu2  ;;  %3157 = vmatpush.bf16.msrb.mxu1 %v6022_v7  ;;  %v6118_v7 = vld [vmem:[%s7670_s7 + $0x1] ss:$0 sm:$0xff] }
 0x40a   :  { %v2098_v14 = vpop.f32.mrf.mxu0  ;;  %v2192_v15 = vpop.f32.mrf.mxu1 }
 0x40b   :  { %v6159_v16 = vpop.eup %6158  ;;  %v2254_v21 = vadd.f32 %v2253_v11, %v2192_v15  ;;  %v6029_v11 = vld [vmem:[%s7668_s5 + $0x80] sm:$0xff]  ;;  %v6069_v14 = vld [vmem:[%s7671_s8 + $0x28] sm:$0xff] }
 0x40c   :  { %v2102_v54 = vpack.c.bf16 %v6159_v16, %v6159_v16  ;;  %3158 = vmatpush.bf16.msrb.mxu1 %v6021_v10  ;;  %v6068_v15 = vld [vmem:[%s7671_s8 + $0x20] sm:$0xff] }
 0x40d   :  { %v2261_v18 = vadd.f32 %v6112_v12, %v2254_v21  ;;  %v6115_v16 = vld [vmem:[%s7670_s7] ss:$0 sm:$0xff] }
 0x40e   :  { %2736 = vmatmul.bf16.vlgmr.msra.gmra.mxu0 %v2102_v54  ;;  %v6067_v54 = vld [vmem:[%s7671_s8 + $0x18] sm:$0xff] }
 0x40f   :  { %6160 = vtanh.f32 %v2261_v18  ;;  %3373 = vmatpush.bf16.msra.mxu0 %v6036_v13  ;;  %v7464_v13 = vsel %vm3688_vm0, 1.0, %v6235_v47 }
 0x410   :  { %v2255_v19 = vpop.f32.mrf.mxu2  ;;  %v3867_v49 = vsel %vm3844_vm2, %v7464_v13, 0.0 }
 0x411   :  { %v6066_v19 = vld [vmem:[%s7671_s8 + $0x10] sm:$0xff] }
 0x412   :  { %v2194_v20 = vpop.f32.mrf.mxu1  ;;  %v2414_v22 = vpop.f32.mrf.mxu0 }
 0x413   :  { %3374 = vmatpush.bf16.msra.mxu0 %v6035_v51  ;;  %v6051_v51 = vld [vmem:[%s7668_s5 + $0xb0] sm:$0xff] }
 0x415   :  { %v6161_v23 = vpop.eup %6160 }
 0x416   :  { %v2263_v27 = vpack.c.bf16 %v6161_v23, %v6161_v23 }
 0x417   :  { %3375 = vmatpush.bf16.msra.mxu0 %v6034_v56 }
 0x418   :  { %2675 = vmatmul.bf16.vlgmr.msra.gmra.mxu3 %v2263_v27  ;;  %2897 = vmatmul.bf16.vlgmr.msra.gmra.mxu2 %v2263_v27 }
 0x419   :  { %3312 = vmatpush.bf16.msra.mxu3 %v6044_v43  ;;  %3535 = vmatpush.bf16.msra.mxu2 %v6052_v46 }
 0x41a   :  { %v2416_v28 = vpop.f32.mrf.mxu0 }
 0x41b   :  { %3376 = vmatpush.bf16.msra.mxu0 %v6033_v37  ;;  %v6064_v28 = vld [vmem:[%s7671_s8] sm:$0xff]  ;;  %v6048_v37 = vld [vmem:[%s7668_s5 + $0x98] sm:$0xff] }
 0x41c   :  { %v2353_v31 = vpop.f32.mrf.mxu3  ;;  %v2514_v33 = vpop.f32.mrf.mxu1 }
 0x41d   :  { %v2415_v3 = vadd.f32 %v2414_v22, %v2353_v31  ;;  %v2575_v24 = vpop.f32.mrf.mxu2  ;;  %3313 = vmatpush.bf16.msra.mxu3 %v6043_v45  ;;  %v6065_v22 = vld [vmem:[%s7671_s8 + $0x8] sm:$0xff]  ;;  %v6116_v31 = vld [vmem:[%s7670_s7 + $0x1] ss:$0 sm:$0xff]  ;;  %3536 = vmatpush.bf16.msra.mxu2 %v6051_v51 }
 0x41e   :  { %v2576_v39 = vadd.f32 %v2575_v24, %v2514_v33  ;;  %v3682_v45 = vld [vmem:[%s7664_s1 + $0x8] sm:$0xff] }
 0x41f   :  { %v2422_v40 = vadd.f32 %v6113_v29, %v2415_v3  ;;  %3377 = vmatpush.bf16.msra.mxu0 %v6032_v63  ;;  %vm3689_vm1 = vcmp.ge.s32.totalorder %v3682_v45, 0  ;;  %3778 = vperm.xlu2 %6100, %v3682_v45   ;;  %v6046_v63 = vld [vmem:[%s7668_s5 + $0x88] sm:$0xff] }
 0x420   :  { %v2583_v25 = vadd.f32 %v6114_v35, %v2576_v39 }
 0x421   :  { %6162 = vtanh.f32 %v2422_v40  ;;  %3314 = vmatpush.bf16.msra.mxu3 %v6042_v48  ;;  %v6117_v40 = vld [vmem:[%s7670_s7 + $0x2] ss:$0 sm:$0xff]  ;;  %v7467_v48 = vsel %vm3689_vm1, 1.0, %v6235_v47  ;;  %3537 = vmatpush.bf16.msra.mxu2 %v6050_v53 }
 0x422   :  { %6164 = vtanh.f32 %v2583_v25  ;;  %v3868_v50 = vsel %vm3844_vm2, %v7467_v48, 0.0 }
 0x423   :  { %3378 = vmatpush.bf16.msra.mxu0 %v6031_v2  ;;  %v6055_v2 = vld [vmem:[%s7669_s6 + $0x90] sm:$0xff] }
 0x424   :  { %v2355_v26 = vpop.f32.mrf.mxu3  ;;  %v2516_v30 = vpop.f32.mrf.mxu1 }
 0x425   :  { %v2577_v32 = vpop.f32.mrf.mxu2  ;;  %3315 = vmatpush.bf16.msra.mxu3 %v6041_v52  ;;  %v7476_v52 = vadd.f32 %v3868_v50, %v3867_v49  ;;  %3538 = vmatpush.bf16.msra.mxu2 %v6049_v58 }
 0x427   :  { %v6163_v34 = vpop.eup %6162  ;;  %3379 = vmatpush.bf16.msra.mxu0 %v6030_v8 }
 0x428   :  { %v6165_v36 = vpop.eup %6164  ;;  %v2424_v38 = vpack.c.bf16 %v6163_v34, %v6163_v34 }
 0x429   :  { %v2585_v41 = vpack.c.bf16 %v6165_v36, %v6165_v36  ;;  %3316 = vmatpush.bf16.msra.mxu3 %v6040_v57  ;;  %v6060_v57 = vld [vmem:[%s7669_s6 + $0xb8] sm:$0xff]  ;;  %3539 = vmatpush.bf16.msra.mxu2 %v6048_v37 }
 0x42a   :  { %2836 = vmatmul.bf16.vlgmr.msra.gmra.mxu1 %v2424_v38  ;;  %3058 = vmatmul.bf16.vlgmr.msrb.gmra.mxu0 %v2424_v38 }
 0x42b   :  { %2586 = vst [vmem:[#allocation2 + $0xc] sm:$0xf] %v2585_v41  ;;  %2997 = vmatmul.bf16.vlgmr.msrb.gmra.mxu3 %v2585_v41  ;;  %3380 = vmatpush.bf16.msra.mxu0 %v6029_v11 }
 0x42c   :  { %3474 = vmatpush.bf16.msra.mxu1 %v6060_v57 }
 0x42d   :  { %3317 = vmatpush.bf16.msra.mxu3 %v6039_v60  ;;  %v6058_v60 = vld [vmem:[%s7669_s6 + $0xa8] sm:$0xff]  ;;  %3540 = vmatpush.bf16.msra.mxu2 %v6047_v61 }
 0x42e   :  { %v7582_v61 = vld [vmem:[%s7664_s1 + $0x28] sm:$0xff] }
 0x42f   :  { %vm3693_vm13 = vcmp.ge.s32.totalorder %v7582_v61, 0 }
 0x430   :  { %3475 = vmatpush.bf16.msra.mxu1 %v6059_v59 }
 0x431   :  { %3318 = vmatpush.bf16.msra.mxu3 %v6038_v0  ;;  %3541 = vmatpush.bf16.msra.mxu2 %v6046_v63  ;;  %v6056_v0 = vld [vmem:[%s7669_s6 + $0x98] sm:$0xff] }
 0x432   :  { %v6062_v56 = vld [vmem:[#allocation2 + $0x8] sm:$0xff] }
 0x434   :  { %3476 = vmatpush.bf16.msra.mxu1 %v6058_v60  ;;  %v7576_v60 = vld [vmem:[%s7664_s1 + $0x18] sm:$0xff] }
 0x435   :  { %3319 = vmatpush.bf16.msra.mxu3 %v6037_v4  ;;  %3542 = vmatpush.bf16.msra.mxu2 %v6045_v1  ;;  %v6054_v4 = vld [vmem:[%s7669_s6 + $0x88] sm:$0xff]  ;;  %vm3691_vm10 = vcmp.ge.s32.totalorder %v7576_v60, 0 }
 0x438   :  { %3477 = vmatpush.bf16.msra.mxu1 %v6057_v62  ;;  %v3776_v62 = vpop.permute.xlu1 %3775 }
 0x439   :  { %3653 = vmatpush.bf16.msrb.mxu3 %v6071_v6 }
 0x43c   :  { %3478 = vmatpush.bf16.msra.mxu1 %v6056_v0 }
 0x43d   :  { %3654 = vmatpush.bf16.msrb.mxu3 %v6070_v9 }
 0x440   :  { %3479 = vmatpush.bf16.msra.mxu1 %v6055_v2 }
 0x441   :  { %3655 = vmatpush.bf16.msrb.mxu3 %v6069_v14 }
 0x444   :  { %3480 = vmatpush.bf16.msra.mxu1 %v6054_v4 }
 0x445   :  { %3656 = vmatpush.bf16.msrb.mxu3 %v6068_v15 }
 0x449   :  { %3657 = vmatpush.bf16.msrb.mxu3 %v6067_v54 }
 0x44d   :  { %3658 = vmatpush.bf16.msrb.mxu3 %v6066_v19 }
 0x451   :  { %3659 = vmatpush.bf16.msrb.mxu3 %v6065_v22 }
 0x455   :  { %3660 = vmatpush.bf16.msrb.mxu3 %v6064_v28 }
 0x48b   :  { %v2737_v5 = vpop.f32.mrf.mxu0 }
 0x493   :  { %v2739_v12 = vpop.f32.mrf.mxu0 }
 0x49b   :  { %v2676_v21 = vpop.f32.mrf.mxu3  ;;  %v2898_v17 = vpop.f32.mrf.mxu2 }
 0x49c   :  { %v2738_v18 = vadd.f32 %v2737_v5, %v2676_v21  ;;  %v6053_v5 = vld [vmem:[%s7669_s6 + $0x80] sm:$0xff] }
 0x49d   :  { %3481 = vmatpush.bf16.msra.mxu1 %v6053_v5 }
 0x49e   :  { %v2745_v20 = vadd.f32 %v6115_v16, %v2738_v18 }
 0x4a0   :  { %6166 = vtanh.f32 %v2745_v20 }
 0x4a3   :  { %v2678_v23 = vpop.f32.mrf.mxu3  ;;  %v2900_v27 = vpop.f32.mrf.mxu2 }
 0x4a4   :  { %v7529_v27 = vld [vmem:[%s7672_s9] ss:$0 sm:$0xff] }
 0x4a6   :  { %v6167_v29 = vpop.eup %6166 }
 0x4a7   :  { %v2747_v33 = vpack.c.bf16 %v6167_v29, %v6167_v29  ;;  %v2837_v35 = vpop.f32.mrf.mxu1  ;;  %v3059_v3 = vpop.f32.mrf.mxu0 }
 0x4a8   :  { %v2899_v24 = vadd.f32 %v2898_v17, %v2837_v35  ;;  %v6119_v17 = vld [vmem:[%s7670_s7 + $0x2] ss:$0 sm:$0xff] }
 0x4a9   :  { %3220 = vmatmul.bf16.vlgmr.msrb.gmra.mxu2 %v2747_v33 }
 0x4aa   :  { %v2906_v39 = vadd.f32 %v6116_v31, %v2899_v24 }
 0x4ac   :  { %6168 = vtanh.f32 %v2906_v39 }
 0x4ae   :  { %v2998_v25 = vpop.f32.mrf.mxu3 }
 0x4af   :  { %v3060_v26 = vadd.f32 %v3059_v3, %v2998_v25  ;;  %v2839_v30 = vpop.f32.mrf.mxu1  ;;  %v3061_v32 = vpop.f32.mrf.mxu0  ;;  %v7550_v25 = vld [vmem:[%s7664_s1 + $0x20] sm:$0xff] }
 0x4b0   :  { %vm3692_vm12 = vcmp.ge.s32.totalorder %v7550_v25, 0 }
 0x4b1   :  { %v3067_v34 = vadd.f32 %v6117_v40, %v3060_v26  ;;  %v7556_v26 = vld [vmem:[%s7664_s1 + $0x30] sm:$0xff] }
 0x4b2   :  { %v6169_v36 = vpop.eup %6168  ;;  %vm3694_vm14 = vcmp.ge.s32.totalorder %v7556_v26, 0 }
 0x4b3   :  { %v2908_v38 = vpack.c.bf16 %v6169_v36, %v6169_v36  ;;  %6170 = vtanh.f32 %v3067_v34  ;;  %v6121_v34 = vld [vmem:[%s7670_s7 + $0x2] ss:$0 sm:$0xff] }
 0x4b5   :  { %3159 = vmatmul.bf16.vlgmr.msrb.gmra.mxu1 %v2908_v38  ;;  %3381 = vmatmul.bf16.vlgmr.msra.gmra.mxu0 %v2908_v38 }
 0x4b6   :  { %v3000_v41 = vpop.f32.mrf.mxu3 }
 0x4b9   :  { %v6171_v42 = vpop.eup %6170 }
 0x4ba   :  { %v3069_v43 = vpack.c.bf16 %v6171_v42, %v6171_v42 }
 0x4bc   :  { %3070 = vst [vmem:[#allocation2 + $0x10] sm:$0xf] %v3069_v43  ;;  %3320 = vmatmul.bf16.vlgmr.msra.gmra.mxu3 %v3069_v43 }
 0x4cc   :  { %3661 = vmatmul.bf16.vlgmr.msrb.gmra.mxu3 %v6061_v55 }
 0x4dc   :  { %3666 = vmatmul.bf16.gmra.mxu3 %v6062_v56 }
 0x52c   :  { %v3221_v6 = vpop.f32.mrf.mxu2 }
 0x532   :  { %v3160_v8 = vpop.f32.mrf.mxu1  ;;  %v3382_v9 = vpop.f32.mrf.mxu0 }
 0x533   :  { %v3222_v10 = vadd.f32 %v3221_v6, %v3160_v8  ;;  %v3779_v8 = vpop.permute.xlu2 %3778 }
 0x534   :  { %v3223_v11 = vpop.f32.mrf.mxu2 }
 0x535   :  { %v3229_v12 = vadd.f32 %v6118_v7, %v3222_v10 }
 0x537   :  { %6172 = vtanh.f32 %v3229_v12  ;;  %v3772_v12 = vlaneseq }
 0x53a   :  { %v3162_v14 = vpop.f32.mrf.mxu1  ;;  %v3384_v15 = vpop.f32.mrf.mxu0 }
 0x53d   :  { %v6173_v16 = vpop.eup %6172 }
 0x53e   :  { %v3231_v21 = vpack.c.bf16 %v6173_v16, %v6173_v16 }
 0x53f   :  { %v3321_v54 = vpop.f32.mrf.mxu3 }
 0x540   :  { %v3383_v18 = vadd.f32 %v3382_v9, %v3321_v54  ;;  %3543 = vmatmul.bf16.vlgmr.msra.gmra.mxu2 %v3231_v21 }
 0x542   :  { %v3390_v19 = vadd.f32 %v6119_v17, %v3383_v18  ;;  %v7600_v17 = vand.u32 127, %v3772_v12 }
 0x544   :  { %6174 = vtanh.f32 %v3390_v19  ;;  %vm3795_vm3 = vcmp.eq.s32.totalorder %v7600_v17, %v3776_v62  ;;  %vm3796_vm4 = vcmp.eq.s32.totalorder %v7600_v17, %v3779_v8 }
 0x547   :  { %v3323_v20 = vpop.f32.mrf.mxu3 }
 0x54a   :  { %v6175_v22 = vpop.eup %6174 }
 0x54b   :  { %v3392_v23 = vpack.c.bf16 %v6175_v22, %v6175_v22 }
 0x54d   :  { %3393 = vst [vmem:[#allocation2 + $0x14] sm:$0xf] %v3392_v23  ;;  %3482 = vmatmul.bf16.vlgmr.msra.gmra.mxu1 %v3392_v23 }
 0x54f   :  { %v3662_v28 = vpop.f32.mrf.mxu3 }
 0x550   :  { %v7532_v29 = vadd.f32 %v7529_v27, %v3662_v28 }
 0x552   :  { %3709 = vmax.xlane.f32.xlu0 %v7532_v29  ;;  %v3802_v18 = vsel %vm3795_vm3, %v7532_v29, 0.0  ;;  %vm3908_vm3 = vcmask 0  }
 0x554   :  { %v6063_v31 = vld [vmem:[#allocation2 + $0x10] sm:$0xff] }
 0x555   :  { %3671 = vmatmul.bf16.gmra.mxu3 %v6063_v31 }
 0x557   :  { %v3664_v33 = vpop.f32.mrf.mxu3 }
 0x558   :  { %v7536_v35 = vadd.f32 %v7529_v27, %v3664_v33 }
 0x55a   :  { %3711 = vmax.xlane.f32.xlu0 %v7536_v35  ;;  %v3803_v28 = vsel %vm3796_vm4, %v7536_v35, 0.0 }
 0x55f   :  { %v3667_v3 = vpop.f32.mrf.mxu3 }
 0x560   :  { %v7540_v24 = vadd.f32 %v7529_v27, %v3667_v3 }
 0x562   :  { %3713 = vmax.xlane.f32.xlu1 %v7540_v24 }
 0x567   :  { %v3669_v39 = vpop.f32.mrf.mxu3 }
 0x568   :  { %v7544_v40 = vadd.f32 %v7529_v27, %v3669_v39 }
 0x56a   :  { %3715 = vmax.xlane.f32.xlu1 %v7544_v40 }
 0x583   :  { %3787 = vperm.xlu1 %6099, %v7550_v25   ;;  %v5728_v25 = vsel %vm3693_vm13, 1.0, %v6235_v47 }
 0x58b   :  { %3793 = vperm.xlu1 %6099, %v7556_v26  }
 0x5c3   :  { %v3544_v30 = vpop.f32.mrf.mxu2 }
 0x5c5   :  { %v7559_v32 = vpop.xlane.xlu0 %3709 }
 0x5c6   :  { %v3723_v0 = vsub.f32 %v7532_v29, %v7559_v32 }
 0x5c8   :  { %v3730_v1 = vmul.f32 1.442695, %v3723_v0 }
 0x5ca   :  { %v3483_v36 = vpop.f32.mrf.mxu1 }
 0x5cb   :  { %v3545_v38 = vadd.f32 %v3544_v30, %v3483_v36  ;;  %v3546_v41 = vpop.f32.mrf.mxu2 }
 0x5cd   :  { %v3552_v42 = vadd.f32 %v6121_v34, %v3545_v38  ;;  %v7564_v43 = vpop.xlane.xlu0 %3711 }
 0x5ce   :  { %v3724_v44 = vsub.f32 %v7536_v35, %v7564_v43 }
 0x5cf   :  { %6176 = vtanh.f32 %v3552_v42 }
 0x5d0   :  { %v3732_v45 = vmul.f32 1.442695, %v3724_v44 }
 0x5d2   :  { %6178 = vpow2.f32 %v3732_v45  ;;  %v3485_v46 = vpop.f32.mrf.mxu1 }
 0x5d3   :  { %6180 = vpow2.f32 %v3730_v1 }
 0x5d5   :  { %v6177_v49 = vpop.eup %6176  ;;  %v7585_v63 = vpop.xlane.xlu1 %3713 }
 0x5d6   :  { %v3554_v50 = vpack.c.bf16 %v6177_v49, %v6177_v49  ;;  %v3725_v35 = vsub.f32 %v7540_v24, %v7585_v63 }
 0x5d8   :  { %v6179_v51 = vpop.eup %6178  ;;  %3555 = vst [vmem:[#allocation2 + $0x18] sm:$0xf] %v3554_v50  ;;  %v3672_v53 = vpop.f32.mrf.mxu3 }
 0x5d9   :  { %3746 = vadd.xlane.f32.xlu1 %v6179_v51  ;;  %v3673_v55 = vadd.f32 %v7529_v27, %v3672_v53  ;;  %v6181_v6 = vpop.eup %6180 }
 0x5db   :  { %3717 = vmax.xlane.f32.xlu2 %v3673_v55 }
 0x5dd   :  { %v7589_v2 = vpop.xlane.xlu1 %3715 }
 0x5de   :  { %v3726_v4 = vsub.f32 %v7544_v40, %v7589_v2 }
 0x5df   :  { %v3562_v56 = vld [vmem:[#allocation2 + $0x18] sm:$0xf] }
 0x5e0   :  { %v3596_v57 = vunpack.c.l.b16 %v3562_v56  ;;  %v3674_v58 = vpop.f32.mrf.mxu3  ;;  %v3736_v5 = vmul.f32 1.442695, %v3726_v4 }
 0x5e1   :  { %v7570_v59 = vadd.f32 %v7529_v27, %v3674_v58 }
 0x5e2   :  { %v3600_v37 = vpack.c.b16 %v3596_v57, %v3596_v57  ;;  %6182 = vpow2.f32 %v3736_v5 }
 0x5e3   :  { %3719 = vmax.xlane.f32.xlu2 %v7570_v59 }
 0x5e4   :  { %3676 = vmatmul.bf16.gmra.mxu3 %v3600_v37 }
 0x5e8   :  { %v6183_v7 = vpop.eup %6182 }
 0x5f5   :  { %v3788_v20 = vpop.permute.xlu1 %3787 }
 0x5f6   :  { %vm3799_vm6 = vcmp.eq.s32.totalorder %v7600_v17, %v3788_v20 }
 0x5f7   :  { %v3806_v3 = vsel %vm3799_vm6, %v3673_v55, 0.0 }
 0x5fb   :  { %3784 = vperm.xlu2 %6100, %v7576_v60  }
 0x5fd   :  { %v3794_v33 = vpop.permute.xlu1 %3793 }
 0x5fe   :  { %vm3801_vm7 = vcmp.eq.s32.totalorder %v7600_v17, %v3794_v33 }
 0x603   :  { %3790 = vperm.xlu2 %6100, %v7582_v61  }
 0x62c   :  { %3744 = vadd.xlane.f32.xlu2 %v6181_v6 }
 0x634   :  { %3750 = vadd.xlane.f32.xlu2 %v6183_v7 }
 0x64c   :  { %v3747_v38 = vpop.xlane.xlu1 %3746 }
 0x64e   :  { %v7593_v9 = vpop.xlane.xlu2 %3717 }
 0x64f   :  { %v3727_v10 = vsub.f32 %v3673_v55, %v7593_v9 }
 0x651   :  { %v3738_v11 = vmul.f32 1.442695, %v3727_v10 }
 0x653   :  { %6184 = vpow2.f32 %v3738_v11 }
 0x656   :  { %v7596_v14 = vpop.xlane.xlu2 %3719 }
 0x657   :  { %v3728_v15 = vsub.f32 %v7570_v59, %v7596_v14 }
 0x659   :  { %v6185_v16 = vpop.eup %6184  ;;  %v3740_v21 = vmul.f32 1.442695, %v3728_v15 }
 0x65a   :  { %3752 = vadd.xlane.f32.xlu1 %v6185_v16 }
 0x65b   :  { %6186 = vpow2.f32 %v3740_v21  ;;  %v3876_v21 = vsel %vm3844_vm2, %v5728_v25, 0.0 }
 0x65e   :  { %v3785_v19 = vpop.permute.xlu2 %3784 }
 0x65f   :  { %vm3798_vm5 = vcmp.eq.s32.totalorder %v7600_v17, %v3785_v19 }
 0x660   :  { %v3805_v31 = vsel %vm3798_vm5, %v7544_v40, 0.0  ;;  %v3734_v40 = vmul.f32 1.442695, %v3725_v35 }
 0x661   :  { %v6187_v54 = vpop.eup %6186 }
 0x662   :  { %3809 = vadd.xlane.f32.xlu1 %v3802_v18  ;;  %3754 = vadd.xlane.f32.xlu2 %v6187_v54  ;;  %6188 = vpow2.f32 %v3734_v40 }
 0x666   :  { %v3791_v34 = vpop.permute.xlu2 %3790 }
 0x667   :  { %v3677_v22 = vpop.f32.mrf.mxu3  ;;  %vm3800_vm9 = vcmp.eq.s32.totalorder %v7600_v17, %v3791_v34 }
 0x668   :  { %v3678_v23 = vadd.f32 %v7529_v27, %v3677_v22  ;;  %v3683_v27 = vld [vmem:[%s7664_s1 + $0x10] sm:$0xff]  ;;  %v6189_v30 = vpop.eup %6188 }
 0x669   :  { %vm3690_vm11 = vcmp.ge.s32.totalorder %v3683_v27, 0 }
 0x66a   :  { %3721 = vmax.xlane.f32.xlu0 %v3678_v23  ;;  %3811 = vadd.xlane.f32.xlu2 %v3803_v28  ;;  %v3808_v39 = vsel %vm3801_vm7, %v3678_v23, 0.0  ;;  %v5725_v10 = vsel %vm3690_vm11, 1.0, %v6235_v47 }
 0x66b   :  { %3815 = vadd.xlane.f32.xlu1 %v3805_v31  ;;  %v3870_v12 = vsel %vm3844_vm2, %v5725_v10, 0.0 }
 0x66c   :  { %v3871_v15 = vadd.f32 %v3870_v12, %v7476_v52 }
 0x66f   :  { %v3679_v29 = vpop.f32.mrf.mxu3 }
 0x672   :  { %3817 = vadd.xlane.f32.xlu2 %v3806_v3 }
 0x673   :  { %3821 = vadd.xlane.f32.xlu1 %v3808_v39 }
 0x67e   :  { %3781 = vperm.xlu0 %6101, %v3683_v27  }
 0x69f   :  { %v3745_v36 = vpop.xlane.xlu2 %3744 }
 0x6a0   :  { %6190 = vlog2.f32 %v3745_v36 }
 0x6a1   :  { %6192 = vlog2.f32 %v3747_v38 }
 0x6a6   :  { %v6191_v44 = vpop.eup %6190 }
 0x6a7   :  { %v3751_v41 = vpop.xlane.xlu2 %3750  ;;  %v3759_v45 = vmul.f32 0.6931472, %v6191_v44  ;;  %v6193_v46 = vpop.eup %6192 }
 0x6a8   :  { %3748 = vadd.xlane.f32.xlu0 %v6189_v30  ;;  %v3761_v51 = vmul.f32 0.6931472, %v6193_v46 }
 0x6a9   :  { %v3823_v53 = vadd.f32 %v3759_v45, %v7559_v32 }
 0x6aa   :  { %v3824_v57 = vadd.f32 %v3761_v51, %v7564_v43 }
 0x6cd   :  { %v3753_v42 = vpop.xlane.xlu1 %3752 }
 0x6d5   :  { %v3755_v49 = vpop.xlane.xlu2 %3754  ;;  %v3810_v50 = vpop.xlane.xlu1 %3809 }
 0x6d6   :  { %v3830_v55 = vsub.f32 %v3823_v53, %v3810_v50 }
 0x6d8   :  { %v3837_v62 = vmul.f32 %v7464_v13, %v3830_v55  ;;  %v3807_v13 = vsel %vm3800_vm9, %v7570_v59, 0.0 }
 0x6da   :  { %v3845_v5 = vsel %vm3844_vm2, %v3837_v62, 0.0 }
 0x6dd   :  { %v7617_v56 = vpop.xlane.xlu0 %3721  ;;  %v3812_v37 = vpop.xlane.xlu2 %3811 }
 0x6de   :  { %v3729_v58 = vsub.f32 %v3678_v23, %v7617_v56  ;;  %v3831_v0 = vsub.f32 %v3824_v57, %v3812_v37  ;;  %v3816_v33 = vpop.xlane.xlu1 %3815 }
 0x6e0   :  { %v3742_v1 = vmul.f32 1.442695, %v3729_v58  ;;  %v3838_v4 = vmul.f32 %v7467_v48, %v3831_v0  ;;  %v5726_v48 = vsel %vm3691_vm10, 1.0, %v6235_v47 }
 0x6e1   :  { %v3872_v11 = vsel %vm3844_vm2, %v5726_v48, 0.0 }
 0x6e2   :  { %6194 = vpow2.f32 %v3742_v1  ;;  %v3846_v6 = vsel %vm3844_vm2, %v3838_v4, 0.0  ;;  %v3873_v60 = vadd.f32 %v3872_v11, %v3871_v15 }
 0x6e3   :  { %v7625_v32 = vadd.f32 %v3846_v6, %v3845_v5  ;;  %6196 = vlog2.f32 %v3751_v41 }
 0x6e4   :  { %6198 = vlog2.f32 %v3753_v42 }
 0x6e5   :  { %v3818_v3 = vpop.xlane.xlu2 %3817 }
 0x6e8   :  { %v6195_v7 = vpop.eup %6194 }
 0x6e9   :  { %3756 = vadd.xlane.f32.xlu0 %v6195_v7  ;;  %v6197_v61 = vpop.eup %6196 }
 0x6ea   :  { %v6199_v22 = vpop.eup %6198  ;;  %v3765_v23 = vmul.f32 0.6931472, %v6197_v61 }
 0x6eb   :  { %v3767_v28 = vmul.f32 0.6931472, %v6199_v22 }
 0x6ec   :  { %v3826_v29 = vadd.f32 %v3765_v23, %v7589_v2  ;;  %v3822_v2 = vpop.xlane.xlu1 %3821 }
 0x6ed   :  { %v3827_v27 = vadd.f32 %v3767_v28, %v7593_v9 }
 0x6ee   :  { %v3833_v39 = vsub.f32 %v3826_v29, %v3816_v33 }
 0x6ef   :  { %v3834_v36 = vsub.f32 %v3827_v27, %v3818_v3 }
 0x6f0   :  { %v3782_v8 = vpop.permute.xlu0 %3781  ;;  %v3840_v42 = vmul.f32 %v5726_v48, %v3833_v39 }
 0x6f1   :  { %vm3797_vm8 = vcmp.eq.s32.totalorder %v7600_v17, %v3782_v8  ;;  %v5729_v17 = vsel %vm3694_vm14, 1.0, %v6235_v47 }
 0x6f2   :  { %v3804_v43 = vsel %vm3797_vm8, %v7540_v24, 0.0  ;;  %v5727_v24 = vsel %vm3692_vm12, 1.0, %v6235_v47  ;;  %v3878_v18 = vsel %vm3844_vm2, %v5729_v17, 0.0  ;;  %v3850_v9 = vsel %vm3844_vm2, %v3840_v42, 0.0 }
 0x6f3   :  { %3813 = vadd.xlane.f32.xlu0 %v3804_v43  ;;  %v3874_v59 = vsel %vm3844_vm2, %v5727_v24, 0.0  ;;  %v3841_v46 = vmul.f32 %v5727_v24, %v3834_v36 }
 0x6f4   :  { %v3875_v16 = vadd.f32 %v3874_v59, %v3873_v60 }
 0x6f5   :  { %v3852_v57 = vsel %vm3844_vm2, %v3841_v46, 0.0 }
 0x6f6   :  { %v3877_v54 = vadd.f32 %v3876_v21, %v3875_v16 }
 0x6f8   :  { %v3879_v19 = vadd.f32 %v3878_v18, %v3877_v54 }
 0x6fb   :  { %3819 = vadd.xlane.f32.xlu0 %v3807_v13 }
 0x703   :  { %3880 = vadd.xlane.f32.xlu0 %v3879_v19 }
 0x71b   :  { %v3749_v52 = vpop.xlane.xlu0 %3748 }
 0x71c   :  { %6200 = vlog2.f32 %v3749_v52 }
 0x722   :  { %v6201_v26 = vpop.eup %6200 }
 0x723   :  { %v3763_v31 = vmul.f32 0.6931472, %v6201_v26 }
 0x725   :  { %v3825_v40 = vadd.f32 %v3763_v31, %v7585_v63 }
 0x75c   :  { %v3757_v20 = vpop.xlane.xlu0 %3756 }
 0x75d   :  { %6202 = vlog2.f32 %v3757_v20 }
 0x75e   :  { %6204 = vlog2.f32 %v3755_v49 }
 0x763   :  { %v6203_v47 = vpop.eup %6202 }
 0x764   :  { %v3771_v35 = vmul.f32 0.6931472, %v6203_v47  ;;  %v6205_v30 = vpop.eup %6204 }
 0x765   :  { %v3769_v41 = vmul.f32 0.6931472, %v6205_v30 }
 0x766   :  { %v3814_v34 = vpop.xlane.xlu0 %3813  ;;  %v3829_v44 = vadd.f32 %v3771_v35, %v7617_v56 }
 0x767   :  { %v3832_v38 = vsub.f32 %v3825_v40, %v3814_v34  ;;  %v3828_v63 = vadd.f32 %v3769_v41, %v7596_v14 }
 0x768   :  { %v3836_v51 = vsub.f32 %v3829_v44, %v3822_v2 }
 0x769   :  { %v3839_v45 = vmul.f32 %v5725_v10, %v3832_v38 }
 0x76a   :  { %v3843_v56 = vmul.f32 %v5729_v17, %v3836_v51 }
 0x76b   :  { %v3848_v49 = vsel %vm3844_vm2, %v3839_v45, 0.0 }
 0x76c   :  { %v3849_v50 = vadd.f32 %v3848_v49, %v7625_v32  ;;  %v3856_v4 = vsel %vm3844_vm2, %v3843_v56, 0.0 }
 0x76e   :  { %v3820_v53 = vpop.xlane.xlu0 %3819  ;;  %v3851_v55 = vadd.f32 %v3850_v9, %v3849_v50 }
 0x76f   :  { %v3835_v58 = vsub.f32 %v3828_v63, %v3820_v53 }
 0x770   :  { %v3853_v37 = vadd.f32 %v3852_v57, %v3851_v55 }
 0x771   :  { %v3842_v62 = vmul.f32 %v5728_v25, %v3835_v58 }
 0x773   :  { %v3854_v0 = vsel %vm3844_vm2, %v3842_v62, 0.0 }
 0x774   :  { %v3855_v1 = vadd.f32 %v3854_v0, %v3853_v37 }
 0x776   :  { %v3857_v5 = vadd.f32 %v3856_v4, %v3855_v1  ;;  %v3881_v6 = vpop.xlane.xlu0 %3880 }
 0x777   :  { %v3882_v32 = vrot.slane %v3881_v6, 4 }
 0x778   :  { %3858 = vadd.xlane.f32.xlu2 %v3857_v5 }
 0x779   :  { %v3883_v7 = vadd.f32 %v3882_v32, %v3881_v6 }
 0x77b   :  { %v3884_v8 = vrot.slane %v3883_v7, 2 }
 0x77d   :  { %v3885_v48 = vadd.f32 %v3884_v8, %v3883_v7 }
 0x77f   :  { %v3886_v12 = vrot.slane %v3885_v48, 1 }
 0x781   :  { %v3887_v59 = vadd.f32 %v3886_v12, %v3885_v48 }
 0x7eb   :  { %v3859_v14 = vpop.xlane.xlu2 %3858 }
 0x7ec   :  { %v3860_v43 = vrot.slane %v3859_v14, 4 }
 0x7ee   :  { %v3861_v13 = vadd.f32 %v3860_v43, %v3859_v14 }
 0x7f0   :  { %v3862_v10 = vrot.slane %v3861_v13, 2 }
 0x7f2   :  { %v3863_v11 = vadd.f32 %v3862_v10, %v3861_v13 }
 0x7f4   :  { %v3864_v24 = vrot.slane %v3863_v11, 1 }
 0x7f6   :  { %v3865_v15 = vadd.f32 %v3864_v24, %v3863_v11 }
 0x7f8   :  { %6089 = vpush %v3865_v15 }
 0x7f9   :  { %6091 = vpush %v3887_v59 }
 0x829   :  { %s7657_s1 = spop %6089 }
 0x82a   :  { %s6092_s8 = spop %6091 }
 0x82b   :  { %s3889_s22 = smax.f32 %s6236_s21, %s6092_s8 }
 0x82c   :  { %v3890_v60 = vstv %s3889_s22 }
 0x82d   :  { %6206 = vrcp.f32 %v3890_v60  ;;  %v3902_v17 = vand.u32 2147483648, %v3890_v60  ;;  %v3900_v18 = vand.u32 2147483647, %v3890_v60  ;;  %vm3896_vm0 = vweird.f32 %v3890_v60 }
 0x82f   :  { %v3903_v52 = vor.u32 1.1754944e-38, %v3902_v17  ;;  %vm3901_vm2 = vcmp.eq.f32.partialorder %v3900_v18, 8.507059e+37 }
 0x833   :  { %v6207_v25 = vpop.eup %6206 }
 0x834   :  { %v3892_v16 = vmul.f32 %v6207_v25, %v3890_v60  ;;  %vm3897_vm15 = vweird.f32 %v6207_v25 }
 0x835   :  { %vm3898_vm1 = vmor %vm3896_vm0, %vm3897_vm15 }
 0x836   :  { %v3893_v21 = vsub.f32 1.0, %v3892_v16 }
 0x838   :  { %v3894_v54 = vmul.f32 %v6207_v25, %v3893_v21 }
 0x83a   :  { %v3895_v19 = vadd.f32 %v6207_v25, %v3894_v54 }
 0x83c   :  { %v3899_v61 = vsel %vm3898_vm1, %v6207_v25, %v3895_v19 }
 0x83d   :  { %v3904_v20 = vsel %vm3901_vm2, %v3903_v52, %v3899_v61 }
 0x83e   :  { %6093 = vpush %v3904_v20 }
 0x86f   :  { %s6094_s26 = spop %6093 }
 0x870   :  { %s3906_s27 = smul.f32 %s6094_s26, %s7657_s1 }
 0x872   :  { %v3907_v22 = vstv %s3906_s27 }
 0x873   :  { %3909 = vst.msk [vmem:[#allocation3] sm:$0x1] %vm3908_vm3, %v3907_v22 }
 0x874   :  { %3920 = dma.vmem_to_hbm [thread:$0]  %s3916_s23, 16, %s3918_s25, [#allocation4]  }
 0x875   :  { %6232 = dma.done.wait [#allocation4], 16  }
 0x876   :  { %6233 = vsyncadd [#allocation4], 4294967280 }
 0x877   :  { %3925 = vsyncpa [#allocation4], 1 }

</bundles_post_ra>
